<compile_context>
chip_gen: v7x
topology: tpu7x:2x2x1
jax: 0.10.0
libtpu: 0.0.40
codegen_flags: <defaults>
</compile_context>

<pallas_src>
import functools

import jax
import jax.numpy as jnp
from jax import lax
from jax.experimental import pallas as pl
from jax.experimental.pallas import tpu as pltpu

_EPS = 1e-9


# ----------------------------- Pallas kernels -----------------------------

def _gcn_stack_kernel(a_ref, x_ref, *rest):
    """All L GCN layers: h_{l} = relu(A_norm @ (h_{l-1} @ W_l) + b_l).

    rest = (w0, b0, w1, b1, ..., out_ref); out is hidden_cat (L*N, Fg)
    (same row ordering as torch.cat of the per-layer hidden representations).
    """
    out_ref = rest[-1]
    wb = rest[:-1]
    num_layers = len(wb) // 2
    a = a_ref[...]
    h = x_ref[...]
    n = a.shape[0]
    for l in range(num_layers):
        xw = jnp.dot(h, wb[2 * l][...], preferred_element_type=jnp.float32)
        h = jnp.maximum(
            jnp.dot(a, xw, preferred_element_type=jnp.float32) + wb[2 * l + 1][...],
            0.0)
        out_ref[l * n:(l + 1) * n, :] = h


def _primary_caps_kernel(h_ref, w_ref, b_ref, o_ref, *, units, dim):
    """PrimaryCapsuleLayer: all `units` Conv1d units as one matmul + per-unit squash.

    h_ref: (L*Fg, N)  -- hidden representations in the torch (1, L, Fg, N) view layout
    w_ref: (units*dim, L*Fg), rows ordered (unit, capsule_dim)
    b_ref: (units*dim, 1)
    o_ref: (units*dim, N)  squashed capsules (torch (1, L, D*N) flat layout)
    """
    q = jnp.dot(w_ref[...], h_ref[...], preferred_element_type=jnp.float32) + b_ref[...]
    for u in range(units):
        blk = q[u * dim:(u + 1) * dim, :]
        mag = jnp.sum(blk * blk, axis=1, keepdims=True)
        mag = jnp.sum(mag, axis=0, keepdims=True)                       # (1, 1)
        factor = (mag / (1.0 + mag)) * lax.rsqrt(mag + _EPS)
        o_ref[u * dim:(u + 1) * dim, :] = blk * factor


def _dynamic_routing(u_big, *, I, J, U, iters):
    """SecondaryCapsuleLayer dynamic routing on a pre-built u_hat.

    u_big: (N, I*J*U) with columns ordered (i, j, u); u_big[n, i*(J*U)+j*U+u]
           = sum_l x[i, n, l] * W[i, j, u, l].
    Returns v: (N, J*U), columns ordered (j, u).
    Only VPU/XLU ops inside the routing loop (no selection-matrix MXU pushes).
    """
    n_nodes = u_big.shape[0]
    m = J * U
    parts = [u_big[:, i * m:(i + 1) * m] for i in range(I)]             # I x (N, M)

    b = jnp.zeros((I, J), jnp.float32)
    v = None
    for _ in range(iters):
        # softmax of routing logits over the J output capsules (torch dim=2)
        bm = jnp.max(b, axis=1, keepdims=True)
        e = jnp.exp(b - bm)
        c = e / jnp.sum(e, axis=1, keepdims=True)                       # (I, J)
        # broadcast c over the u axis -> (I, J*U), columns ordered (j, u)
        cb = jnp.concatenate(
            [jnp.broadcast_to(c[:, j:j + 1], (I, U)) for j in range(J)], axis=1)
        # s[n, (j,u)] = sum_i c[i, j] * u_hat[i, n, (j,u)]
        s = parts[0] * cb[0:1, :]
        for i in range(1, I):
            s = s + parts[i] * cb[i:i + 1, :]
        # squash with magnitude over the J axis (faithful to the reference squash dim=2)
        ss = s * s
        mag_u = ss[:, 0:U]
        for j in range(1, J):
            mag_u = mag_u + ss[:, j * U:(j + 1) * U]                    # (N, U)
        mag = jnp.concatenate([mag_u] * J, axis=1)                      # (N, J*U)
        v = (mag / (1.0 + mag)) * s * lax.rsqrt(mag + _EPS)
        # b[i, j] += mean_n sum_u u_hat[i, n, (j,u)] * v[n, (j,u)]
        upd_rows = []
        for i in range(I):
            t = jnp.sum(parts[i] * v, axis=0, keepdims=True)            # (1, J*U)
            upd_rows.append(jnp.concatenate(
                [jnp.sum(t[:, j * U:(j + 1) * U], axis=1, keepdims=True)
                 for j in range(J)], axis=1))                           # (1, J)
        b = b + jnp.concatenate(upd_rows, axis=0) / float(n_nodes)
    return v


def _caps_head_kernel(xatt_ref, feat_ref, aw1_ref, ab1_ref, aw2_ref, ab2_ref,
                      wg1_ref, wg2_ref, rw1_ref, rb1_ref, rw2_ref, rb2_ref,
                      rw3_ref, rb3_ref, mean_ref, loss_ref, *, D, C, T, iters):
    """Attention + graph/class dynamic routing + class mean + reconstruction loss."""
    x = xatt_ref[...]                                                   # (N, L*D)

    # --- Attention: two linears, softmax over nodes (dim=0), rescale ---
    h1 = jnp.maximum(
        jnp.dot(x, aw1_ref[...], preferred_element_type=jnp.float32) + ab1_ref[...],
        0.0)
    score = jnp.dot(h1, aw2_ref[...], preferred_element_type=jnp.float32) + ab2_ref[...]
    sme = jnp.exp(score - jnp.max(score, axis=0, keepdims=True))
    sm = sme / jnp.sum(sme, axis=0, keepdims=True)
    resc = x * sm                                                       # (N, L*D)

    # --- Graph capsules (routing #1): u_hat built with one lane-dense matmul ---
    big1 = jnp.dot(resc, wg1_ref[...], preferred_element_type=jnp.float32)   # (N, D*C*D)
    v_graph = _dynamic_routing(big1, I=D, J=C, U=D, iters=iters)             # (N, C*D)

    # --- Class capsules (routing #2) ---
    big2 = jnp.dot(v_graph, wg2_ref[...], preferred_element_type=jnp.float32)  # (N, C*T*D)
    v_class = _dynamic_routing(big2, I=C, J=T, U=D, iters=iters)               # (N, T*D)

    # --- class capsule output: mean over nodes ---
    mean_row = jnp.mean(v_class, axis=0, keepdims=True)                 # (1, T*D), cols (t, d)
    mean_ref[...] = mean_row

    # --- reconstruction: keep only the strongest class capsule (first argmax, like torch) ---
    sq = mean_row * mean_row
    mags = [jnp.sum(sq[:, t * D:(t + 1) * D], axis=1, keepdims=True) for t in range(T)]
    mmax = mags[0]
    for t in range(1, T):
        mmax = jnp.maximum(mmax, mags[t])
    chosen = jnp.zeros((1, 1), jnp.float32)
    pieces = []
    for t in range(T):
        is_max = (mags[t] >= mmax).astype(jnp.float32)
        keep = is_max * jnp.maximum(1.0 - chosen, 0.0)                  # first max only
        pieces.append(mean_row[:, t * D:(t + 1) * D] * keep)
        chosen = chosen + is_max
    masked = jnp.concatenate(pieces, axis=1)                            # (1, T*D)
    # TODO(synk): reference also computes normalized feature_counts here but never uses it.

    r = jnp.maximum(
        jnp.dot(masked, rw1_ref[...], preferred_element_type=jnp.float32) + rb1_ref[...],
        0.0)
    r = jnp.maximum(
        jnp.dot(r, rw2_ref[...], preferred_element_type=jnp.float32) + rb2_ref[...],
        0.0)
    logits = jnp.dot(r, rw3_ref[...], preferred_element_type=jnp.float32) + rb3_ref[...]
    le = jnp.exp(logits - jnp.max(logits, axis=1, keepdims=True))
    recon = le / jnp.sum(le, axis=1, keepdims=True)                     # (1, F)

    dlt = feat_ref[...] - recon                                         # (N, F) broadcast
    loss_ref[0, 0] = jnp.sum(dlt * dlt)


# ----------------------------- wrappers -----------------------------------

_VMEM_SPEC = pl.BlockSpec(memory_space=pltpu.MemorySpace.VMEM)
_SMEM_SPEC = pl.BlockSpec(memory_space=pltpu.MemorySpace.SMEM)


def pallas_gcn_stack(a_norm, x, ws, bs):
    n = x.shape[0]
    fg = ws[0].shape[1]
    num_layers = len(ws)
    ins = [a_norm, x]
    for w, b in zip(ws, bs):
        ins += [w, b.reshape(1, -1)]
    return pl.pallas_call(
        _gcn_stack_kernel,
        out_shape=jax.ShapeDtypeStruct((num_layers * n, fg), jnp.float32),
        in_specs=[_VMEM_SPEC] * len(ins),
        out_specs=_VMEM_SPEC,
    )(*ins)


def pallas_primary_caps(h_resh, wp_t, bp, *, units, dim):
    n = h_resh.shape[1]
    rows = wp_t.shape[0]
    return pl.pallas_call(
        functools.partial(_primary_caps_kernel, units=units, dim=dim),
        out_shape=jax.ShapeDtypeStruct((rows, n), jnp.float32),
        in_specs=[_VMEM_SPEC] * 3,
        out_specs=_VMEM_SPEC,
    )(h_resh, wp_t, bp)


def pallas_caps_head(x_att, features, aw1, ab1, aw2, ab2, wbig1, wbig2,
                     rw1, rb1, rw2, rb2, rw3, rb3, *, D, C, T, iters=3):
    ins = (x_att, features,
           aw1, ab1.reshape(1, -1), aw2, ab2.reshape(1, -1),
           wbig1, wbig2,
           rw1, rb1.reshape(1, -1), rw2, rb2.reshape(1, -1), rw3, rb3.reshape(1, -1))
    mean_row, loss = pl.pallas_call(
        functools.partial(_caps_head_kernel, D=D, C=C, T=T, iters=iters),
        out_shape=(jax.ShapeDtypeStruct((1, T * D), jnp.float32),
                   jax.ShapeDtypeStruct((1, 1), jnp.float32)),
        in_specs=[_VMEM_SPEC] * len(ins),
        out_specs=(_VMEM_SPEC, _SMEM_SPEC),
    )(*ins)
    return mean_row, loss


# ----------------------------- model glue ----------------------------------

def normalized_adjacency(edges, n):
    a = jnp.zeros((n, n), jnp.float32).at[edges[1], edges[0]].set(1.0)
    a = a + jnp.eye(n, dtype=jnp.float32)                  # add self loops
    deg = jnp.maximum(jnp.sum(a, axis=1), 1e-12)           # guard isolated nodes
    d_inv = 1.0 / jnp.sqrt(deg)
    return a * d_inv[:, None] * d_inv[None, :]


def _routing_weight(w):
    """torch W (in_channels I, num_units J, unit_size U, in_units L) ->
    block weight (L*I, I*J*U) so that u_hat for every channel comes from ONE matmul
    against a source whose columns are ordered (l, i)."""
    i_ch, j_caps, u_size, l_in = w.shape
    m = j_caps * u_size
    w2 = jnp.transpose(w, (3, 0, 1, 2)).reshape(l_in, i_ch, m)      # [l, i, (j,u)]
    eye_i = jnp.eye(i_ch, dtype=jnp.float32)[None, :, :, None]      # (1, I, I, 1)
    return (w2[:, :, None, :] * eye_i).reshape(l_in * i_ch, i_ch * m)


def init_params(key, cfg):
    F = cfg["features"]
    Fg, L = cfg["gcn_filters"], cfg["gcn_layers"]
    D, C, T, A = (cfg["capsule_dimensions"], cfg["number_of_capsules"],
                  cfg["targets"], cfg["attention_dim"])
    keys = iter(jax.random.split(key, 32))

    def nrm(shape, scale=0.1):
        return scale * jax.random.normal(next(keys), shape, jnp.float32)

    p = {}
    dims = [F] + [Fg] * L
    for l in range(L):
        p[f"gcn_w{l}"] = nrm((dims[l], dims[l + 1]))
        p[f"gcn_b{l}"] = nrm((dims[l + 1],), 0.01)
    for u in range(L):                                  # primary capsule conv units
        p[f"prim_w{u}"] = nrm((L * Fg, D))
        p[f"prim_b{u}"] = nrm((D,), 0.01)
    p["att_w1"] = nrm((L * D, A)); p["att_b1"] = nrm((A,), 0.01)
    p["att_w2"] = nrm((A, L * D)); p["att_b2"] = nrm((L * D,), 0.01)
    # secondary capsule weights, torch layout (in_channels, num_units, unit_size, in_units)
    p["W_graph"] = nrm((D, C, D, L), 1.0)
    p["W_class"] = nrm((C, T, D, D), 1.0)
    d1, d2 = int(F * 2 / 3), int(F * 3 / 2)
    p["rec_w1"] = nrm((T * D, d1)); p["rec_b1"] = nrm((d1,), 0.01)
    p["rec_w2"] = nrm((d1, d2));    p["rec_b2"] = nrm((d2,), 0.01)
    p["rec_w3"] = nrm((d2, F));     p["rec_b3"] = nrm((F,), 0.01)
    return p


def capsgnn_forward(params, features, edges, cfg):
    n, _ = features.shape
    L, Fg = cfg["gcn_layers"], cfg["gcn_filters"]
    D, C, T = cfg["capsule_dimensions"], cfg["number_of_capsules"], cfg["targets"]

    a_norm = normalized_adjacency(edges, n)

    # 1. GCN stack (one fused Pallas kernel, X@W hoisted, grid-free)
    ws = [params[f"gcn_w{l}"] for l in range(L)]
    bs = [params[f"gcn_b{l}"] for l in range(L)]
    hidden_cat = pallas_gcn_stack(a_norm, features, ws, bs)             # (L*N, Fg)

    # 2. Primary capsules: torch view (1, L, Fg, N); all L Conv1d units as one matmul.
    h_resh = hidden_cat.reshape(L * Fg, n)                              # free layout plumbing
    wp_t = jnp.concatenate([params[f"prim_w{u}"].T for u in range(L)], axis=0)  # (L*D, L*Fg)
    bp = jnp.concatenate([params[f"prim_b{u}"] for u in range(L)]).reshape(L * D, 1)
    q = pallas_primary_caps(h_resh, wp_t, bp, units=L, dim=D)           # (L*D, N), squashed

    # 3-6. Attention + graph capsules + class capsules + reconstruction loss (one kernel).
    x_att = q.reshape(n, L * D)                                         # torch .view scramble
    w_big1 = _routing_weight(params["W_graph"])                         # (L*D, D*C*D)
    w_big2 = _routing_weight(params["W_class"])                         # (C*D, C*T*D)
    class_mean, loss = pallas_caps_head(
        x_att, features,
        params["att_w1"], params["att_b1"], params["att_w2"], params["att_b2"],
        w_big1, w_big2,
        params["rec_w1"], params["rec_b1"], params["rec_w2"], params["rec_b2"],
        params["rec_w3"], params["rec_b3"],
        D=D, C=C, T=T, iters=3)

    class_capsule_output = class_mean.reshape(1, T, D)
    return class_capsule_output, loss[0, 0]


# ----------------------------- main -----------------------------------------

if __name__ == "__main__":
    cfg = dict(gcn_layers=2, gcn_filters=16, capsule_dimensions=8,
               number_of_capsules=4, targets=3, attention_dim=8)
    N, F = 16, 16

    key = jax.random.PRNGKey(0)
    k_feat, k_param = jax.random.split(key)
    features = jax.random.uniform(k_feat, (N, F), jnp.float32)
    # symmetric ring graph, edge_index layout (2, E) like torch_geometric
    src = jnp.arange(N, dtype=jnp.int32)
    dst = (src + 1) % N
    edges = jnp.stack([jnp.concatenate([src, dst]),
                       jnp.concatenate([dst, src])], axis=0)            # (2, 32)

    params = init_params(k_param, dict(cfg, features=F))

    fwd = jax.jit(lambda p, f, e: capsgnn_forward(p, f, e, cfg))
    class_out, rec_loss = fwd(params, features, edges)
    jax.block_until_ready((class_out, rec_loss))

    assert class_out.shape == (1, cfg["targets"], cfg["capsule_dimensions"])
    assert rec_loss.shape == ()
    assert bool(jnp.isfinite(rec_loss))
    print("KERNEL_OK")
</pallas_src>

<mosaic_0001>
module attributes {stable_mosaic.version = 11 : i64} {
  func.func @_gcn_stack_kernel(%arg0: memref<16x16xf32, #tpu.memory_space<vmem>>, %arg1: memref<16x16xf32, #tpu.memory_space<vmem>>, %arg2: memref<16x16xf32, #tpu.memory_space<vmem>>, %arg3: memref<1x16xf32, #tpu.memory_space<vmem>>, %arg4: memref<16x16xf32, #tpu.memory_space<vmem>>, %arg5: memref<1x16xf32, #tpu.memory_space<vmem>>, %arg6: memref<32x16xf32, #tpu.memory_space<vmem>>) attributes {dimension_semantics = [], scalar_prefetch = 0 : i64, scratch_operands = 0 : i64, tpu.core_type = #tpu.core_type<tc>} {
    %c0 = arith.constant 0 : index
    %c0_0 = arith.constant 0 : index
    %0 = vector.load %arg0[%c0, %c0_0] : memref<16x16xf32, #tpu.memory_space<vmem>>, vector<16x16xf32>
    %c0_1 = arith.constant 0 : index
    %c0_2 = arith.constant 0 : index
    %1 = vector.load %arg1[%c0_1, %c0_2] : memref<16x16xf32, #tpu.memory_space<vmem>>, vector<16x16xf32>
    %c0_3 = arith.constant 0 : index
    %c0_4 = arith.constant 0 : index
    %2 = vector.load %arg2[%c0_3, %c0_4] : memref<16x16xf32, #tpu.memory_space<vmem>>, vector<16x16xf32>
    %cst = arith.constant dense<0.000000e+00> : vector<16x16xf32>
    %3 = tpu.matmul %1, %2, %cst {dimension_numbers = #tpu.dot_dimension_numbers<[1], [0], [0], [1], [0, 0, 1, 1], [], []>} : vector<16x16xf32>, vector<16x16xf32>, vector<16x16xf32> -> vector<16x16xf32>
    %cst_5 = arith.constant dense<0.000000e+00> : vector<16x16xf32>
    %4 = tpu.matmul %0, %3, %cst_5 {dimension_numbers = #tpu.dot_dimension_numbers<[1], [0], [0], [1], [0, 0, 1, 1], [], []>} : vector<16x16xf32>, vector<16x16xf32>, vector<16x16xf32> -> vector<16x16xf32>
    %c0_6 = arith.constant 0 : index
    %c0_7 = arith.constant 0 : index
    %5 = vector.load %arg3[%c0_6, %c0_7] : memref<1x16xf32, #tpu.memory_space<vmem>>, vector<1x16xf32>
    %6 = vector.broadcast %5 : vector<1x16xf32> to vector<16x16xf32>
    %7 = arith.addf %4, %6 : vector<16x16xf32>
    %cst_8 = arith.constant 0.000000e+00 : f32
    %8 = vector.broadcast %cst_8 : f32 to vector<16x16xf32>
    %9 = arith.maximumf %7, %8 : vector<16x16xf32>
    %c0_9 = arith.constant 0 : index
    %c0_10 = arith.constant 0 : index
    %10 = vector.load %arg6[%c0_9, %c0_10] : memref<32x16xf32, #tpu.memory_space<vmem>>, vector<16x16xf32>
    tpu.vector_store %arg6[%c0_9, %c0_10], %9 {strides = array<i32>} : memref<32x16xf32, #tpu.memory_space<vmem>>, vector<16x16xf32>,
    %c0_11 = arith.constant 0 : index
    %c0_12 = arith.constant 0 : index
    %11 = vector.load %arg4[%c0_11, %c0_12] : memref<16x16xf32, #tpu.memory_space<vmem>>, vector<16x16xf32>
    %cst_13 = arith.constant dense<0.000000e+00> : vector<16x16xf32>
    %12 = tpu.matmul %9, %11, %cst_13 {dimension_numbers = #tpu.dot_dimension_numbers<[1], [0], [0], [1], [0, 0, 1, 1], [], []>} : vector<16x16xf32>, vector<16x16xf32>, vector<16x16xf32> -> vector<16x16xf32>
    %cst_14 = arith.constant dense<0.000000e+00> : vector<16x16xf32>
    %13 = tpu.matmul %0, %12, %cst_14 {dimension_numbers = #tpu.dot_dimension_numbers<[1], [0], [0], [1], [0, 0, 1, 1], [], []>} : vector<16x16xf32>, vector<16x16xf32>, vector<16x16xf32> -> vector<16x16xf32>
    %c0_15 = arith.constant 0 : index
    %c0_16 = arith.constant 0 : index
    %14 = vector.load %arg5[%c0_15, %c0_16] : memref<1x16xf32, #tpu.memory_space<vmem>>, vector<1x16xf32>
    %15 = vector.broadcast %14 : vector<1x16xf32> to vector<16x16xf32>
    %16 = arith.addf %13, %15 : vector<16x16xf32>
    %cst_17 = arith.constant 0.000000e+00 : f32
    %17 = vector.broadcast %cst_17 : f32 to vector<16x16xf32>
    %18 = arith.maximumf %16, %17 : vector<16x16xf32>
    %c16 = arith.constant 16 : index
    %c0_18 = arith.constant 0 : index
    %19 = vector.load %arg6[%c16, %c0_18] : memref<32x16xf32, #tpu.memory_space<vmem>>, vector<16x16xf32>
    tpu.vector_store %arg6[%c16, %c0_18], %18 {strides = array<i32>} : memref<32x16xf32, #tpu.memory_space<vmem>>, vector<16x16xf32>,
    return
  }
}

module attributes {stable_mosaic.version = 11 : i64} {
  func.func @_primary_caps_kernel(%arg0: memref<32x16xf32, #tpu.memory_space<vmem>>, %arg1: memref<16x32xf32, #tpu.memory_space<vmem>>, %arg2: memref<16x1xf32, #tpu.memory_space<vmem>>, %arg3: memref<16x16xf32, #tpu.memory_space<vmem>>) attributes {dimension_semantics = [], scalar_prefetch = 0 : i64, scratch_operands = 0 : i64, tpu.core_type = #tpu.core_type<tc>} {
    %c0 = arith.constant 0 : index
    %c0_0 = arith.constant 0 : index
    %0 = vector.load %arg1[%c0, %c0_0] : memref<16x32xf32, #tpu.memory_space<vmem>>, vector<16x32xf32>
    %c0_1 = arith.constant 0 : index
    %c0_2 = arith.constant 0 : index
    %1 = vector.load %arg0[%c0_1, %c0_2] : memref<32x16xf32, #tpu.memory_space<vmem>>, vector<32x16xf32>
    %cst = arith.constant dense<0.000000e+00> : vector<16x16xf32>
    %2 = tpu.matmul %0, %1, %cst {dimension_numbers = #tpu.dot_dimension_numbers<[1], [0], [0], [1], [0, 0, 1, 1], [], []>} : vector<16x32xf32>, vector<32x16xf32>, vector<16x16xf32> -> vector<16x16xf32>
    %c0_3 = arith.constant 0 : index
    %c0_4 = arith.constant 0 : index
    %3 = vector.load %arg2[%c0_3, %c0_4] : memref<16x1xf32, #tpu.memory_space<vmem>>, vector<16x1xf32>
    %4 = vector.broadcast %3 : vector<16x1xf32> to vector<16x16xf32>
    %5 = arith.addf %2, %4 : vector<16x16xf32>
    %6 = vector.extract_strided_slice %5 {offsets = [0, 0], sizes = [8, 16], strides = [1, 1]} : vector<16x16xf32> to vector<8x16xf32>
    %7 = arith.mulf %6, %6 : vector<8x16xf32>
    %cst_5 = arith.constant dense<0.000000e+00> : vector<8xf32>
    %8 = vector.multi_reduction <add>, %7, %cst_5 [1] : vector<8x16xf32> to vector<8xf32>
    %9 = vector.shape_cast %8 : vector<8xf32> to vector<8x1xf32>
    %cst_6 = arith.constant dense<0.000000e+00> : vector<1xf32>
    %10 = vector.multi_reduction <add>, %9, %cst_6 [0] : vector<8x1xf32> to vector<1xf32>
    %11 = vector.shape_cast %10 : vector<1xf32> to vector<1x1xf32>
    %cst_7 = arith.constant 1.000000e+00 : f32
    %12 = vector.broadcast %cst_7 : f32 to vector<1x1xf32>
    %13 = arith.addf %12, %11 : vector<1x1xf32>
    %14 = arith.divf %11, %13 : vector<1x1xf32>
    %cst_8 = arith.constant 9.99999971E-10 : f32
    %15 = vector.broadcast %cst_8 : f32 to vector<1x1xf32>
    %16 = arith.addf %11, %15 : vector<1x1xf32>
    %17 = math.rsqrt %16 : vector<1x1xf32>
    %18 = arith.mulf %14, %17 : vector<1x1xf32>
    %19 = vector.broadcast %18 : vector<1x1xf32> to vector<8x16xf32>
    %20 = arith.mulf %6, %19 : vector<8x16xf32>
    %c0_9 = arith.constant 0 : index
    %c0_10 = arith.constant 0 : index
    %21 = vector.load %arg3[%c0_9, %c0_10] : memref<16x16xf32, #tpu.memory_space<vmem>>, vector<8x16xf32>
    tpu.vector_store %arg3[%c0_9, %c0_10], %20 {strides = array<i32>} : memref<16x16xf32, #tpu.memory_space<vmem>>, vector<8x16xf32>,
    %22 = vector.extract_strided_slice %5 {offsets = [8, 0], sizes = [8, 16], strides = [1, 1]} : vector<16x16xf32> to vector<8x16xf32>
    %23 = arith.mulf %22, %22 : vector<8x16xf32>
    %cst_11 = arith.constant dense<0.000000e+00> : vector<8xf32>
    %24 = vector.multi_reduction <add>, %23, %cst_11 [1] : vector<8x16xf32> to vector<8xf32>
    %25 = vector.shape_cast %24 : vector<8xf32> to vector<8x1xf32>
    %cst_12 = arith.constant dense<0.000000e+00> : vector<1xf32>
    %26 = vector.multi_reduction <add>, %25, %cst_12 [0] : vector<8x1xf32> to vector<1xf32>
    %27 = vector.shape_cast %26 : vector<1xf32> to vector<1x1xf32>
    %cst_13 = arith.constant 1.000000e+00 : f32
    %28 = vector.broadcast %cst_13 : f32 to vector<1x1xf32>
    %29 = arith.addf %28, %27 : vector<1x1xf32>
    %30 = arith.divf %27, %29 : vector<1x1xf32>
    %cst_14 = arith.constant 9.99999971E-10 : f32
    %31 = vector.broadcast %cst_14 : f32 to vector<1x1xf32>
    %32 = arith.addf %27, %31 : vector<1x1xf32>
    %33 = math.rsqrt %32 : vector<1x1xf32>
    %34 = arith.mulf %30, %33 : vector<1x1xf32>
    %35 = vector.broadcast %34 : vector<1x1xf32> to vector<8x16xf32>
    %36 = arith.mulf %22, %35 : vector<8x16xf32>
    %c8 = arith.constant 8 : index
    %c0_15 = arith.constant 0 : index
    %37 = vector.load %arg3[%c8, %c0_15] : memref<16x16xf32, #tpu.memory_space<vmem>>, vector<8x16xf32>
    tpu.vector_store %arg3[%c8, %c0_15], %36 {strides = array<i32>} : memref<16x16xf32, #tpu.memory_space<vmem>>, vector<8x16xf32>,
    return
  }
}

module attributes {stable_mosaic.version = 11 : i64} {
  func.func @_caps_head_kernel(%arg0: memref<16x16xf32, #tpu.memory_space<vmem>>, %arg1: memref<16x16xf32, #tpu.memory_space<vmem>>, %arg2: memref<16x8xf32, #tpu.memory_space<vmem>>, %arg3: memref<1x8xf32, #tpu.memory_space<vmem>>, %arg4: memref<8x16xf32, #tpu.memory_space<vmem>>, %arg5: memref<1x16xf32, #tpu.memory_space<vmem>>, %arg6: memref<16x256xf32, #tpu.memory_space<vmem>>, %arg7: memref<32x96xf32, #tpu.memory_space<vmem>>, %arg8: memref<24x10xf32, #tpu.memory_space<vmem>>, %arg9: memref<1x10xf32, #tpu.memory_space<vmem>>, %arg10: memref<10x24xf32, #tpu.memory_space<vmem>>, %arg11: memref<1x24xf32, #tpu.memory_space<vmem>>, %arg12: memref<24x16xf32, #tpu.memory_space<vmem>>, %arg13: memref<1x16xf32, #tpu.memory_space<vmem>>, %arg14: memref<1x24xf32, #tpu.memory_space<vmem>>, %arg15: memref<1x1xf32, #tpu.memory_space<smem>>) attributes {dimension_semantics = [], scalar_prefetch = 0 : i64, scratch_operands = 0 : i64, tpu.core_type = #tpu.core_type<tc>} {
    %c0 = arith.constant 0 : index
    %c0_0 = arith.constant 0 : index
    %0 = vector.load %arg0[%c0, %c0_0] : memref<16x16xf32, #tpu.memory_space<vmem>>, vector<16x16xf32>
    %c0_1 = arith.constant 0 : index
    %c0_2 = arith.constant 0 : index
    %1 = vector.load %arg2[%c0_1, %c0_2] : memref<16x8xf32, #tpu.memory_space<vmem>>, vector<16x8xf32>
    %cst = arith.constant dense<0.000000e+00> : vector<16x8xf32>
    %2 = tpu.matmul %0, %1, %cst {dimension_numbers = #tpu.dot_dimension_numbers<[1], [0], [0], [1], [0, 0, 1, 1], [], []>} : vector<16x16xf32>, vector<16x8xf32>, vector<16x8xf32> -> vector<16x8xf32>
    %c0_3 = arith.constant 0 : index
    %c0_4 = arith.constant 0 : index
    %3 = vector.load %arg3[%c0_3, %c0_4] : memref<1x8xf32, #tpu.memory_space<vmem>>, vector<1x8xf32>
    %4 = vector.broadcast %3 : vector<1x8xf32> to vector<16x8xf32>
    %5 = arith.addf %2, %4 : vector<16x8xf32>
    %cst_5 = arith.constant 0.000000e+00 : f32
    %6 = vector.broadcast %cst_5 : f32 to vector<16x8xf32>
    %7 = arith.maximumf %5, %6 : vector<16x8xf32>
    %c0_6 = arith.constant 0 : index
    %c0_7 = arith.constant 0 : index
    %8 = vector.load %arg4[%c0_6, %c0_7] : memref<8x16xf32, #tpu.memory_space<vmem>>, vector<8x16xf32>
    %cst_8 = arith.constant dense<0.000000e+00> : vector<16x16xf32>
    %9 = tpu.matmul %7, %8, %cst_8 {dimension_numbers = #tpu.dot_dimension_numbers<[1], [0], [0], [1], [0, 0, 1, 1], [], []>} : vector<16x8xf32>, vector<8x16xf32>, vector<16x16xf32> -> vector<16x16xf32>
    %c0_9 = arith.constant 0 : index
    %c0_10 = arith.constant 0 : index
    %10 = vector.load %arg5[%c0_9, %c0_10] : memref<1x16xf32, #tpu.memory_space<vmem>>, vector<1x16xf32>
    %11 = vector.broadcast %10 : vector<1x16xf32> to vector<16x16xf32>
    %12 = arith.addf %9, %11 : vector<16x16xf32>
    %cst_11 = arith.constant dense<0xFF800000> : vector<16xf32>
    %13 = vector.multi_reduction <maximumf>, %12, %cst_11 [0] : vector<16x16xf32> to vector<16xf32>
    %14 = vector.shape_cast %13 : vector<16xf32> to vector<1x16xf32>
    %15 = vector.broadcast %14 : vector<1x16xf32> to vector<16x16xf32>
    %16 = arith.subf %12, %15 : vector<16x16xf32>
    %17 = math.exp %16 : vector<16x16xf32>
    %cst_12 = arith.constant dense<0.000000e+00> : vector<16xf32>
    %18 = vector.multi_reduction <add>, %17, %cst_12 [0] : vector<16x16xf32> to vector<16xf32>
    %19 = vector.shape_cast %18 : vector<16xf32> to vector<1x16xf32>
    %20 = vector.broadcast %19 : vector<1x16xf32> to vector<16x16xf32>
    %21 = arith.divf %17, %20 : vector<16x16xf32>
    %22 = arith.mulf %0, %21 : vector<16x16xf32>
    %c0_13 = arith.constant 0 : index
    %c0_14 = arith.constant 0 : index
    %23 = vector.load %arg6[%c0_13, %c0_14] : memref<16x256xf32, #tpu.memory_space<vmem>>, vector<16x256xf32>
    %cst_15 = arith.constant dense<0.000000e+00> : vector<16x256xf32>
    %24 = tpu.matmul %22, %23, %cst_15 {dimension_numbers = #tpu.dot_dimension_numbers<[1], [0], [0], [1], [0, 0, 1, 1], [], []>} : vector<16x16xf32>, vector<16x256xf32>, vector<16x256xf32> -> vector<16x256xf32>
    %25 = vector.extract_strided_slice %24 {offsets = [0, 0], sizes = [16, 32], strides = [1, 1]} : vector<16x256xf32> to vector<16x32xf32>
    %26 = vector.extract_strided_slice %24 {offsets = [0, 32], sizes = [16, 32], strides = [1, 1]} : vector<16x256xf32> to vector<16x32xf32>
    %27 = vector.extract_strided_slice %24 {offsets = [0, 64], sizes = [16, 32], strides = [1, 1]} : vector<16x256xf32> to vector<16x32xf32>
    %28 = vector.extract_strided_slice %24 {offsets = [0, 96], sizes = [16, 32], strides = [1, 1]} : vector<16x256xf32> to vector<16x32xf32>
    %29 = vector.extract_strided_slice %24 {offsets = [0, 128], sizes = [16, 32], strides = [1, 1]} : vector<16x256xf32> to vector<16x32xf32>
    %30 = vector.extract_strided_slice %24 {offsets = [0, 160], sizes = [16, 32], strides = [1, 1]} : vector<16x256xf32> to vector<16x32xf32>
    %31 = vector.extract_strided_slice %24 {offsets = [0, 192], sizes = [16, 32], strides = [1, 1]} : vector<16x256xf32> to vector<16x32xf32>
    %32 = vector.extract_strided_slice %24 {offsets = [0, 224], sizes = [16, 32], strides = [1, 1]} : vector<16x256xf32> to vector<16x32xf32>
    %cst_16 = arith.constant 0.000000e+00 : f32
    %33 = vector.broadcast %cst_16 : f32 to vector<8x4xf32>
    %cst_17 = arith.constant dense<0xFF800000> : vector<8xf32>
    %34 = vector.multi_reduction <maximumf>, %33, %cst_17 [1] : vector<8x4xf32> to vector<8xf32>
    %35 = vector.shape_cast %34 : vector<8xf32> to vector<8x1xf32>
    %36 = vector.broadcast %35 : vector<8x1xf32> to vector<8x4xf32>
    %37 = arith.subf %33, %36 : vector<8x4xf32>
    %38 = math.exp %37 : vector<8x4xf32>
    %cst_18 = arith.constant dense<0.000000e+00> : vector<8xf32>
    %39 = vector.multi_reduction <add>, %38, %cst_18 [1] : vector<8x4xf32> to vector<8xf32>
    %40 = vector.shape_cast %39 : vector<8xf32> to vector<8x1xf32>
    %41 = vector.broadcast %40 : vector<8x1xf32> to vector<8x4xf32>
    %42 = arith.divf %38, %41 : vector<8x4xf32>
    %43 = vector.extract_strided_slice %42 {offsets = [0, 0], sizes = [8, 1], strides = [1, 1]} : vector<8x4xf32> to vector<8x1xf32>
    %44 = vector.shape_cast %43 : vector<8x1xf32> to vector<8x1xf32>
    %45 = vector.broadcast %44 : vector<8x1xf32> to vector<8x8xf32>
    %46 = vector.extract_strided_slice %42 {offsets = [0, 1], sizes = [8, 1], strides = [1, 1]} : vector<8x4xf32> to vector<8x1xf32>
    %47 = vector.shape_cast %46 : vector<8x1xf32> to vector<8x1xf32>
    %48 = vector.broadcast %47 : vector<8x1xf32> to vector<8x8xf32>
    %49 = vector.extract_strided_slice %42 {offsets = [0, 2], sizes = [8, 1], strides = [1, 1]} : vector<8x4xf32> to vector<8x1xf32>
    %50 = vector.shape_cast %49 : vector<8x1xf32> to vector<8x1xf32>
    %51 = vector.broadcast %50 : vector<8x1xf32> to vector<8x8xf32>
    %52 = vector.extract_strided_slice %42 {offsets = [0, 3], sizes = [8, 1], strides = [1, 1]} : vector<8x4xf32> to vector<8x1xf32>
    %53 = vector.shape_cast %52 : vector<8x1xf32> to vector<8x1xf32>
    %54 = vector.broadcast %53 : vector<8x1xf32> to vector<8x8xf32>
    %55 = tpu.concatenate %45, %48, %51, %54 in 1 : vector<8x8xf32>, vector<8x8xf32>, vector<8x8xf32>, vector<8x8xf32> -> vector<8x32xf32>
    %56 = vector.extract_strided_slice %55 {offsets = [0, 0], sizes = [1, 32], strides = [1, 1]} : vector<8x32xf32> to vector<1x32xf32>
    %57 = vector.broadcast %56 : vector<1x32xf32> to vector<16x32xf32>
    %58 = arith.mulf %25, %57 : vector<16x32xf32>
    %59 = vector.extract_strided_slice %55 {offsets = [1, 0], sizes = [1, 32], strides = [1, 1]} : vector<8x32xf32> to vector<1x32xf32>
    %60 = vector.broadcast %59 : vector<1x32xf32> to vector<16x32xf32>
    %61 = arith.mulf %26, %60 : vector<16x32xf32>
    %62 = arith.addf %58, %61 : vector<16x32xf32>
    %63 = vector.extract_strided_slice %55 {offsets = [2, 0], sizes = [1, 32], strides = [1, 1]} : vector<8x32xf32> to vector<1x32xf32>
    %64 = vector.broadcast %63 : vector<1x32xf32> to vector<16x32xf32>
    %65 = arith.mulf %27, %64 : vector<16x32xf32>
    %66 = arith.addf %62, %65 : vector<16x32xf32>
    %67 = vector.extract_strided_slice %55 {offsets = [3, 0], sizes = [1, 32], strides = [1, 1]} : vector<8x32xf32> to vector<1x32xf32>
    %68 = vector.broadcast %67 : vector<1x32xf32> to vector<16x32xf32>
    %69 = arith.mulf %28, %68 : vector<16x32xf32>
    %70 = arith.addf %66, %69 : vector<16x32xf32>
    %71 = vector.extract_strided_slice %55 {offsets = [4, 0], sizes = [1, 32], strides = [1, 1]} : vector<8x32xf32> to vector<1x32xf32>
    %72 = vector.broadcast %71 : vector<1x32xf32> to vector<16x32xf32>
    %73 = arith.mulf %29, %72 : vector<16x32xf32>
    %74 = arith.addf %70, %73 : vector<16x32xf32>
    %75 = vector.extract_strided_slice %55 {offsets = [5, 0], sizes = [1, 32], strides = [1, 1]} : vector<8x32xf32> to vector<1x32xf32>
    %76 = vector.broadcast %75 : vector<1x32xf32> to vector<16x32xf32>
    %77 = arith.mulf %30, %76 : vector<16x32xf32>
    %78 = arith.addf %74, %77 : vector<16x32xf32>
    %79 = vector.extract_strided_slice %55 {offsets = [6, 0], sizes = [1, 32], strides = [1, 1]} : vector<8x32xf32> to vector<1x32xf32>
    %80 = vector.broadcast %79 : vector<1x32xf32> to vector<16x32xf32>
    %81 = arith.mulf %31, %80 : vector<16x32xf32>
    %82 = arith.addf %78, %81 : vector<16x32xf32>
    %83 = vector.extract_strided_slice %55 {offsets = [7, 0], sizes = [1, 32], strides = [1, 1]} : vector<8x32xf32> to vector<1x32xf32>
    %84 = vector.broadcast %83 : vector<1x32xf32> to vector<16x32xf32>
    %85 = arith.mulf %32, %84 : vector<16x32xf32>
    %86 = arith.addf %82, %85 : vector<16x32xf32>
    %87 = arith.mulf %86, %86 : vector<16x32xf32>
    %88 = vector.extract_strided_slice %87 {offsets = [0, 0], sizes = [16, 8], strides = [1, 1]} : vector<16x32xf32> to vector<16x8xf32>
    %89 = vector.extract_strided_slice %87 {offsets = [0, 8], sizes = [16, 8], strides = [1, 1]} : vector<16x32xf32> to vector<16x8xf32>
    %90 = arith.addf %88, %89 : vector<16x8xf32>
    %91 = vector.extract_strided_slice %87 {offsets = [0, 16], sizes = [16, 8], strides = [1, 1]} : vector<16x32xf32> to vector<16x8xf32>
    %92 = arith.addf %90, %91 : vector<16x8xf32>
    %93 = vector.extract_strided_slice %87 {offsets = [0, 24], sizes = [16, 8], strides = [1, 1]} : vector<16x32xf32> to vector<16x8xf32>
    %94 = arith.addf %92, %93 : vector<16x8xf32>
    %95 = tpu.concatenate %94, %94, %94, %94 in 1 : vector<16x8xf32>, vector<16x8xf32>, vector<16x8xf32>, vector<16x8xf32> -> vector<16x32xf32>
    %cst_19 = arith.constant 1.000000e+00 : f32
    %96 = vector.broadcast %cst_19 : f32 to vector<16x32xf32>
    %97 = arith.addf %96, %95 : vector<16x32xf32>
    %98 = arith.divf %95, %97 : vector<16x32xf32>
    %99 = arith.mulf %98, %86 : vector<16x32xf32>
    %cst_20 = arith.constant 9.99999971E-10 : f32
    %100 = vector.broadcast %cst_20 : f32 to vector<16x32xf32>
    %101 = arith.addf %95, %100 : vector<16x32xf32>
    %102 = math.rsqrt %101 : vector<16x32xf32>
    %103 = arith.mulf %99, %102 : vector<16x32xf32>
    %104 = arith.mulf %25, %103 : vector<16x32xf32>
    %cst_21 = arith.constant dense<0.000000e+00> : vector<32xf32>
    %105 = vector.multi_reduction <add>, %104, %cst_21 [0] : vector<16x32xf32> to vector<32xf32>
    %106 = vector.shape_cast %105 : vector<32xf32> to vector<1x32xf32>
    %107 = vector.extract_strided_slice %106 {offsets = [0, 0], sizes = [1, 8], strides = [1, 1]} : vector<1x32xf32> to vector<1x8xf32>
    %cst_22 = arith.constant dense<0.000000e+00> : vector<1xf32>
    %108 = vector.multi_reduction <add>, %107, %cst_22 [1] : vector<1x8xf32> to vector<1xf32>
    %109 = vector.shape_cast %108 : vector<1xf32> to vector<1x1xf32>
    %110 = vector.extract_strided_slice %106 {offsets = [0, 8], sizes = [1, 8], strides = [1, 1]} : vector<1x32xf32> to vector<1x8xf32>
    %cst_23 = arith.constant dense<0.000000e+00> : vector<1xf32>
    %111 = vector.multi_reduction <add>, %110, %cst_23 [1] : vector<1x8xf32> to vector<1xf32>
    %112 = vector.shape_cast %111 : vector<1xf32> to vector<1x1xf32>
    %113 = vector.extract_strided_slice %106 {offsets = [0, 16], sizes = [1, 8], strides = [1, 1]} : vector<1x32xf32> to vector<1x8xf32>
    %cst_24 = arith.constant dense<0.000000e+00> : vector<1xf32>
    %114 = vector.multi_reduction <add>, %113, %cst_24 [1] : vector<1x8xf32> to vector<1xf32>
    %115 = vector.shape_cast %114 : vector<1xf32> to vector<1x1xf32>
    %116 = vector.extract_strided_slice %106 {offsets = [0, 24], sizes = [1, 8], strides = [1, 1]} : vector<1x32xf32> to vector<1x8xf32>
    %cst_25 = arith.constant dense<0.000000e+00> : vector<1xf32>
    %117 = vector.multi_reduction <add>, %116, %cst_25 [1] : vector<1x8xf32> to vector<1xf32>
    %118 = vector.shape_cast %117 : vector<1xf32> to vector<1x1xf32>
    %119 = tpu.concatenate %109, %112, %115, %118 in 1 : vector<1x1xf32>, vector<1x1xf32>, vector<1x1xf32>, vector<1x1xf32> -> vector<1x4xf32>
    %120 = arith.mulf %26, %103 : vector<16x32xf32>
    %cst_26 = arith.constant dense<0.000000e+00> : vector<32xf32>
    %121 = vector.multi_reduction <add>, %120, %cst_26 [0] : vector<16x32xf32> to vector<32xf32>
    %122 = vector.shape_cast %121 : vector<32xf32> to vector<1x32xf32>
    %123 = vector.extract_strided_slice %122 {offsets = [0, 0], sizes = [1, 8], strides = [1, 1]} : vector<1x32xf32> to vector<1x8xf32>
    %cst_27 = arith.constant dense<0.000000e+00> : vector<1xf32>
    %124 = vector.multi_reduction <add>, %123, %cst_27 [1] : vector<1x8xf32> to vector<1xf32>
    %125 = vector.shape_cast %124 : vector<1xf32> to vector<1x1xf32>
    %126 = vector.extract_strided_slice %122 {offsets = [0, 8], sizes = [1, 8], strides = [1, 1]} : vector<1x32xf32> to vector<1x8xf32>
    %cst_28 = arith.constant dense<0.000000e+00> : vector<1xf32>
    %127 = vector.multi_reduction <add>, %126, %cst_28 [1] : vector<1x8xf32> to vector<1xf32>
    %128 = vector.shape_cast %127 : vector<1xf32> to vector<1x1xf32>
    %129 = vector.extract_strided_slice %122 {offsets = [0, 16], sizes = [1, 8], strides = [1, 1]} : vector<1x32xf32> to vector<1x8xf32>
    %cst_29 = arith.constant dense<0.000000e+00> : vector<1xf32>
    %130 = vector.multi_reduction <add>, %129, %cst_29 [1] : vector<1x8xf32> to vector<1xf32>
    %131 = vector.shape_cast %130 : vector<1xf32> to vector<1x1xf32>
    %132 = vector.extract_strided_slice %122 {offsets = [0, 24], sizes = [1, 8], strides = [1, 1]} : vector<1x32xf32> to vector<1x8xf32>
    %cst_30 = arith.constant dense<0.000000e+00> : vector<1xf32>
    %133 = vector.multi_reduction <add>, %132, %cst_30 [1] : vector<1x8xf32> to vector<1xf32>
    %134 = vector.shape_cast %133 : vector<1xf32> to vector<1x1xf32>
    %135 = tpu.concatenate %125, %128, %131, %134 in 1 : vector<1x1xf32>, vector<1x1xf32>, vector<1x1xf32>, vector<1x1xf32> -> vector<1x4xf32>
    %136 = arith.mulf %27, %103 : vector<16x32xf32>
    %cst_31 = arith.constant dense<0.000000e+00> : vector<32xf32>
    %137 = vector.multi_reduction <add>, %136, %cst_31 [0] : vector<16x32xf32> to vector<32xf32>
    %138 = vector.shape_cast %137 : vector<32xf32> to vector<1x32xf32>
    %139 = vector.extract_strided_slice %138 {offsets = [0, 0], sizes = [1, 8], strides = [1, 1]} : vector<1x32xf32> to vector<1x8xf32>
    %cst_32 = arith.constant dense<0.000000e+00> : vector<1xf32>
    %140 = vector.multi_reduction <add>, %139, %cst_32 [1] : vector<1x8xf32> to vector<1xf32>
    %141 = vector.shape_cast %140 : vector<1xf32> to vector<1x1xf32>
    %142 = vector.extract_strided_slice %138 {offsets = [0, 8], sizes = [1, 8], strides = [1, 1]} : vector<1x32xf32> to vector<1x8xf32>
    %cst_33 = arith.constant dense<0.000000e+00> : vector<1xf32>
    %143 = vector.multi_reduction <add>, %142, %cst_33 [1] : vector<1x8xf32> to vector<1xf32>
    %144 = vector.shape_cast %143 : vector<1xf32> to vector<1x1xf32>
    %145 = vector.extract_strided_slice %138 {offsets = [0, 16], sizes = [1, 8], strides = [1, 1]} : vector<1x32xf32> to vector<1x8xf32>
    %cst_34 = arith.constant dense<0.000000e+00> : vector<1xf32>
    %146 = vector.multi_reduction <add>, %145, %cst_34 [1] : vector<1x8xf32> to vector<1xf32>
    %147 = vector.shape_cast %146 : vector<1xf32> to vector<1x1xf32>
    %148 = vector.extract_strided_slice %138 {offsets = [0, 24], sizes = [1, 8], strides = [1, 1]} : vector<1x32xf32> to vector<1x8xf32>
    %cst_35 = arith.constant dense<0.000000e+00> : vector<1xf32>
    %149 = vector.multi_reduction <add>, %148, %cst_35 [1] : vector<1x8xf32> to vector<1xf32>
    %150 = vector.shape_cast %149 : vector<1xf32> to vector<1x1xf32>
    %151 = tpu.concatenate %141, %144, %147, %150 in 1 : vector<1x1xf32>, vector<1x1xf32>, vector<1x1xf32>, vector<1x1xf32> -> vector<1x4xf32>
    %152 = arith.mulf %28, %103 : vector<16x32xf32>
    %cst_36 = arith.constant dense<0.000000e+00> : vector<32xf32>
    %153 = vector.multi_reduction <add>, %152, %cst_36 [0] : vector<16x32xf32> to vector<32xf32>
    %154 = vector.shape_cast %153 : vector<32xf32> to vector<1x32xf32>
    %155 = vector.extract_strided_slice %154 {offsets = [0, 0], sizes = [1, 8], strides = [1, 1]} : vector<1x32xf32> to vector<1x8xf32>
    %cst_37 = arith.constant dense<0.000000e+00> : vector<1xf32>
    %156 = vector.multi_reduction <add>, %155, %cst_37 [1] : vector<1x8xf32> to vector<1xf32>
    %157 = vector.shape_cast %156 : vector<1xf32> to vector<1x1xf32>
    %158 = vector.extract_strided_slice %154 {offsets = [0, 8], sizes = [1, 8], strides = [1, 1]} : vector<1x32xf32> to vector<1x8xf32>
    %cst_38 = arith.constant dense<0.000000e+00> : vector<1xf32>
    %159 = vector.multi_reduction <add>, %158, %cst_38 [1] : vector<1x8xf32> to vector<1xf32>
    %160 = vector.shape_cast %159 : vector<1xf32> to vector<1x1xf32>
    %161 = vector.extract_strided_slice %154 {offsets = [0, 16], sizes = [1, 8], strides = [1, 1]} : vector<1x32xf32> to vector<1x8xf32>
    %cst_39 = arith.constant dense<0.000000e+00> : vector<1xf32>
    %162 = vector.multi_reduction <add>, %161, %cst_39 [1] : vector<1x8xf32> to vector<1xf32>
    %163 = vector.shape_cast %162 : vector<1xf32> to vector<1x1xf32>
    %164 = vector.extract_strided_slice %154 {offsets = [0, 24], sizes = [1, 8], strides = [1, 1]} : vector<1x32xf32> to vector<1x8xf32>
    %cst_40 = arith.constant dense<0.000000e+00> : vector<1xf32>
    %165 = vector.multi_reduction <add>, %164, %cst_40 [1] : vector<1x8xf32> to vector<1xf32>
    %166 = vector.shape_cast %165 : vector<1xf32> to vector<1x1xf32>
    %167 = tpu.concatenate %157, %160, %163, %166 in 1 : vector<1x1xf32>, vector<1x1xf32>, vector<1x1xf32>, vector<1x1xf32> -> vector<1x4xf32>
    %168 = arith.mulf %29, %103 : vector<16x32xf32>
    %cst_41 = arith.constant dense<0.000000e+00> : vector<32xf32>
    %169 = vector.multi_reduction <add>, %168, %cst_41 [0] : vector<16x32xf32> to vector<32xf32>
    %170 = vector.shape_cast %169 : vector<32xf32> to vector<1x32xf32>
    %171 = vector.extract_strided_slice %170 {offsets = [0, 0], sizes = [1, 8], strides = [1, 1]} : vector<1x32xf32> to vector<1x8xf32>
    %cst_42 = arith.constant dense<0.000000e+00> : vector<1xf32>
    %172 = vector.multi_reduction <add>, %171, %cst_42 [1] : vector<1x8xf32> to vector<1xf32>
    %173 = vector.shape_cast %172 : vector<1xf32> to vector<1x1xf32>
    %174 = vector.extract_strided_slice %170 {offsets = [0, 8], sizes = [1, 8], strides = [1, 1]} : vector<1x32xf32> to vector<1x8xf32>
    %cst_43 = arith.constant dense<0.000000e+00> : vector<1xf32>
    %175 = vector.multi_reduction <add>, %174, %cst_43 [1] : vector<1x8xf32> to vector<1xf32>
    %176 = vector.shape_cast %175 : vector<1xf32> to vector<1x1xf32>
    %177 = vector.extract_strided_slice %170 {offsets = [0, 16], sizes = [1, 8], strides = [1, 1]} : vector<1x32xf32> to vector<1x8xf32>
    %cst_44 = arith.constant dense<0.000000e+00> : vector<1xf32>
    %178 = vector.multi_reduction <add>, %177, %cst_44 [1] : vector<1x8xf32> to vector<1xf32>
    %179 = vector.shape_cast %178 : vector<1xf32> to vector<1x1xf32>
    %180 = vector.extract_strided_slice %170 {offsets = [0, 24], sizes = [1, 8], strides = [1, 1]} : vector<1x32xf32> to vector<1x8xf32>
    %cst_45 = arith.constant dense<0.000000e+00> : vector<1xf32>
    %181 = vector.multi_reduction <add>, %180, %cst_45 [1] : vector<1x8xf32> to vector<1xf32>
    %182 = vector.shape_cast %181 : vector<1xf32> to vector<1x1xf32>
    %183 = tpu.concatenate %173, %176, %179, %182 in 1 : vector<1x1xf32>, vector<1x1xf32>, vector<1x1xf32>, vector<1x1xf32> -> vector<1x4xf32>
    %184 = arith.mulf %30, %103 : vector<16x32xf32>
    %cst_46 = arith.constant dense<0.000000e+00> : vector<32xf32>
    %185 = vector.multi_reduction <add>, %184, %cst_46 [0] : vector<16x32xf32> to vector<32xf32>
    %186 = vector.shape_cast %185 : vector<32xf32> to vector<1x32xf32>
    %187 = vector.extract_strided_slice %186 {offsets = [0, 0], sizes = [1, 8], strides = [1, 1]} : vector<1x32xf32> to vector<1x8xf32>
    %cst_47 = arith.constant dense<0.000000e+00> : vector<1xf32>
    %188 = vector.multi_reduction <add>, %187, %cst_47 [1] : vector<1x8xf32> to vector<1xf32>
    %189 = vector.shape_cast %188 : vector<1xf32> to vector<1x1xf32>
    %190 = vector.extract_strided_slice %186 {offsets = [0, 8], sizes = [1, 8], strides = [1, 1]} : vector<1x32xf32> to vector<1x8xf32>
    %cst_48 = arith.constant dense<0.000000e+00> : vector<1xf32>
    %191 = vector.multi_reduction <add>, %190, %cst_48 [1] : vector<1x8xf32> to vector<1xf32>
    %192 = vector.shape_cast %191 : vector<1xf32> to vector<1x1xf32>
    %193 = vector.extract_strided_slice %186 {offsets = [0, 16], sizes = [1, 8], strides = [1, 1]} : vector<1x32xf32> to vector<1x8xf32>
    %cst_49 = arith.constant dense<0.000000e+00> : vector<1xf32>
    %194 = vector.multi_reduction <add>, %193, %cst_49 [1] : vector<1x8xf32> to vector<1xf32>
    %195 = vector.shape_cast %194 : vector<1xf32> to vector<1x1xf32>
    %196 = vector.extract_strided_slice %186 {offsets = [0, 24], sizes = [1, 8], strides = [1, 1]} : vector<1x32xf32> to vector<1x8xf32>
    %cst_50 = arith.constant dense<0.000000e+00> : vector<1xf32>
    %197 = vector.multi_reduction <add>, %196, %cst_50 [1] : vector<1x8xf32> to vector<1xf32>
    %198 = vector.shape_cast %197 : vector<1xf32> to vector<1x1xf32>
    %199 = tpu.concatenate %189, %192, %195, %198 in 1 : vector<1x1xf32>, vector<1x1xf32>, vector<1x1xf32>, vector<1x1xf32> -> vector<1x4xf32>
    %200 = arith.mulf %31, %103 : vector<16x32xf32>
    %cst_51 = arith.constant dense<0.000000e+00> : vector<32xf32>
    %201 = vector.multi_reduction <add>, %200, %cst_51 [0] : vector<16x32xf32> to vector<32xf32>
    %202 = vector.shape_cast %201 : vector<32xf32> to vector<1x32xf32>
    %203 = vector.extract_strided_slice %202 {offsets = [0, 0], sizes = [1, 8], strides = [1, 1]} : vector<1x32xf32> to vector<1x8xf32>
    %cst_52 = arith.constant dense<0.000000e+00> : vector<1xf32>
    %204 = vector.multi_reduction <add>, %203, %cst_52 [1] : vector<1x8xf32> to vector<1xf32>
    %205 = vector.shape_cast %204 : vector<1xf32> to vector<1x1xf32>
    %206 = vector.extract_strided_slice %202 {offsets = [0, 8], sizes = [1, 8], strides = [1, 1]} : vector<1x32xf32> to vector<1x8xf32>
    %cst_53 = arith.constant dense<0.000000e+00> : vector<1xf32>
    %207 = vector.multi_reduction <add>, %206, %cst_53 [1] : vector<1x8xf32> to vector<1xf32>
    %208 = vector.shape_cast %207 : vector<1xf32> to vector<1x1xf32>
    %209 = vector.extract_strided_slice %202 {offsets = [0, 16], sizes = [1, 8], strides = [1, 1]} : vector<1x32xf32> to vector<1x8xf32>
    %cst_54 = arith.constant dense<0.000000e+00> : vector<1xf32>
    %210 = vector.multi_reduction <add>, %209, %cst_54 [1] : vector<1x8xf32> to vector<1xf32>
    %211 = vector.shape_cast %210 : vector<1xf32> to vector<1x1xf32>
    %212 = vector.extract_strided_slice %202 {offsets = [0, 24], sizes = [1, 8], strides = [1, 1]} : vector<1x32xf32> to vector<1x8xf32>
    %cst_55 = arith.constant dense<0.000000e+00> : vector<1xf32>
    %213 = vector.multi_reduction <add>, %212, %cst_55 [1] : vector<1x8xf32> to vector<1xf32>
    %214 = vector.shape_cast %213 : vector<1xf32> to vector<1x1xf32>
    %215 = tpu.concatenate %205, %208, %211, %214 in 1 : vector<1x1xf32>, vector<1x1xf32>, vector<1x1xf32>, vector<1x1xf32> -> vector<1x4xf32>
    %216 = arith.mulf %32, %103 : vector<16x32xf32>
    %cst_56 = arith.constant dense<0.000000e+00> : vector<32xf32>
    %217 = vector.multi_reduction <add>, %216, %cst_56 [0] : vector<16x32xf32> to vector<32xf32>
    %218 = vector.shape_cast %217 : vector<32xf32> to vector<1x32xf32>
    %219 = vector.extract_strided_slice %218 {offsets = [0, 0], sizes = [1, 8], strides = [1, 1]} : vector<1x32xf32> to vector<1x8xf32>
    %cst_57 = arith.constant dense<0.000000e+00> : vector<1xf32>
    %220 = vector.multi_reduction <add>, %219, %cst_57 [1] : vector<1x8xf32> to vector<1xf32>
    %221 = vector.shape_cast %220 : vector<1xf32> to vector<1x1xf32>
    %222 = vector.extract_strided_slice %218 {offsets = [0, 8], sizes = [1, 8], strides = [1, 1]} : vector<1x32xf32> to vector<1x8xf32>
    %cst_58 = arith.constant dense<0.000000e+00> : vector<1xf32>
    %223 = vector.multi_reduction <add>, %222, %cst_58 [1] : vector<1x8xf32> to vector<1xf32>
    %224 = vector.shape_cast %223 : vector<1xf32> to vector<1x1xf32>
    %225 = vector.extract_strided_slice %218 {offsets = [0, 16], sizes = [1, 8], strides = [1, 1]} : vector<1x32xf32> to vector<1x8xf32>
    %cst_59 = arith.constant dense<0.000000e+00> : vector<1xf32>
    %226 = vector.multi_reduction <add>, %225, %cst_59 [1] : vector<1x8xf32> to vector<1xf32>
    %227 = vector.shape_cast %226 : vector<1xf32> to vector<1x1xf32>
    %228 = vector.extract_strided_slice %218 {offsets = [0, 24], sizes = [1, 8], strides = [1, 1]} : vector<1x32xf32> to vector<1x8xf32>
    %cst_60 = arith.constant dense<0.000000e+00> : vector<1xf32>
    %229 = vector.multi_reduction <add>, %228, %cst_60 [1] : vector<1x8xf32> to vector<1xf32>
    %230 = vector.shape_cast %229 : vector<1xf32> to vector<1x1xf32>
    %231 = tpu.concatenate %221, %224, %227, %230 in 1 : vector<1x1xf32>, vector<1x1xf32>, vector<1x1xf32>, vector<1x1xf32> -> vector<1x4xf32>
    %232 = tpu.concatenate %119, %135, %151, %167, %183, %199, %215, %231 in 0 : vector<1x4xf32>, vector<1x4xf32>, vector<1x4xf32>, vector<1x4xf32>, vector<1x4xf32>, vector<1x4xf32>, vector<1x4xf32>, vector<1x4xf32> -> vector<8x4xf32>
    %cst_61 = arith.constant 1.600000e+01 : f32
    %233 = vector.broadcast %cst_61 : f32 to vector<8x4xf32>
    %234 = arith.divf %232, %233 : vector<8x4xf32>
    %235 = arith.addf %33, %234 : vector<8x4xf32>
    %cst_62 = arith.constant dense<0xFF800000> : vector<8xf32>
    %236 = vector.multi_reduction <maximumf>, %235, %cst_62 [1] : vector<8x4xf32> to vector<8xf32>
    %237 = vector.shape_cast %236 : vector<8xf32> to vector<8x1xf32>
    %238 = vector.broadcast %237 : vector<8x1xf32> to vector<8x4xf32>
    %239 = arith.subf %235, %238 : vector<8x4xf32>
    %240 = math.exp %239 : vector<8x4xf32>
    %cst_63 = arith.constant dense<0.000000e+00> : vector<8xf32>
    %241 = vector.multi_reduction <add>, %240, %cst_63 [1] : vector<8x4xf32> to vector<8xf32>
    %242 = vector.shape_cast %241 : vector<8xf32> to vector<8x1xf32>
    %243 = vector.broadcast %242 : vector<8x1xf32> to vector<8x4xf32>
    %244 = arith.divf %240, %243 : vector<8x4xf32>
    %245 = vector.extract_strided_slice %244 {offsets = [0, 0], sizes = [8, 1], strides = [1, 1]} : vector<8x4xf32> to vector<8x1xf32>
    %246 = vector.shape_cast %245 : vector<8x1xf32> to vector<8x1xf32>
    %247 = vector.broadcast %246 : vector<8x1xf32> to vector<8x8xf32>
    %248 = vector.extract_strided_slice %244 {offsets = [0, 1], sizes = [8, 1], strides = [1, 1]} : vector<8x4xf32> to vector<8x1xf32>
    %249 = vector.shape_cast %248 : vector<8x1xf32> to vector<8x1xf32>
    %250 = vector.broadcast %249 : vector<8x1xf32> to vector<8x8xf32>
    %251 = vector.extract_strided_slice %244 {offsets = [0, 2], sizes = [8, 1], strides = [1, 1]} : vector<8x4xf32> to vector<8x1xf32>
    %252 = vector.shape_cast %251 : vector<8x1xf32> to vector<8x1xf32>
    %253 = vector.broadcast %252 : vector<8x1xf32> to vector<8x8xf32>
    %254 = vector.extract_strided_slice %244 {offsets = [0, 3], sizes = [8, 1], strides = [1, 1]} : vector<8x4xf32> to vector<8x1xf32>
    %255 = vector.shape_cast %254 : vector<8x1xf32> to vector<8x1xf32>
    %256 = vector.broadcast %255 : vector<8x1xf32> to vector<8x8xf32>
    %257 = tpu.concatenate %247, %250, %253, %256 in 1 : vector<8x8xf32>, vector<8x8xf32>, vector<8x8xf32>, vector<8x8xf32> -> vector<8x32xf32>
    %258 = vector.extract_strided_slice %257 {offsets = [0, 0], sizes = [1, 32], strides = [1, 1]} : vector<8x32xf32> to vector<1x32xf32>
    %259 = vector.broadcast %258 : vector<1x32xf32> to vector<16x32xf32>
    %260 = arith.mulf %25, %259 : vector<16x32xf32>
    %261 = vector.extract_strided_slice %257 {offsets = [1, 0], sizes = [1, 32], strides = [1, 1]} : vector<8x32xf32> to vector<1x32xf32>
    %262 = vector.broadcast %261 : vector<1x32xf32> to vector<16x32xf32>
    %263 = arith.mulf %26, %262 : vector<16x32xf32>
    %264 = arith.addf %260, %263 : vector<16x32xf32>
    %265 = vector.extract_strided_slice %257 {offsets = [2, 0], sizes = [1, 32], strides = [1, 1]} : vector<8x32xf32> to vector<1x32xf32>
    %266 = vector.broadcast %265 : vector<1x32xf32> to vector<16x32xf32>
    %267 = arith.mulf %27, %266 : vector<16x32xf32>
    %268 = arith.addf %264, %267 : vector<16x32xf32>
    %269 = vector.extract_strided_slice %257 {offsets = [3, 0], sizes = [1, 32], strides = [1, 1]} : vector<8x32xf32> to vector<1x32xf32>
    %270 = vector.broadcast %269 : vector<1x32xf32> to vector<16x32xf32>
    %271 = arith.mulf %28, %270 : vector<16x32xf32>
    %272 = arith.addf %268, %271 : vector<16x32xf32>
    %273 = vector.extract_strided_slice %257 {offsets = [4, 0], sizes = [1, 32], strides = [1, 1]} : vector<8x32xf32> to vector<1x32xf32>
    %274 = vector.broadcast %273 : vector<1x32xf32> to vector<16x32xf32>
    %275 = arith.mulf %29, %274 : vector<16x32xf32>
    %276 = arith.addf %272, %275 : vector<16x32xf32>
    %277 = vector.extract_strided_slice %257 {offsets = [5, 0], sizes = [1, 32], strides = [1, 1]} : vector<8x32xf32> to vector<1x32xf32>
    %278 = vector.broadcast %277 : vector<1x32xf32> to vector<16x32xf32>
    %279 = arith.mulf %30, %278 : vector<16x32xf32>
    %280 = arith.addf %276, %279 : vector<16x32xf32>
    %281 = vector.extract_strided_slice %257 {offsets = [6, 0], sizes = [1, 32], strides = [1, 1]} : vector<8x32xf32> to vector<1x32xf32>
    %282 = vector.broadcast %281 : vector<1x32xf32> to vector<16x32xf32>
    %283 = arith.mulf %31, %282 : vector<16x32xf32>
    %284 = arith.addf %280, %283 : vector<16x32xf32>
    %285 = vector.extract_strided_slice %257 {offsets = [7, 0], sizes = [1, 32], strides = [1, 1]} : vector<8x32xf32> to vector<1x32xf32>
    %286 = vector.broadcast %285 : vector<1x32xf32> to vector<16x32xf32>
    %287 = arith.mulf %32, %286 : vector<16x32xf32>
    %288 = arith.addf %284, %287 : vector<16x32xf32>
    %289 = arith.mulf %288, %288 : vector<16x32xf32>
    %290 = vector.extract_strided_slice %289 {offsets = [0, 0], sizes = [16, 8], strides = [1, 1]} : vector<16x32xf32> to vector<16x8xf32>
    %291 = vector.extract_strided_slice %289 {offsets = [0, 8], sizes = [16, 8], strides = [1, 1]} : vector<16x32xf32> to vector<16x8xf32>
    %292 = arith.addf %290, %291 : vector<16x8xf32>
    %293 = vector.extract_strided_slice %289 {offsets = [0, 16], sizes = [16, 8], strides = [1, 1]} : vector<16x32xf32> to vector<16x8xf32>
    %294 = arith.addf %292, %293 : vector<16x8xf32>
    %295 = vector.extract_strided_slice %289 {offsets = [0, 24], sizes = [16, 8], strides = [1, 1]} : vector<16x32xf32> to vector<16x8xf32>
    %296 = arith.addf %294, %295 : vector<16x8xf32>
    %297 = tpu.concatenate %296, %296, %296, %296 in 1 : vector<16x8xf32>, vector<16x8xf32>, vector<16x8xf32>, vector<16x8xf32> -> vector<16x32xf32>
    %cst_64 = arith.constant 1.000000e+00 : f32
    %298 = vector.broadcast %cst_64 : f32 to vector<16x32xf32>
    %299 = arith.addf %298, %297 : vector<16x32xf32>
    %300 = arith.divf %297, %299 : vector<16x32xf32>
    %301 = arith.mulf %300, %288 : vector<16x32xf32>
    %cst_65 = arith.constant 9.99999971E-10 : f32
    %302 = vector.broadcast %cst_65 : f32 to vector<16x32xf32>
    %303 = arith.addf %297, %302 : vector<16x32xf32>
    %304 = math.rsqrt %303 : vector<16x32xf32>
    %305 = arith.mulf %301, %304 : vector<16x32xf32>
    %306 = arith.mulf %25, %305 : vector<16x32xf32>
    %cst_66 = arith.constant dense<0.000000e+00> : vector<32xf32>
    %307 = vector.multi_reduction <add>, %306, %cst_66 [0] : vector<16x32xf32> to vector<32xf32>
    %308 = vector.shape_cast %307 : vector<32xf32> to vector<1x32xf32>
    %309 = vector.extract_strided_slice %308 {offsets = [0, 0], sizes = [1, 8], strides = [1, 1]} : vector<1x32xf32> to vector<1x8xf32>
    %cst_67 = arith.constant dense<0.000000e+00> : vector<1xf32>
    %310 = vector.multi_reduction <add>, %309, %cst_67 [1] : vector<1x8xf32> to vector<1xf32>
    %311 = vector.shape_cast %310 : vector<1xf32> to vector<1x1xf32>
    %312 = vector.extract_strided_slice %308 {offsets = [0, 8], sizes = [1, 8], strides = [1, 1]} : vector<1x32xf32> to vector<1x8xf32>
    %cst_68 = arith.constant dense<0.000000e+00> : vector<1xf32>
    %313 = vector.multi_reduction <add>, %312, %cst_68 [1] : vector<1x8xf32> to vector<1xf32>
    %314 = vector.shape_cast %313 : vector<1xf32> to vector<1x1xf32>
    %315 = vector.extract_strided_slice %308 {offsets = [0, 16], sizes = [1, 8], strides = [1, 1]} : vector<1x32xf32> to vector<1x8xf32>
    %cst_69 = arith.constant dense<0.000000e+00> : vector<1xf32>
    %316 = vector.multi_reduction <add>, %315, %cst_69 [1] : vector<1x8xf32> to vector<1xf32>
    %317 = vector.shape_cast %316 : vector<1xf32> to vector<1x1xf32>
    %318 = vector.extract_strided_slice %308 {offsets = [0, 24], sizes = [1, 8], strides = [1, 1]} : vector<1x32xf32> to vector<1x8xf32>
    %cst_70 = arith.constant dense<0.000000e+00> : vector<1xf32>
    %319 = vector.multi_reduction <add>, %318, %cst_70 [1] : vector<1x8xf32> to vector<1xf32>
    %320 = vector.shape_cast %319 : vector<1xf32> to vector<1x1xf32>
    %321 = tpu.concatenate %311, %314, %317, %320 in 1 : vector<1x1xf32>, vector<1x1xf32>, vector<1x1xf32>, vector<1x1xf32> -> vector<1x4xf32>
    %322 = arith.mulf %26, %305 : vector<16x32xf32>
    %cst_71 = arith.constant dense<0.000000e+00> : vector<32xf32>
    %323 = vector.multi_reduction <add>, %322, %cst_71 [0] : vector<16x32xf32> to vector<32xf32>
    %324 = vector.shape_cast %323 : vector<32xf32> to vector<1x32xf32>
    %325 = vector.extract_strided_slice %324 {offsets = [0, 0], sizes = [1, 8], strides = [1, 1]} : vector<1x32xf32> to vector<1x8xf32>
    %cst_72 = arith.constant dense<0.000000e+00> : vector<1xf32>
    %326 = vector.multi_reduction <add>, %325, %cst_72 [1] : vector<1x8xf32> to vector<1xf32>
    %327 = vector.shape_cast %326 : vector<1xf32> to vector<1x1xf32>
    %328 = vector.extract_strided_slice %324 {offsets = [0, 8], sizes = [1, 8], strides = [1, 1]} : vector<1x32xf32> to vector<1x8xf32>
    %cst_73 = arith.constant dense<0.000000e+00> : vector<1xf32>
    %329 = vector.multi_reduction <add>, %328, %cst_73 [1] : vector<1x8xf32> to vector<1xf32>
    %330 = vector.shape_cast %329 : vector<1xf32> to vector<1x1xf32>
    %331 = vector.extract_strided_slice %324 {offsets = [0, 16], sizes = [1, 8], strides = [1, 1]} : vector<1x32xf32> to vector<1x8xf32>
    %cst_74 = arith.constant dense<0.000000e+00> : vector<1xf32>
    %332 = vector.multi_reduction <add>, %331, %cst_74 [1] : vector<1x8xf32> to vector<1xf32>
    %333 = vector.shape_cast %332 : vector<1xf32> to vector<1x1xf32>
    %334 = vector.extract_strided_slice %324 {offsets = [0, 24], sizes = [1, 8], strides = [1, 1]} : vector<1x32xf32> to vector<1x8xf32>
    %cst_75 = arith.constant dense<0.000000e+00> : vector<1xf32>
    %335 = vector.multi_reduction <add>, %334, %cst_75 [1] : vector<1x8xf32> to vector<1xf32>
    %336 = vector.shape_cast %335 : vector<1xf32> to vector<1x1xf32>
    %337 = tpu.concatenate %327, %330, %333, %336 in 1 : vector<1x1xf32>, vector<1x1xf32>, vector<1x1xf32>, vector<1x1xf32> -> vector<1x4xf32>
    %338 = arith.mulf %27, %305 : vector<16x32xf32>
    %cst_76 = arith.constant dense<0.000000e+00> : vector<32xf32>
    %339 = vector.multi_reduction <add>, %338, %cst_76 [0] : vector<16x32xf32> to vector<32xf32>
    %340 = vector.shape_cast %339 : vector<32xf32> to vector<1x32xf32>
    %341 = vector.extract_strided_slice %340 {offsets = [0, 0], sizes = [1, 8], strides = [1, 1]} : vector<1x32xf32> to vector<1x8xf32>
    %cst_77 = arith.constant dense<0.000000e+00> : vector<1xf32>
    %342 = vector.multi_reduction <add>, %341, %cst_77 [1] : vector<1x8xf32> to vector<1xf32>
    %343 = vector.shape_cast %342 : vector<1xf32> to vector<1x1xf32>
    %344 = vector.extract_strided_slice %340 {offsets = [0, 8], sizes = [1, 8], strides = [1, 1]} : vector<1x32xf32> to vector<1x8xf32>
    %cst_78 = arith.constant dense<0.000000e+00> : vector<1xf32>
    %345 = vector.multi_reduction <add>, %344, %cst_78 [1] : vector<1x8xf32> to vector<1xf32>
    %346 = vector.shape_cast %345 : vector<1xf32> to vector<1x1xf32>
    %347 = vector.extract_strided_slice %340 {offsets = [0, 16], sizes = [1, 8], strides = [1, 1]} : vector<1x32xf32> to vector<1x8xf32>
    %cst_79 = arith.constant dense<0.000000e+00> : vector<1xf32>
    %348 = vector.multi_reduction <add>, %347, %cst_79 [1] : vector<1x8xf32> to vector<1xf32>
    %349 = vector.shape_cast %348 : vector<1xf32> to vector<1x1xf32>
    %350 = vector.extract_strided_slice %340 {offsets = [0, 24], sizes = [1, 8], strides = [1, 1]} : vector<1x32xf32> to vector<1x8xf32>
    %cst_80 = arith.constant dense<0.000000e+00> : vector<1xf32>
    %351 = vector.multi_reduction <add>, %350, %cst_80 [1] : vector<1x8xf32> to vector<1xf32>
    %352 = vector.shape_cast %351 : vector<1xf32> to vector<1x1xf32>
    %353 = tpu.concatenate %343, %346, %349, %352 in 1 : vector<1x1xf32>, vector<1x1xf32>, vector<1x1xf32>, vector<1x1xf32> -> vector<1x4xf32>
    %354 = arith.mulf %28, %305 : vector<16x32xf32>
    %cst_81 = arith.constant dense<0.000000e+00> : vector<32xf32>
    %355 = vector.multi_reduction <add>, %354, %cst_81 [0] : vector<16x32xf32> to vector<32xf32>
    %356 = vector.shape_cast %355 : vector<32xf32> to vector<1x32xf32>
    %357 = vector.extract_strided_slice %356 {offsets = [0, 0], sizes = [1, 8], strides = [1, 1]} : vector<1x32xf32> to vector<1x8xf32>
    %cst_82 = arith.constant dense<0.000000e+00> : vector<1xf32>
    %358 = vector.multi_reduction <add>, %357, %cst_82 [1] : vector<1x8xf32> to vector<1xf32>
    %359 = vector.shape_cast %358 : vector<1xf32> to vector<1x1xf32>
    %360 = vector.extract_strided_slice %356 {offsets = [0, 8], sizes = [1, 8], strides = [1, 1]} : vector<1x32xf32> to vector<1x8xf32>
    %cst_83 = arith.constant dense<0.000000e+00> : vector<1xf32>
    %361 = vector.multi_reduction <add>, %360, %cst_83 [1] : vector<1x8xf32> to vector<1xf32>
    %362 = vector.shape_cast %361 : vector<1xf32> to vector<1x1xf32>
    %363 = vector.extract_strided_slice %356 {offsets = [0, 16], sizes = [1, 8], strides = [1, 1]} : vector<1x32xf32> to vector<1x8xf32>
    %cst_84 = arith.constant dense<0.000000e+00> : vector<1xf32>
    %364 = vector.multi_reduction <add>, %363, %cst_84 [1] : vector<1x8xf32> to vector<1xf32>
    %365 = vector.shape_cast %364 : vector<1xf32> to vector<1x1xf32>
    %366 = vector.extract_strided_slice %356 {offsets = [0, 24], sizes = [1, 8], strides = [1, 1]} : vector<1x32xf32> to vector<1x8xf32>
    %cst_85 = arith.constant dense<0.000000e+00> : vector<1xf32>
    %367 = vector.multi_reduction <add>, %366, %cst_85 [1] : vector<1x8xf32> to vector<1xf32>
    %368 = vector.shape_cast %367 : vector<1xf32> to vector<1x1xf32>
    %369 = tpu.concatenate %359, %362, %365, %368 in 1 : vector<1x1xf32>, vector<1x1xf32>, vector<1x1xf32>, vector<1x1xf32> -> vector<1x4xf32>
    %370 = arith.mulf %29, %305 : vector<16x32xf32>
    %cst_86 = arith.constant dense<0.000000e+00> : vector<32xf32>
    %371 = vector.multi_reduction <add>, %370, %cst_86 [0] : vector<16x32xf32> to vector<32xf32>
    %372 = vector.shape_cast %371 : vector<32xf32> to vector<1x32xf32>
    %373 = vector.extract_strided_slice %372 {offsets = [0, 0], sizes = [1, 8], strides = [1, 1]} : vector<1x32xf32> to vector<1x8xf32>
    %cst_87 = arith.constant dense<0.000000e+00> : vector<1xf32>
    %374 = vector.multi_reduction <add>, %373, %cst_87 [1] : vector<1x8xf32> to vector<1xf32>
    %375 = vector.shape_cast %374 : vector<1xf32> to vector<1x1xf32>
    %376 = vector.extract_strided_slice %372 {offsets = [0, 8], sizes = [1, 8], strides = [1, 1]} : vector<1x32xf32> to vector<1x8xf32>
    %cst_88 = arith.constant dense<0.000000e+00> : vector<1xf32>
    %377 = vector.multi_reduction <add>, %376, %cst_88 [1] : vector<1x8xf32> to vector<1xf32>
    %378 = vector.shape_cast %377 : vector<1xf32> to vector<1x1xf32>
    %379 = vector.extract_strided_slice %372 {offsets = [0, 16], sizes = [1, 8], strides = [1, 1]} : vector<1x32xf32> to vector<1x8xf32>
    %cst_89 = arith.constant dense<0.000000e+00> : vector<1xf32>
    %380 = vector.multi_reduction <add>, %379, %cst_89 [1] : vector<1x8xf32> to vector<1xf32>
    %381 = vector.shape_cast %380 : vector<1xf32> to vector<1x1xf32>
    %382 = vector.extract_strided_slice %372 {offsets = [0, 24], sizes = [1, 8], strides = [1, 1]} : vector<1x32xf32> to vector<1x8xf32>
    %cst_90 = arith.constant dense<0.000000e+00> : vector<1xf32>
    %383 = vector.multi_reduction <add>, %382, %cst_90 [1] : vector<1x8xf32> to vector<1xf32>
    %384 = vector.shape_cast %383 : vector<1xf32> to vector<1x1xf32>
    %385 = tpu.concatenate %375, %378, %381, %384 in 1 : vector<1x1xf32>, vector<1x1xf32>, vector<1x1xf32>, vector<1x1xf32> -> vector<1x4xf32>
    %386 = arith.mulf %30, %305 : vector<16x32xf32>
    %cst_91 = arith.constant dense<0.000000e+00> : vector<32xf32>
    %387 = vector.multi_reduction <add>, %386, %cst_91 [0] : vector<16x32xf32> to vector<32xf32>
    %388 = vector.shape_cast %387 : vector<32xf32> to vector<1x32xf32>
    %389 = vector.extract_strided_slice %388 {offsets = [0, 0], sizes = [1, 8], strides = [1, 1]} : vector<1x32xf32> to vector<1x8xf32>
    %cst_92 = arith.constant dense<0.000000e+00> : vector<1xf32>
    %390 = vector.multi_reduction <add>, %389, %cst_92 [1] : vector<1x8xf32> to vector<1xf32>
    %391 = vector.shape_cast %390 : vector<1xf32> to vector<1x1xf32>
    %392 = vector.extract_strided_slice %388 {offsets = [0, 8], sizes = [1, 8], strides = [1, 1]} : vector<1x32xf32> to vector<1x8xf32>
    %cst_93 = arith.constant dense<0.000000e+00> : vector<1xf32>
    %393 = vector.multi_reduction <add>, %392, %cst_93 [1] : vector<1x8xf32> to vector<1xf32>
    %394 = vector.shape_cast %393 : vector<1xf32> to vector<1x1xf32>
    %395 = vector.extract_strided_slice %388 {offsets = [0, 16], sizes = [1, 8], strides = [1, 1]} : vector<1x32xf32> to vector<1x8xf32>
    %cst_94 = arith.constant dense<0.000000e+00> : vector<1xf32>
    %396 = vector.multi_reduction <add>, %395, %cst_94 [1] : vector<1x8xf32> to vector<1xf32>
    %397 = vector.shape_cast %396 : vector<1xf32> to vector<1x1xf32>
    %398 = vector.extract_strided_slice %388 {offsets = [0, 24], sizes = [1, 8], strides = [1, 1]} : vector<1x32xf32> to vector<1x8xf32>
    %cst_95 = arith.constant dense<0.000000e+00> : vector<1xf32>
    %399 = vector.multi_reduction <add>, %398, %cst_95 [1] : vector<1x8xf32> to vector<1xf32>
    %400 = vector.shape_cast %399 : vector<1xf32> to vector<1x1xf32>
    %401 = tpu.concatenate %391, %394, %397, %400 in 1 : vector<1x1xf32>, vector<1x1xf32>, vector<1x1xf32>, vector<1x1xf32> -> vector<1x4xf32>
    %402 = arith.mulf %31, %305 : vector<16x32xf32>
    %cst_96 = arith.constant dense<0.000000e+00> : vector<32xf32>
    %403 = vector.multi_reduction <add>, %402, %cst_96 [0] : vector<16x32xf32> to vector<32xf32>
    %404 = vector.shape_cast %403 : vector<32xf32> to vector<1x32xf32>
    %405 = vector.extract_strided_slice %404 {offsets = [0, 0], sizes = [1, 8], strides = [1, 1]} : vector<1x32xf32> to vector<1x8xf32>
    %cst_97 = arith.constant dense<0.000000e+00> : vector<1xf32>
    %406 = vector.multi_reduction <add>, %405, %cst_97 [1] : vector<1x8xf32> to vector<1xf32>
    %407 = vector.shape_cast %406 : vector<1xf32> to vector<1x1xf32>
    %408 = vector.extract_strided_slice %404 {offsets = [0, 8], sizes = [1, 8], strides = [1, 1]} : vector<1x32xf32> to vector<1x8xf32>
    %cst_98 = arith.constant dense<0.000000e+00> : vector<1xf32>
    %409 = vector.multi_reduction <add>, %408, %cst_98 [1] : vector<1x8xf32> to vector<1xf32>
    %410 = vector.shape_cast %409 : vector<1xf32> to vector<1x1xf32>
    %411 = vector.extract_strided_slice %404 {offsets = [0, 16], sizes = [1, 8], strides = [1, 1]} : vector<1x32xf32> to vector<1x8xf32>
    %cst_99 = arith.constant dense<0.000000e+00> : vector<1xf32>
    %412 = vector.multi_reduction <add>, %411, %cst_99 [1] : vector<1x8xf32> to vector<1xf32>
    %413 = vector.shape_cast %412 : vector<1xf32> to vector<1x1xf32>
    %414 = vector.extract_strided_slice %404 {offsets = [0, 24], sizes = [1, 8], strides = [1, 1]} : vector<1x32xf32> to vector<1x8xf32>
    %cst_100 = arith.constant dense<0.000000e+00> : vector<1xf32>
    %415 = vector.multi_reduction <add>, %414, %cst_100 [1] : vector<1x8xf32> to vector<1xf32>
    %416 = vector.shape_cast %415 : vector<1xf32> to vector<1x1xf32>
    %417 = tpu.concatenate %407, %410, %413, %416 in 1 : vector<1x1xf32>, vector<1x1xf32>, vector<1x1xf32>, vector<1x1xf32> -> vector<1x4xf32>
    %418 = arith.mulf %32, %305 : vector<16x32xf32>
    %cst_101 = arith.constant dense<0.000000e+00> : vector<32xf32>
    %419 = vector.multi_reduction <add>, %418, %cst_101 [0] : vector<16x32xf32> to vector<32xf32>
    %420 = vector.shape_cast %419 : vector<32xf32> to vector<1x32xf32>
    %421 = vector.extract_strided_slice %420 {offsets = [0, 0], sizes = [1, 8], strides = [1, 1]} : vector<1x32xf32> to vector<1x8xf32>
    %cst_102 = arith.constant dense<0.000000e+00> : vector<1xf32>
    %422 = vector.multi_reduction <add>, %421, %cst_102 [1] : vector<1x8xf32> to vector<1xf32>
    %423 = vector.shape_cast %422 : vector<1xf32> to vector<1x1xf32>
    %424 = vector.extract_strided_slice %420 {offsets = [0, 8], sizes = [1, 8], strides = [1, 1]} : vector<1x32xf32> to vector<1x8xf32>
    %cst_103 = arith.constant dense<0.000000e+00> : vector<1xf32>
    %425 = vector.multi_reduction <add>, %424, %cst_103 [1] : vector<1x8xf32> to vector<1xf32>
    %426 = vector.shape_cast %425 : vector<1xf32> to vector<1x1xf32>
    %427 = vector.extract_strided_slice %420 {offsets = [0, 16], sizes = [1, 8], strides = [1, 1]} : vector<1x32xf32> to vector<1x8xf32>
    %cst_104 = arith.constant dense<0.000000e+00> : vector<1xf32>
    %428 = vector.multi_reduction <add>, %427, %cst_104 [1] : vector<1x8xf32> to vector<1xf32>
    %429 = vector.shape_cast %428 : vector<1xf32> to vector<1x1xf32>
    %430 = vector.extract_strided_slice %420 {offsets = [0, 24], sizes = [1, 8], strides = [1, 1]} : vector<1x32xf32> to vector<1x8xf32>
    %cst_105 = arith.constant dense<0.000000e+00> : vector<1xf32>
    %431 = vector.multi_reduction <add>, %430, %cst_105 [1] : vector<1x8xf32> to vector<1xf32>
    %432 = vector.shape_cast %431 : vector<1xf32> to vector<1x1xf32>
    %433 = tpu.concatenate %423, %426, %429, %432 in 1 : vector<1x1xf32>, vector<1x1xf32>, vector<1x1xf32>, vector<1x1xf32> -> vector<1x4xf32>
    %434 = tpu.concatenate %321, %337, %353, %369, %385, %401, %417, %433 in 0 : vector<1x4xf32>, vector<1x4xf32>, vector<1x4xf32>, vector<1x4xf32>, vector<1x4xf32>, vector<1x4xf32>, vector<1x4xf32>, vector<1x4xf32> -> vector<8x4xf32>
    %cst_106 = arith.constant 1.600000e+01 : f32
    %435 = vector.broadcast %cst_106 : f32 to vector<8x4xf32>
    %436 = arith.divf %434, %435 : vector<8x4xf32>
    %437 = arith.addf %235, %436 : vector<8x4xf32>
    %cst_107 = arith.constant dense<0xFF800000> : vector<8xf32>
    %438 = vector.multi_reduction <maximumf>, %437, %cst_107 [1] : vector<8x4xf32> to vector<8xf32>
    %439 = vector.shape_cast %438 : vector<8xf32> to vector<8x1xf32>
    %440 = vector.broadcast %439 : vector<8x1xf32> to vector<8x4xf32>
    %441 = arith.subf %437, %440 : vector<8x4xf32>
    %442 = math.exp %441 : vector<8x4xf32>
    %cst_108 = arith.constant dense<0.000000e+00> : vector<8xf32>
    %443 = vector.multi_reduction <add>, %442, %cst_108 [1] : vector<8x4xf32> to vector<8xf32>
    %444 = vector.shape_cast %443 : vector<8xf32> to vector<8x1xf32>
    %445 = vector.broadcast %444 : vector<8x1xf32> to vector<8x4xf32>
    %446 = arith.divf %442, %445 : vector<8x4xf32>
    %447 = vector.extract_strided_slice %446 {offsets = [0, 0], sizes = [8, 1], strides = [1, 1]} : vector<8x4xf32> to vector<8x1xf32>
    %448 = vector.shape_cast %447 : vector<8x1xf32> to vector<8x1xf32>
    %449 = vector.broadcast %448 : vector<8x1xf32> to vector<8x8xf32>
    %450 = vector.extract_strided_slice %446 {offsets = [0, 1], sizes = [8, 1], strides = [1, 1]} : vector<8x4xf32> to vector<8x1xf32>
    %451 = vector.shape_cast %450 : vector<8x1xf32> to vector<8x1xf32>
    %452 = vector.broadcast %451 : vector<8x1xf32> to vector<8x8xf32>
    %453 = vector.extract_strided_slice %446 {offsets = [0, 2], sizes = [8, 1], strides = [1, 1]} : vector<8x4xf32> to vector<8x1xf32>
    %454 = vector.shape_cast %453 : vector<8x1xf32> to vector<8x1xf32>
    %455 = vector.broadcast %454 : vector<8x1xf32> to vector<8x8xf32>
    %456 = vector.extract_strided_slice %446 {offsets = [0, 3], sizes = [8, 1], strides = [1, 1]} : vector<8x4xf32> to vector<8x1xf32>
    %457 = vector.shape_cast %456 : vector<8x1xf32> to vector<8x1xf32>
    %458 = vector.broadcast %457 : vector<8x1xf32> to vector<8x8xf32>
    %459 = tpu.concatenate %449, %452, %455, %458 in 1 : vector<8x8xf32>, vector<8x8xf32>, vector<8x8xf32>, vector<8x8xf32> -> vector<8x32xf32>
    %460 = vector.extract_strided_slice %459 {offsets = [0, 0], sizes = [1, 32], strides = [1, 1]} : vector<8x32xf32> to vector<1x32xf32>
    %461 = vector.broadcast %460 : vector<1x32xf32> to vector<16x32xf32>
    %462 = arith.mulf %25, %461 : vector<16x32xf32>
    %463 = vector.extract_strided_slice %459 {offsets = [1, 0], sizes = [1, 32], strides = [1, 1]} : vector<8x32xf32> to vector<1x32xf32>
    %464 = vector.broadcast %463 : vector<1x32xf32> to vector<16x32xf32>
    %465 = arith.mulf %26, %464 : vector<16x32xf32>
    %466 = arith.addf %462, %465 : vector<16x32xf32>
    %467 = vector.extract_strided_slice %459 {offsets = [2, 0], sizes = [1, 32], strides = [1, 1]} : vector<8x32xf32> to vector<1x32xf32>
    %468 = vector.broadcast %467 : vector<1x32xf32> to vector<16x32xf32>
    %469 = arith.mulf %27, %468 : vector<16x32xf32>
    %470 = arith.addf %466, %469 : vector<16x32xf32>
    %471 = vector.extract_strided_slice %459 {offsets = [3, 0], sizes = [1, 32], strides = [1, 1]} : vector<8x32xf32> to vector<1x32xf32>
    %472 = vector.broadcast %471 : vector<1x32xf32> to vector<16x32xf32>
    %473 = arith.mulf %28, %472 : vector<16x32xf32>
    %474 = arith.addf %470, %473 : vector<16x32xf32>
    %475 = vector.extract_strided_slice %459 {offsets = [4, 0], sizes = [1, 32], strides = [1, 1]} : vector<8x32xf32> to vector<1x32xf32>
    %476 = vector.broadcast %475 : vector<1x32xf32> to vector<16x32xf32>
    %477 = arith.mulf %29, %476 : vector<16x32xf32>
    %478 = arith.addf %474, %477 : vector<16x32xf32>
    %479 = vector.extract_strided_slice %459 {offsets = [5, 0], sizes = [1, 32], strides = [1, 1]} : vector<8x32xf32> to vector<1x32xf32>
    %480 = vector.broadcast %479 : vector<1x32xf32> to vector<16x32xf32>
    %481 = arith.mulf %30, %480 : vector<16x32xf32>
    %482 = arith.addf %478, %481 : vector<16x32xf32>
    %483 = vector.extract_strided_slice %459 {offsets = [6, 0], sizes = [1, 32], strides = [1, 1]} : vector<8x32xf32> to vector<1x32xf32>
    %484 = vector.broadcast %483 : vector<1x32xf32> to vector<16x32xf32>
    %485 = arith.mulf %31, %484 : vector<16x32xf32>
    %486 = arith.addf %482, %485 : vector<16x32xf32>
    %487 = vector.extract_strided_slice %459 {offsets = [7, 0], sizes = [1, 32], strides = [1, 1]} : vector<8x32xf32> to vector<1x32xf32>
    %488 = vector.broadcast %487 : vector<1x32xf32> to vector<16x32xf32>
    %489 = arith.mulf %32, %488 : vector<16x32xf32>
    %490 = arith.addf %486, %489 : vector<16x32xf32>
    %491 = arith.mulf %490, %490 : vector<16x32xf32>
    %492 = vector.extract_strided_slice %491 {offsets = [0, 0], sizes = [16, 8], strides = [1, 1]} : vector<16x32xf32> to vector<16x8xf32>
    %493 = vector.extract_strided_slice %491 {offsets = [0, 8], sizes = [16, 8], strides = [1, 1]} : vector<16x32xf32> to vector<16x8xf32>
    %494 = arith.addf %492, %493 : vector<16x8xf32>
    %495 = vector.extract_strided_slice %491 {offsets = [0, 16], sizes = [16, 8], strides = [1, 1]} : vector<16x32xf32> to vector<16x8xf32>
    %496 = arith.addf %494, %495 : vector<16x8xf32>
    %497 = vector.extract_strided_slice %491 {offsets = [0, 24], sizes = [16, 8], strides = [1, 1]} : vector<16x32xf32> to vector<16x8xf32>
    %498 = arith.addf %496, %497 : vector<16x8xf32>
    %499 = tpu.concatenate %498, %498, %498, %498 in 1 : vector<16x8xf32>, vector<16x8xf32>, vector<16x8xf32>, vector<16x8xf32> -> vector<16x32xf32>
    %cst_109 = arith.constant 1.000000e+00 : f32
    %500 = vector.broadcast %cst_109 : f32 to vector<16x32xf32>
    %501 = arith.addf %500, %499 : vector<16x32xf32>
    %502 = arith.divf %499, %501 : vector<16x32xf32>
    %503 = arith.mulf %502, %490 : vector<16x32xf32>
    %cst_110 = arith.constant 9.99999971E-10 : f32
    %504 = vector.broadcast %cst_110 : f32 to vector<16x32xf32>
    %505 = arith.addf %499, %504 : vector<16x32xf32>
    %506 = math.rsqrt %505 : vector<16x32xf32>
    %507 = arith.mulf %503, %506 : vector<16x32xf32>
    %c0_111 = arith.constant 0 : index
    %c0_112 = arith.constant 0 : index
    %508 = vector.load %arg7[%c0_111, %c0_112] : memref<32x96xf32, #tpu.memory_space<vmem>>, vector<32x96xf32>
    %cst_113 = arith.constant dense<0.000000e+00> : vector<16x96xf32>
    %509 = tpu.matmul %507, %508, %cst_113 {dimension_numbers = #tpu.dot_dimension_numbers<[1], [0], [0], [1], [0, 0, 1, 1], [], []>} : vector<16x32xf32>, vector<32x96xf32>, vector<16x96xf32> -> vector<16x96xf32>
    %510 = vector.extract_strided_slice %509 {offsets = [0, 0], sizes = [16, 24], strides = [1, 1]} : vector<16x96xf32> to vector<16x24xf32>
    %511 = vector.extract_strided_slice %509 {offsets = [0, 24], sizes = [16, 24], strides = [1, 1]} : vector<16x96xf32> to vector<16x24xf32>
    %512 = vector.extract_strided_slice %509 {offsets = [0, 48], sizes = [16, 24], strides = [1, 1]} : vector<16x96xf32> to vector<16x24xf32>
    %513 = vector.extract_strided_slice %509 {offsets = [0, 72], sizes = [16, 24], strides = [1, 1]} : vector<16x96xf32> to vector<16x24xf32>
    %cst_114 = arith.constant 0.000000e+00 : f32
    %514 = vector.broadcast %cst_114 : f32 to vector<4x3xf32>
    %cst_115 = arith.constant dense<0xFF800000> : vector<4xf32>
    %515 = vector.multi_reduction <maximumf>, %514, %cst_115 [1] : vector<4x3xf32> to vector<4xf32>
    %516 = vector.shape_cast %515 : vector<4xf32> to vector<4x1xf32>
    %517 = vector.broadcast %516 : vector<4x1xf32> to vector<4x3xf32>
    %518 = arith.subf %514, %517 : vector<4x3xf32>
    %519 = math.exp %518 : vector<4x3xf32>
    %cst_116 = arith.constant dense<0.000000e+00> : vector<4xf32>
    %520 = vector.multi_reduction <add>, %519, %cst_116 [1] : vector<4x3xf32> to vector<4xf32>
    %521 = vector.shape_cast %520 : vector<4xf32> to vector<4x1xf32>
    %522 = vector.broadcast %521 : vector<4x1xf32> to vector<4x3xf32>
    %523 = arith.divf %519, %522 : vector<4x3xf32>
    %524 = vector.extract_strided_slice %523 {offsets = [0, 0], sizes = [4, 1], strides = [1, 1]} : vector<4x3xf32> to vector<4x1xf32>
    %525 = vector.shape_cast %524 : vector<4x1xf32> to vector<4x1xf32>
    %526 = vector.broadcast %525 : vector<4x1xf32> to vector<4x8xf32>
    %527 = vector.extract_strided_slice %523 {offsets = [0, 1], sizes = [4, 1], strides = [1, 1]} : vector<4x3xf32> to vector<4x1xf32>
    %528 = vector.shape_cast %527 : vector<4x1xf32> to vector<4x1xf32>
    %529 = vector.broadcast %528 : vector<4x1xf32> to vector<4x8xf32>
    %530 = vector.extract_strided_slice %523 {offsets = [0, 2], sizes = [4, 1], strides = [1, 1]} : vector<4x3xf32> to vector<4x1xf32>
    %531 = vector.shape_cast %530 : vector<4x1xf32> to vector<4x1xf32>
    %532 = vector.broadcast %531 : vector<4x1xf32> to vector<4x8xf32>
    %533 = tpu.concatenate %526, %529, %532 in 1 : vector<4x8xf32>, vector<4x8xf32>, vector<4x8xf32> -> vector<4x24xf32>
    %534 = vector.extract_strided_slice %533 {offsets = [0, 0], sizes = [1, 24], strides = [1, 1]} : vector<4x24xf32> to vector<1x24xf32>
    %535 = vector.broadcast %534 : vector<1x24xf32> to vector<16x24xf32>
    %536 = arith.mulf %510, %535 : vector<16x24xf32>
    %537 = vector.extract_strided_slice %533 {offsets = [1, 0], sizes = [1, 24], strides = [1, 1]} : vector<4x24xf32> to vector<1x24xf32>
    %538 = vector.broadcast %537 : vector<1x24xf32> to vector<16x24xf32>
    %539 = arith.mulf %511, %538 : vector<16x24xf32>
    %540 = arith.addf %536, %539 : vector<16x24xf32>
    %541 = vector.extract_strided_slice %533 {offsets = [2, 0], sizes = [1, 24], strides = [1, 1]} : vector<4x24xf32> to vector<1x24xf32>
    %542 = vector.broadcast %541 : vector<1x24xf32> to vector<16x24xf32>
    %543 = arith.mulf %512, %542 : vector<16x24xf32>
    %544 = arith.addf %540, %543 : vector<16x24xf32>
    %545 = vector.extract_strided_slice %533 {offsets = [3, 0], sizes = [1, 24], strides = [1, 1]} : vector<4x24xf32> to vector<1x24xf32>
    %546 = vector.broadcast %545 : vector<1x24xf32> to vector<16x24xf32>
    %547 = arith.mulf %513, %546 : vector<16x24xf32>
    %548 = arith.addf %544, %547 : vector<16x24xf32>
    %549 = arith.mulf %548, %548 : vector<16x24xf32>
    %550 = vector.extract_strided_slice %549 {offsets = [0, 0], sizes = [16, 8], strides = [1, 1]} : vector<16x24xf32> to vector<16x8xf32>
    %551 = vector.extract_strided_slice %549 {offsets = [0, 8], sizes = [16, 8], strides = [1, 1]} : vector<16x24xf32> to vector<16x8xf32>
    %552 = arith.addf %550, %551 : vector<16x8xf32>
    %553 = vector.extract_strided_slice %549 {offsets = [0, 16], sizes = [16, 8], strides = [1, 1]} : vector<16x24xf32> to vector<16x8xf32>
    %554 = arith.addf %552, %553 : vector<16x8xf32>
    %555 = tpu.concatenate %554, %554, %554 in 1 : vector<16x8xf32>, vector<16x8xf32>, vector<16x8xf32> -> vector<16x24xf32>
    %cst_117 = arith.constant 1.000000e+00 : f32
    %556 = vector.broadcast %cst_117 : f32 to vector<16x24xf32>
    %557 = arith.addf %556, %555 : vector<16x24xf32>
    %558 = arith.divf %555, %557 : vector<16x24xf32>
    %559 = arith.mulf %558, %548 : vector<16x24xf32>
    %cst_118 = arith.constant 9.99999971E-10 : f32
    %560 = vector.broadcast %cst_118 : f32 to vector<16x24xf32>
    %561 = arith.addf %555, %560 : vector<16x24xf32>
    %562 = math.rsqrt %561 : vector<16x24xf32>
    %563 = arith.mulf %559, %562 : vector<16x24xf32>
    %564 = arith.mulf %510, %563 : vector<16x24xf32>
    %cst_119 = arith.constant dense<0.000000e+00> : vector<24xf32>
    %565 = vector.multi_reduction <add>, %564, %cst_119 [0] : vector<16x24xf32> to vector<24xf32>
    %566 = vector.shape_cast %565 : vector<24xf32> to vector<1x24xf32>
    %567 = vector.extract_strided_slice %566 {offsets = [0, 0], sizes = [1, 8], strides = [1, 1]} : vector<1x24xf32> to vector<1x8xf32>
    %cst_120 = arith.constant dense<0.000000e+00> : vector<1xf32>
    %568 = vector.multi_reduction <add>, %567, %cst_120 [1] : vector<1x8xf32> to vector<1xf32>
    %569 = vector.shape_cast %568 : vector<1xf32> to vector<1x1xf32>
    %570 = vector.extract_strided_slice %566 {offsets = [0, 8], sizes = [1, 8], strides = [1, 1]} : vector<1x24xf32> to vector<1x8xf32>
    %cst_121 = arith.constant dense<0.000000e+00> : vector<1xf32>
    %571 = vector.multi_reduction <add>, %570, %cst_121 [1] : vector<1x8xf32> to vector<1xf32>
    %572 = vector.shape_cast %571 : vector<1xf32> to vector<1x1xf32>
    %573 = vector.extract_strided_slice %566 {offsets = [0, 16], sizes = [1, 8], strides = [1, 1]} : vector<1x24xf32> to vector<1x8xf32>
    %cst_122 = arith.constant dense<0.000000e+00> : vector<1xf32>
    %574 = vector.multi_reduction <add>, %573, %cst_122 [1] : vector<1x8xf32> to vector<1xf32>
    %575 = vector.shape_cast %574 : vector<1xf32> to vector<1x1xf32>
    %576 = tpu.concatenate %569, %572, %575 in 1 : vector<1x1xf32>, vector<1x1xf32>, vector<1x1xf32> -> vector<1x3xf32>
    %577 = arith.mulf %511, %563 : vector<16x24xf32>
    %cst_123 = arith.constant dense<0.000000e+00> : vector<24xf32>
    %578 = vector.multi_reduction <add>, %577, %cst_123 [0] : vector<16x24xf32> to vector<24xf32>
    %579 = vector.shape_cast %578 : vector<24xf32> to vector<1x24xf32>
    %580 = vector.extract_strided_slice %579 {offsets = [0, 0], sizes = [1, 8], strides = [1, 1]} : vector<1x24xf32> to vector<1x8xf32>
    %cst_124 = arith.constant dense<0.000000e+00> : vector<1xf32>
    %581 = vector.multi_reduction <add>, %580, %cst_124 [1] : vector<1x8xf32> to vector<1xf32>
    %582 = vector.shape_cast %581 : vector<1xf32> to vector<1x1xf32>
    %583 = vector.extract_strided_slice %579 {offsets = [0, 8], sizes = [1, 8], strides = [1, 1]} : vector<1x24xf32> to vector<1x8xf32>
    %cst_125 = arith.constant dense<0.000000e+00> : vector<1xf32>
    %584 = vector.multi_reduction <add>, %583, %cst_125 [1] : vector<1x8xf32> to vector<1xf32>
    %585 = vector.shape_cast %584 : vector<1xf32> to vector<1x1xf32>
    %586 = vector.extract_strided_slice %579 {offsets = [0, 16], sizes = [1, 8], strides = [1, 1]} : vector<1x24xf32> to vector<1x8xf32>
    %cst_126 = arith.constant dense<0.000000e+00> : vector<1xf32>
    %587 = vector.multi_reduction <add>, %586, %cst_126 [1] : vector<1x8xf32> to vector<1xf32>
    %588 = vector.shape_cast %587 : vector<1xf32> to vector<1x1xf32>
    %589 = tpu.concatenate %582, %585, %588 in 1 : vector<1x1xf32>, vector<1x1xf32>, vector<1x1xf32> -> vector<1x3xf32>
    %590 = arith.mulf %512, %563 : vector<16x24xf32>
    %cst_127 = arith.constant dense<0.000000e+00> : vector<24xf32>
    %591 = vector.multi_reduction <add>, %590, %cst_127 [0] : vector<16x24xf32> to vector<24xf32>
    %592 = vector.shape_cast %591 : vector<24xf32> to vector<1x24xf32>
    %593 = vector.extract_strided_slice %592 {offsets = [0, 0], sizes = [1, 8], strides = [1, 1]} : vector<1x24xf32> to vector<1x8xf32>
    %cst_128 = arith.constant dense<0.000000e+00> : vector<1xf32>
    %594 = vector.multi_reduction <add>, %593, %cst_128 [1] : vector<1x8xf32> to vector<1xf32>
    %595 = vector.shape_cast %594 : vector<1xf32> to vector<1x1xf32>
    %596 = vector.extract_strided_slice %592 {offsets = [0, 8], sizes = [1, 8], strides = [1, 1]} : vector<1x24xf32> to vector<1x8xf32>
    %cst_129 = arith.constant dense<0.000000e+00> : vector<1xf32>
    %597 = vector.multi_reduction <add>, %596, %cst_129 [1] : vector<1x8xf32> to vector<1xf32>
    %598 = vector.shape_cast %597 : vector<1xf32> to vector<1x1xf32>
    %599 = vector.extract_strided_slice %592 {offsets = [0, 16], sizes = [1, 8], strides = [1, 1]} : vector<1x24xf32> to vector<1x8xf32>
    %cst_130 = arith.constant dense<0.000000e+00> : vector<1xf32>
    %600 = vector.multi_reduction <add>, %599, %cst_130 [1] : vector<1x8xf32> to vector<1xf32>
    %601 = vector.shape_cast %600 : vector<1xf32> to vector<1x1xf32>
    %602 = tpu.concatenate %595, %598, %601 in 1 : vector<1x1xf32>, vector<1x1xf32>, vector<1x1xf32> -> vector<1x3xf32>
    %603 = arith.mulf %513, %563 : vector<16x24xf32>
    %cst_131 = arith.constant dense<0.000000e+00> : vector<24xf32>
    %604 = vector.multi_reduction <add>, %603, %cst_131 [0] : vector<16x24xf32> to vector<24xf32>
    %605 = vector.shape_cast %604 : vector<24xf32> to vector<1x24xf32>
    %606 = vector.extract_strided_slice %605 {offsets = [0, 0], sizes = [1, 8], strides = [1, 1]} : vector<1x24xf32> to vector<1x8xf32>
    %cst_132 = arith.constant dense<0.000000e+00> : vector<1xf32>
    %607 = vector.multi_reduction <add>, %606, %cst_132 [1] : vector<1x8xf32> to vector<1xf32>
    %608 = vector.shape_cast %607 : vector<1xf32> to vector<1x1xf32>
    %609 = vector.extract_strided_slice %605 {offsets = [0, 8], sizes = [1, 8], strides = [1, 1]} : vector<1x24xf32> to vector<1x8xf32>
    %cst_133 = arith.constant dense<0.000000e+00> : vector<1xf32>
    %610 = vector.multi_reduction <add>, %609, %cst_133 [1] : vector<1x8xf32> to vector<1xf32>
    %611 = vector.shape_cast %610 : vector<1xf32> to vector<1x1xf32>
    %612 = vector.extract_strided_slice %605 {offsets = [0, 16], sizes = [1, 8], strides = [1, 1]} : vector<1x24xf32> to vector<1x8xf32>
    %cst_134 = arith.constant dense<0.000000e+00> : vector<1xf32>
    %613 = vector.multi_reduction <add>, %612, %cst_134 [1] : vector<1x8xf32> to vector<1xf32>
    %614 = vector.shape_cast %613 : vector<1xf32> to vector<1x1xf32>
    %615 = tpu.concatenate %608, %611, %614 in 1 : vector<1x1xf32>, vector<1x1xf32>, vector<1x1xf32> -> vector<1x3xf32>
    %616 = tpu.concatenate %576, %589, %602, %615 in 0 : vector<1x3xf32>, vector<1x3xf32>, vector<1x3xf32>, vector<1x3xf32> -> vector<4x3xf32>
    %cst_135 = arith.constant 1.600000e+01 : f32
    %617 = vector.broadcast %cst_135 : f32 to vector<4x3xf32>
    %618 = arith.divf %616, %617 : vector<4x3xf32>
    %619 = arith.addf %514, %618 : vector<4x3xf32>
    %cst_136 = arith.constant dense<0xFF800000> : vector<4xf32>
    %620 = vector.multi_reduction <maximumf>, %619, %cst_136 [1] : vector<4x3xf32> to vector<4xf32>
    %621 = vector.shape_cast %620 : vector<4xf32> to vector<4x1xf32>
    %622 = vector.broadcast %621 : vector<4x1xf32> to vector<4x3xf32>
    %623 = arith.subf %619, %622 : vector<4x3xf32>
    %624 = math.exp %623 : vector<4x3xf32>
    %cst_137 = arith.constant dense<0.000000e+00> : vector<4xf32>
    %625 = vector.multi_reduction <add>, %624, %cst_137 [1] : vector<4x3xf32> to vector<4xf32>
    %626 = vector.shape_cast %625 : vector<4xf32> to vector<4x1xf32>
    %627 = vector.broadcast %626 : vector<4x1xf32> to vector<4x3xf32>
    %628 = arith.divf %624, %627 : vector<4x3xf32>
    %629 = vector.extract_strided_slice %628 {offsets = [0, 0], sizes = [4, 1], strides = [1, 1]} : vector<4x3xf32> to vector<4x1xf32>
    %630 = vector.shape_cast %629 : vector<4x1xf32> to vector<4x1xf32>
    %631 = vector.broadcast %630 : vector<4x1xf32> to vector<4x8xf32>
    %632 = vector.extract_strided_slice %628 {offsets = [0, 1], sizes = [4, 1], strides = [1, 1]} : vector<4x3xf32> to vector<4x1xf32>
    %633 = vector.shape_cast %632 : vector<4x1xf32> to vector<4x1xf32>
    %634 = vector.broadcast %633 : vector<4x1xf32> to vector<4x8xf32>
    %635 = vector.extract_strided_slice %628 {offsets = [0, 2], sizes = [4, 1], strides = [1, 1]} : vector<4x3xf32> to vector<4x1xf32>
    %636 = vector.shape_cast %635 : vector<4x1xf32> to vector<4x1xf32>
    %637 = vector.broadcast %636 : vector<4x1xf32> to vector<4x8xf32>
    %638 = tpu.concatenate %631, %634, %637 in 1 : vector<4x8xf32>, vector<4x8xf32>, vector<4x8xf32> -> vector<4x24xf32>
    %639 = vector.extract_strided_slice %638 {offsets = [0, 0], sizes = [1, 24], strides = [1, 1]} : vector<4x24xf32> to vector<1x24xf32>
    %640 = vector.broadcast %639 : vector<1x24xf32> to vector<16x24xf32>
    %641 = arith.mulf %510, %640 : vector<16x24xf32>
    %642 = vector.extract_strided_slice %638 {offsets = [1, 0], sizes = [1, 24], strides = [1, 1]} : vector<4x24xf32> to vector<1x24xf32>
    %643 = vector.broadcast %642 : vector<1x24xf32> to vector<16x24xf32>
    %644 = arith.mulf %511, %643 : vector<16x24xf32>
    %645 = arith.addf %641, %644 : vector<16x24xf32>
    %646 = vector.extract_strided_slice %638 {offsets = [2, 0], sizes = [1, 24], strides = [1, 1]} : vector<4x24xf32> to vector<1x24xf32>
    %647 = vector.broadcast %646 : vector<1x24xf32> to vector<16x24xf32>
    %648 = arith.mulf %512, %647 : vector<16x24xf32>
    %649 = arith.addf %645, %648 : vector<16x24xf32>
    %650 = vector.extract_strided_slice %638 {offsets = [3, 0], sizes = [1, 24], strides = [1, 1]} : vector<4x24xf32> to vector<1x24xf32>
    %651 = vector.broadcast %650 : vector<1x24xf32> to vector<16x24xf32>
    %652 = arith.mulf %513, %651 : vector<16x24xf32>
    %653 = arith.addf %649, %652 : vector<16x24xf32>
    %654 = arith.mulf %653, %653 : vector<16x24xf32>
    %655 = vector.extract_strided_slice %654 {offsets = [0, 0], sizes = [16, 8], strides = [1, 1]} : vector<16x24xf32> to vector<16x8xf32>
    %656 = vector.extract_strided_slice %654 {offsets = [0, 8], sizes = [16, 8], strides = [1, 1]} : vector<16x24xf32> to vector<16x8xf32>
    %657 = arith.addf %655, %656 : vector<16x8xf32>
    %658 = vector.extract_strided_slice %654 {offsets = [0, 16], sizes = [16, 8], strides = [1, 1]} : vector<16x24xf32> to vector<16x8xf32>
    %659 = arith.addf %657, %658 : vector<16x8xf32>
    %660 = tpu.concatenate %659, %659, %659 in 1 : vector<16x8xf32>, vector<16x8xf32>, vector<16x8xf32> -> vector<16x24xf32>
    %cst_138 = arith.constant 1.000000e+00 : f32
    %661 = vector.broadcast %cst_138 : f32 to vector<16x24xf32>
    %662 = arith.addf %661, %660 : vector<16x24xf32>
    %663 = arith.divf %660, %662 : vector<16x24xf32>
    %664 = arith.mulf %663, %653 : vector<16x24xf32>
    %cst_139 = arith.constant 9.99999971E-10 : f32
    %665 = vector.broadcast %cst_139 : f32 to vector<16x24xf32>
    %666 = arith.addf %660, %665 : vector<16x24xf32>
    %667 = math.rsqrt %666 : vector<16x24xf32>
    %668 = arith.mulf %664, %667 : vector<16x24xf32>
    %669 = arith.mulf %510, %668 : vector<16x24xf32>
    %cst_140 = arith.constant dense<0.000000e+00> : vector<24xf32>
    %670 = vector.multi_reduction <add>, %669, %cst_140 [0] : vector<16x24xf32> to vector<24xf32>
    %671 = vector.shape_cast %670 : vector<24xf32> to vector<1x24xf32>
    %672 = vector.extract_strided_slice %671 {offsets = [0, 0], sizes = [1, 8], strides = [1, 1]} : vector<1x24xf32> to vector<1x8xf32>
    %cst_141 = arith.constant dense<0.000000e+00> : vector<1xf32>
    %673 = vector.multi_reduction <add>, %672, %cst_141 [1] : vector<1x8xf32> to vector<1xf32>
    %674 = vector.shape_cast %673 : vector<1xf32> to vector<1x1xf32>
    %675 = vector.extract_strided_slice %671 {offsets = [0, 8], sizes = [1, 8], strides = [1, 1]} : vector<1x24xf32> to vector<1x8xf32>
    %cst_142 = arith.constant dense<0.000000e+00> : vector<1xf32>
    %676 = vector.multi_reduction <add>, %675, %cst_142 [1] : vector<1x8xf32> to vector<1xf32>
    %677 = vector.shape_cast %676 : vector<1xf32> to vector<1x1xf32>
    %678 = vector.extract_strided_slice %671 {offsets = [0, 16], sizes = [1, 8], strides = [1, 1]} : vector<1x24xf32> to vector<1x8xf32>
    %cst_143 = arith.constant dense<0.000000e+00> : vector<1xf32>
    %679 = vector.multi_reduction <add>, %678, %cst_143 [1] : vector<1x8xf32> to vector<1xf32>
    %680 = vector.shape_cast %679 : vector<1xf32> to vector<1x1xf32>
    %681 = tpu.concatenate %674, %677, %680 in 1 : vector<1x1xf32>, vector<1x1xf32>, vector<1x1xf32> -> vector<1x3xf32>
    %682 = arith.mulf %511, %668 : vector<16x24xf32>
    %cst_144 = arith.constant dense<0.000000e+00> : vector<24xf32>
    %683 = vector.multi_reduction <add>, %682, %cst_144 [0] : vector<16x24xf32> to vector<24xf32>
    %684 = vector.shape_cast %683 : vector<24xf32> to vector<1x24xf32>
    %685 = vector.extract_strided_slice %684 {offsets = [0, 0], sizes = [1, 8], strides = [1, 1]} : vector<1x24xf32> to vector<1x8xf32>
    %cst_145 = arith.constant dense<0.000000e+00> : vector<1xf32>
    %686 = vector.multi_reduction <add>, %685, %cst_145 [1] : vector<1x8xf32> to vector<1xf32>
    %687 = vector.shape_cast %686 : vector<1xf32> to vector<1x1xf32>
    %688 = vector.extract_strided_slice %684 {offsets = [0, 8], sizes = [1, 8], strides = [1, 1]} : vector<1x24xf32> to vector<1x8xf32>
    %cst_146 = arith.constant dense<0.000000e+00> : vector<1xf32>
    %689 = vector.multi_reduction <add>, %688, %cst_146 [1] : vector<1x8xf32> to vector<1xf32>
    %690 = vector.shape_cast %689 : vector<1xf32> to vector<1x1xf32>
    %691 = vector.extract_strided_slice %684 {offsets = [0, 16], sizes = [1, 8], strides = [1, 1]} : vector<1x24xf32> to vector<1x8xf32>
    %cst_147 = arith.constant dense<0.000000e+00> : vector<1xf32>
    %692 = vector.multi_reduction <add>, %691, %cst_147 [1] : vector<1x8xf32> to vector<1xf32>
    %693 = vector.shape_cast %692 : vector<1xf32> to vector<1x1xf32>
    %694 = tpu.concatenate %687, %690, %693 in 1 : vector<1x1xf32>, vector<1x1xf32>, vector<1x1xf32> -> vector<1x3xf32>
    %695 = arith.mulf %512, %668 : vector<16x24xf32>
    %cst_148 = arith.constant dense<0.000000e+00> : vector<24xf32>
    %696 = vector.multi_reduction <add>, %695, %cst_148 [0] : vector<16x24xf32> to vector<24xf32>
    %697 = vector.shape_cast %696 : vector<24xf32> to vector<1x24xf32>
    %698 = vector.extract_strided_slice %697 {offsets = [0, 0], sizes = [1, 8], strides = [1, 1]} : vector<1x24xf32> to vector<1x8xf32>
    %cst_149 = arith.constant dense<0.000000e+00> : vector<1xf32>
    %699 = vector.multi_reduction <add>, %698, %cst_149 [1] : vector<1x8xf32> to vector<1xf32>
    %700 = vector.shape_cast %699 : vector<1xf32> to vector<1x1xf32>
    %701 = vector.extract_strided_slice %697 {offsets = [0, 8], sizes = [1, 8], strides = [1, 1]} : vector<1x24xf32> to vector<1x8xf32>
    %cst_150 = arith.constant dense<0.000000e+00> : vector<1xf32>
    %702 = vector.multi_reduction <add>, %701, %cst_150 [1] : vector<1x8xf32> to vector<1xf32>
    %703 = vector.shape_cast %702 : vector<1xf32> to vector<1x1xf32>
    %704 = vector.extract_strided_slice %697 {offsets = [0, 16], sizes = [1, 8], strides = [1, 1]} : vector<1x24xf32> to vector<1x8xf32>
    %cst_151 = arith.constant dense<0.000000e+00> : vector<1xf32>
    %705 = vector.multi_reduction <add>, %704, %cst_151 [1] : vector<1x8xf32> to vector<1xf32>
    %706 = vector.shape_cast %705 : vector<1xf32> to vector<1x1xf32>
    %707 = tpu.concatenate %700, %703, %706 in 1 : vector<1x1xf32>, vector<1x1xf32>, vector<1x1xf32> -> vector<1x3xf32>
    %708 = arith.mulf %513, %668 : vector<16x24xf32>
    %cst_152 = arith.constant dense<0.000000e+00> : vector<24xf32>
    %709 = vector.multi_reduction <add>, %708, %cst_152 [0] : vector<16x24xf32> to vector<24xf32>
    %710 = vector.shape_cast %709 : vector<24xf32> to vector<1x24xf32>
    %711 = vector.extract_strided_slice %710 {offsets = [0, 0], sizes = [1, 8], strides = [1, 1]} : vector<1x24xf32> to vector<1x8xf32>
    %cst_153 = arith.constant dense<0.000000e+00> : vector<1xf32>
    %712 = vector.multi_reduction <add>, %711, %cst_153 [1] : vector<1x8xf32> to vector<1xf32>
    %713 = vector.shape_cast %712 : vector<1xf32> to vector<1x1xf32>
    %714 = vector.extract_strided_slice %710 {offsets = [0, 8], sizes = [1, 8], strides = [1, 1]} : vector<1x24xf32> to vector<1x8xf32>
    %cst_154 = arith.constant dense<0.000000e+00> : vector<1xf32>
    %715 = vector.multi_reduction <add>, %714, %cst_154 [1] : vector<1x8xf32> to vector<1xf32>
    %716 = vector.shape_cast %715 : vector<1xf32> to vector<1x1xf32>
    %717 = vector.extract_strided_slice %710 {offsets = [0, 16], sizes = [1, 8], strides = [1, 1]} : vector<1x24xf32> to vector<1x8xf32>
    %cst_155 = arith.constant dense<0.000000e+00> : vector<1xf32>
    %718 = vector.multi_reduction <add>, %717, %cst_155 [1] : vector<1x8xf32> to vector<1xf32>
    %719 = vector.shape_cast %718 : vector<1xf32> to vector<1x1xf32>
    %720 = tpu.concatenate %713, %716, %719 in 1 : vector<1x1xf32>, vector<1x1xf32>, vector<1x1xf32> -> vector<1x3xf32>
    %721 = tpu.concatenate %681, %694, %707, %720 in 0 : vector<1x3xf32>, vector<1x3xf32>, vector<1x3xf32>, vector<1x3xf32> -> vector<4x3xf32>
    %cst_156 = arith.constant 1.600000e+01 : f32
    %722 = vector.broadcast %cst_156 : f32 to vector<4x3xf32>
    %723 = arith.divf %721, %722 : vector<4x3xf32>
    %724 = arith.addf %619, %723 : vector<4x3xf32>
    %cst_157 = arith.constant dense<0xFF800000> : vector<4xf32>
    %725 = vector.multi_reduction <maximumf>, %724, %cst_157 [1] : vector<4x3xf32> to vector<4xf32>
    %726 = vector.shape_cast %725 : vector<4xf32> to vector<4x1xf32>
    %727 = vector.broadcast %726 : vector<4x1xf32> to vector<4x3xf32>
    %728 = arith.subf %724, %727 : vector<4x3xf32>
    %729 = math.exp %728 : vector<4x3xf32>
    %cst_158 = arith.constant dense<0.000000e+00> : vector<4xf32>
    %730 = vector.multi_reduction <add>, %729, %cst_158 [1] : vector<4x3xf32> to vector<4xf32>
    %731 = vector.shape_cast %730 : vector<4xf32> to vector<4x1xf32>
    %732 = vector.broadcast %731 : vector<4x1xf32> to vector<4x3xf32>
    %733 = arith.divf %729, %732 : vector<4x3xf32>
    %734 = vector.extract_strided_slice %733 {offsets = [0, 0], sizes = [4, 1], strides = [1, 1]} : vector<4x3xf32> to vector<4x1xf32>
    %735 = vector.shape_cast %734 : vector<4x1xf32> to vector<4x1xf32>
    %736 = vector.broadcast %735 : vector<4x1xf32> to vector<4x8xf32>
    %737 = vector.extract_strided_slice %733 {offsets = [0, 1], sizes = [4, 1], strides = [1, 1]} : vector<4x3xf32> to vector<4x1xf32>
    %738 = vector.shape_cast %737 : vector<4x1xf32> to vector<4x1xf32>
    %739 = vector.broadcast %738 : vector<4x1xf32> to vector<4x8xf32>
    %740 = vector.extract_strided_slice %733 {offsets = [0, 2], sizes = [4, 1], strides = [1, 1]} : vector<4x3xf32> to vector<4x1xf32>
    %741 = vector.shape_cast %740 : vector<4x1xf32> to vector<4x1xf32>
    %742 = vector.broadcast %741 : vector<4x1xf32> to vector<4x8xf32>
    %743 = tpu.concatenate %736, %739, %742 in 1 : vector<4x8xf32>, vector<4x8xf32>, vector<4x8xf32> -> vector<4x24xf32>
    %744 = vector.extract_strided_slice %743 {offsets = [0, 0], sizes = [1, 24], strides = [1, 1]} : vector<4x24xf32> to vector<1x24xf32>
    %745 = vector.broadcast %744 : vector<1x24xf32> to vector<16x24xf32>
    %746 = arith.mulf %510, %745 : vector<16x24xf32>
    %747 = vector.extract_strided_slice %743 {offsets = [1, 0], sizes = [1, 24], strides = [1, 1]} : vector<4x24xf32> to vector<1x24xf32>
    %748 = vector.broadcast %747 : vector<1x24xf32> to vector<16x24xf32>
    %749 = arith.mulf %511, %748 : vector<16x24xf32>
    %750 = arith.addf %746, %749 : vector<16x24xf32>
    %751 = vector.extract_strided_slice %743 {offsets = [2, 0], sizes = [1, 24], strides = [1, 1]} : vector<4x24xf32> to vector<1x24xf32>
    %752 = vector.broadcast %751 : vector<1x24xf32> to vector<16x24xf32>
    %753 = arith.mulf %512, %752 : vector<16x24xf32>
    %754 = arith.addf %750, %753 : vector<16x24xf32>
    %755 = vector.extract_strided_slice %743 {offsets = [3, 0], sizes = [1, 24], strides = [1, 1]} : vector<4x24xf32> to vector<1x24xf32>
    %756 = vector.broadcast %755 : vector<1x24xf32> to vector<16x24xf32>
    %757 = arith.mulf %513, %756 : vector<16x24xf32>
    %758 = arith.addf %754, %757 : vector<16x24xf32>
    %759 = arith.mulf %758, %758 : vector<16x24xf32>
    %760 = vector.extract_strided_slice %759 {offsets = [0, 0], sizes = [16, 8], strides = [1, 1]} : vector<16x24xf32> to vector<16x8xf32>
    %761 = vector.extract_strided_slice %759 {offsets = [0, 8], sizes = [16, 8], strides = [1, 1]} : vector<16x24xf32> to vector<16x8xf32>
    %762 = arith.addf %760, %761 : vector<16x8xf32>
    %763 = vector.extract_strided_slice %759 {offsets = [0, 16], sizes = [16, 8], strides = [1, 1]} : vector<16x24xf32> to vector<16x8xf32>
    %764 = arith.addf %762, %763 : vector<16x8xf32>
    %765 = tpu.concatenate %764, %764, %764 in 1 : vector<16x8xf32>, vector<16x8xf32>, vector<16x8xf32> -> vector<16x24xf32>
    %cst_159 = arith.constant 1.000000e+00 : f32
    %766 = vector.broadcast %cst_159 : f32 to vector<16x24xf32>
    %767 = arith.addf %766, %765 : vector<16x24xf32>
    %768 = arith.divf %765, %767 : vector<16x24xf32>
    %769 = arith.mulf %768, %758 : vector<16x24xf32>
    %cst_160 = arith.constant 9.99999971E-10 : f32
    %770 = vector.broadcast %cst_160 : f32 to vector<16x24xf32>
    %771 = arith.addf %765, %770 : vector<16x24xf32>
    %772 = math.rsqrt %771 : vector<16x24xf32>
    %773 = arith.mulf %769, %772 : vector<16x24xf32>
    %cst_161 = arith.constant dense<0.000000e+00> : vector<24xf32>
    %774 = vector.multi_reduction <add>, %773, %cst_161 [0] : vector<16x24xf32> to vector<24xf32>
    %775 = vector.shape_cast %774 : vector<24xf32> to vector<1x24xf32>
    %cst_162 = arith.constant 1.600000e+01 : f32
    %776 = vector.broadcast %cst_162 : f32 to vector<1x24xf32>
    %777 = arith.divf %775, %776 : vector<1x24xf32>
    %c0_163 = arith.constant 0 : index
    %c0_164 = arith.constant 0 : index
    %778 = vector.load %arg14[%c0_163, %c0_164] : memref<1x24xf32, #tpu.memory_space<vmem>>, vector<1x24xf32>
    tpu.vector_store %arg14[%c0_163, %c0_164], %777 {strides = array<i32>} : memref<1x24xf32, #tpu.memory_space<vmem>>, vector<1x24xf32>,
    %779 = arith.mulf %777, %777 : vector<1x24xf32>
    %780 = vector.extract_strided_slice %779 {offsets = [0, 0], sizes = [1, 8], strides = [1, 1]} : vector<1x24xf32> to vector<1x8xf32>
    %cst_165 = arith.constant dense<0.000000e+00> : vector<1xf32>
    %781 = vector.multi_reduction <add>, %780, %cst_165 [1] : vector<1x8xf32> to vector<1xf32>
    %782 = vector.shape_cast %781 : vector<1xf32> to vector<1x1xf32>
    %783 = vector.extract_strided_slice %779 {offsets = [0, 8], sizes = [1, 8], strides = [1, 1]} : vector<1x24xf32> to vector<1x8xf32>
    %cst_166 = arith.constant dense<0.000000e+00> : vector<1xf32>
    %784 = vector.multi_reduction <add>, %783, %cst_166 [1] : vector<1x8xf32> to vector<1xf32>
    %785 = vector.shape_cast %784 : vector<1xf32> to vector<1x1xf32>
    %786 = vector.extract_strided_slice %779 {offsets = [0, 16], sizes = [1, 8], strides = [1, 1]} : vector<1x24xf32> to vector<1x8xf32>
    %cst_167 = arith.constant dense<0.000000e+00> : vector<1xf32>
    %787 = vector.multi_reduction <add>, %786, %cst_167 [1] : vector<1x8xf32> to vector<1xf32>
    %788 = vector.shape_cast %787 : vector<1xf32> to vector<1x1xf32>
    %789 = arith.maximumf %782, %785 : vector<1x1xf32>
    %790 = arith.maximumf %789, %788 : vector<1x1xf32>
    %cst_168 = arith.constant 0.000000e+00 : f32
    %791 = vector.broadcast %cst_168 : f32 to vector<1x1xf32>
    %792 = arith.cmpf oge, %782, %790 : vector<1x1xf32>
    %793 = arith.extui %792 : vector<1x1xi1> to vector<1x1xi32>
    %794 = arith.sitofp %793 : vector<1x1xi32> to vector<1x1xf32>
    %cst_169 = arith.constant 1.000000e+00 : f32
    %795 = vector.broadcast %cst_169 : f32 to vector<1x1xf32>
    %796 = arith.subf %795, %791 : vector<1x1xf32>
    %cst_170 = arith.constant 0.000000e+00 : f32
    %797 = vector.broadcast %cst_170 : f32 to vector<1x1xf32>
    %798 = arith.maximumf %796, %797 : vector<1x1xf32>
    %799 = arith.mulf %794, %798 : vector<1x1xf32>
    %800 = vector.extract_strided_slice %777 {offsets = [0, 0], sizes = [1, 8], strides = [1, 1]} : vector<1x24xf32> to vector<1x8xf32>
    %801 = vector.broadcast %799 : vector<1x1xf32> to vector<1x8xf32>
    %802 = arith.mulf %800, %801 : vector<1x8xf32>
    %803 = arith.addf %791, %794 : vector<1x1xf32>
    %804 = arith.cmpf oge, %785, %790 : vector<1x1xf32>
    %805 = arith.extui %804 : vector<1x1xi1> to vector<1x1xi32>
    %806 = arith.sitofp %805 : vector<1x1xi32> to vector<1x1xf32>
    %cst_171 = arith.constant 1.000000e+00 : f32
    %807 = vector.broadcast %cst_171 : f32 to vector<1x1xf32>
    %808 = arith.subf %807, %803 : vector<1x1xf32>
    %cst_172 = arith.constant 0.000000e+00 : f32
    %809 = vector.broadcast %cst_172 : f32 to vector<1x1xf32>
    %810 = arith.maximumf %808, %809 : vector<1x1xf32>
    %811 = arith.mulf %806, %810 : vector<1x1xf32>
    %812 = vector.extract_strided_slice %777 {offsets = [0, 8], sizes = [1, 8], strides = [1, 1]} : vector<1x24xf32> to vector<1x8xf32>
    %813 = vector.broadcast %811 : vector<1x1xf32> to vector<1x8xf32>
    %814 = arith.mulf %812, %813 : vector<1x8xf32>
    %815 = arith.addf %803, %806 : vector<1x1xf32>
    %816 = arith.cmpf oge, %788, %790 : vector<1x1xf32>
    %817 = arith.extui %816 : vector<1x1xi1> to vector<1x1xi32>
    %818 = arith.sitofp %817 : vector<1x1xi32> to vector<1x1xf32>
    %cst_173 = arith.constant 1.000000e+00 : f32
    %819 = vector.broadcast %cst_173 : f32 to vector<1x1xf32>
    %820 = arith.subf %819, %815 : vector<1x1xf32>
    %cst_174 = arith.constant 0.000000e+00 : f32
    %821 = vector.broadcast %cst_174 : f32 to vector<1x1xf32>
    %822 = arith.maximumf %820, %821 : vector<1x1xf32>
    %823 = arith.mulf %818, %822 : vector<1x1xf32>
    %824 = vector.extract_strided_slice %777 {offsets = [0, 16], sizes = [1, 8], strides = [1, 1]} : vector<1x24xf32> to vector<1x8xf32>
    %825 = vector.broadcast %823 : vector<1x1xf32> to vector<1x8xf32>
    %826 = arith.mulf %824, %825 : vector<1x8xf32>
    %827 = tpu.concatenate %802, %814, %826 in 1 : vector<1x8xf32>, vector<1x8xf32>, vector<1x8xf32> -> vector<1x24xf32>
    %c0_175 = arith.constant 0 : index
    %c0_176 = arith.constant 0 : index
    %828 = vector.load %arg8[%c0_175, %c0_176] : memref<24x10xf32, #tpu.memory_space<vmem>>, vector<24x10xf32>
    %cst_177 = arith.constant dense<0.000000e+00> : vector<1x10xf32>
    %829 = tpu.matmul %827, %828, %cst_177 {dimension_numbers = #tpu.dot_dimension_numbers<[1], [0], [0], [1], [0, 0, 1, 1], [], []>} : vector<1x24xf32>, vector<24x10xf32>, vector<1x10xf32> -> vector<1x10xf32>
    %c0_178 = arith.constant 0 : index
    %c0_179 = arith.constant 0 : index
    %830 = vector.load %arg9[%c0_178, %c0_179] : memref<1x10xf32, #tpu.memory_space<vmem>>, vector<1x10xf32>
    %831 = arith.addf %829, %830 : vector<1x10xf32>
    %cst_180 = arith.constant 0.000000e+00 : f32
    %832 = vector.broadcast %cst_180 : f32 to vector<1x10xf32>
    %833 = arith.maximumf %831, %832 : vector<1x10xf32>
    %c0_181 = arith.constant 0 : index
    %c0_182 = arith.constant 0 : index
    %834 = vector.load %arg10[%c0_181, %c0_182] : memref<10x24xf32, #tpu.memory_space<vmem>>, vector<10x24xf32>
    %cst_183 = arith.constant dense<0.000000e+00> : vector<1x24xf32>
    %835 = tpu.matmul %833, %834, %cst_183 {dimension_numbers = #tpu.dot_dimension_numbers<[1], [0], [0], [1], [0, 0, 1, 1], [], []>} : vector<1x10xf32>, vector<10x24xf32>, vector<1x24xf32> -> vector<1x24xf32>
    %c0_184 = arith.constant 0 : index
    %c0_185 = arith.constant 0 : index
    %836 = vector.load %arg11[%c0_184, %c0_185] : memref<1x24xf32, #tpu.memory_space<vmem>>, vector<1x24xf32>
    %837 = arith.addf %835, %836 : vector<1x24xf32>
    %cst_186 = arith.constant 0.000000e+00 : f32
    %838 = vector.broadcast %cst_186 : f32 to vector<1x24xf32>
    %839 = arith.maximumf %837, %838 : vector<1x24xf32>
    %c0_187 = arith.constant 0 : index
    %c0_188 = arith.constant 0 : index
    %840 = vector.load %arg12[%c0_187, %c0_188] : memref<24x16xf32, #tpu.memory_space<vmem>>, vector<24x16xf32>
    %cst_189 = arith.constant dense<0.000000e+00> : vector<1x16xf32>
    %841 = tpu.matmul %839, %840, %cst_189 {dimension_numbers = #tpu.dot_dimension_numbers<[1], [0], [0], [1], [0, 0, 1, 1], [], []>} : vector<1x24xf32>, vector<24x16xf32>, vector<1x16xf32> -> vector<1x16xf32>
    %c0_190 = arith.constant 0 : index
    %c0_191 = arith.constant 0 : index
    %842 = vector.load %arg13[%c0_190, %c0_191] : memref<1x16xf32, #tpu.memory_space<vmem>>, vector<1x16xf32>
    %843 = arith.addf %841, %842 : vector<1x16xf32>
    %cst_192 = arith.constant dense<0xFF800000> : vector<1xf32>
    %844 = vector.multi_reduction <maximumf>, %843, %cst_192 [1] : vector<1x16xf32> to vector<1xf32>
    %845 = vector.shape_cast %844 : vector<1xf32> to vector<1x1xf32>
    %846 = vector.broadcast %845 : vector<1x1xf32> to vector<1x16xf32>
    %847 = arith.subf %843, %846 : vector<1x16xf32>
    %848 = math.exp %847 : vector<1x16xf32>
    %cst_193 = arith.constant dense<0.000000e+00> : vector<1xf32>
    %849 = vector.multi_reduction <add>, %848, %cst_193 [1] : vector<1x16xf32> to vector<1xf32>
    %850 = vector.shape_cast %849 : vector<1xf32> to vector<1x1xf32>
    %851 = vector.broadcast %850 : vector<1x1xf32> to vector<1x16xf32>
    %852 = arith.divf %848, %851 : vector<1x16xf32>
    %c0_194 = arith.constant 0 : index
    %c0_195 = arith.constant 0 : index
    %853 = vector.load %arg1[%c0_194, %c0_195] : memref<16x16xf32, #tpu.memory_space<vmem>>, vector<16x16xf32>
    %854 = vector.broadcast %852 : vector<1x16xf32> to vector<16x16xf32>
    %855 = arith.subf %853, %854 : vector<16x16xf32>
    %856 = arith.mulf %855, %855 : vector<16x16xf32>
    %857 = vector.shape_cast %856 : vector<16x16xf32> to vector<1x16x16xf32>
    %cst_196 = arith.constant dense<0.000000e+00> : vector<1xf32>
    %858 = vector.multi_reduction <add>, %857, %cst_196 [1, 2] : vector<1x16x16xf32> to vector<1xf32>
    %859 = vector.shape_cast %858 : vector<1xf32> to vector<1x1x1xf32>
    %860 = vector.extract %859[0, 0, 0] : f32 from vector<1x1x1xf32>
    %c0_197 = arith.constant 0 : index
    %c0_198 = arith.constant 0 : index
    %861 = memref.load %arg15[%c0_197, %c0_198] : memref<1x1xf32, #tpu.memory_space<smem>>
    memref.store %860, %arg15[%c0_197, %c0_198] : memref<1x1xf32, #tpu.memory_space<smem>>
    return
  }
}

</mosaic_0001>

<bundles_post_ra>
// kernel: mul.31
= control target key start
LH: loop header
LB: loop body
LE: loop exit
PB: predicated region body
PF: predicated region fallthrough
CT: control target
= control target key end

     0   :  { %vm82_vm0 = vcmask 1047556   ;;  %vm84_vm1 = vcmask 64512   ;;  %s195_s9 = smov 24   ;;  %s196_s14 = smov 8   ;;  %vm103_vm2 = vcmask 261312   ;;  %vm124_vm3 = vcmask 195712   ;;  %s289_s0 = inlined_call_operand.vmem [shape: f32[2,8,4,8], index: 0, kind: input, shape index: {}]   ;;  %s290_s1 = inlined_call_operand.vmem [shape: f32[2,8,32], index: 1, kind: output, shape index: {}]  }
   0x1   :  { %v180_v0 = vld [vmem:[%s289_s0 + $0x1c] sm:$0xf]  ;;  %v181_v1 = vld [vmem:[%s289_s0 + $0x18] sm:$0xf]  ;;  %v182_v2 = vld [vmem:[%s289_s0 + $0x14] sm:$0xf] }
   0x2   :  { %48 = vst [vmem:[#allocation0 + $0x38] sm:$0xf] %v180_v0  ;;  %53 = vst [vmem:[#allocation0 + $0x30] sm:$0xf] %v181_v1  ;;  %v183_v3 = vld [vmem:[%s289_s0 + $0x10] sm:$0xf] }
   0x3   :  { %58 = vst [vmem:[#allocation0 + $0x28] sm:$0xf] %v182_v2  ;;  %v184_v4 = vld [vmem:[%s289_s0 + $0xc] sm:$0xf]  ;;  %v185_v5 = vld [vmem:[%s289_s0 + $0x8] sm:$0xf] }
   0x4   :  { %63 = vst [vmem:[#allocation0 + $0x20] sm:$0xf] %v183_v3  ;;  %68 = vst [vmem:[#allocation0 + $0x18] sm:$0xf] %v184_v4  ;;  %v186_v6 = vld [vmem:[%s289_s0 + $0x4] sm:$0xf] }
   0x5   :  { %73 = vst [vmem:[#allocation0 + $0x10] sm:$0xf] %v185_v5  ;;  %v78_v7 = vld [vmem:[%s289_s0] sm:$0xf]  ;;  %77 = vst [vmem:[#allocation0 + $0x8] sm:$0xf] %v186_v6 }
   0x6   :  { %79 = vst [vmem:[#allocation0] sm:$0xf] %v78_v7  ;;  %v172_v8 = vld [vmem:[%s289_s0 + $0x3c] sm:$0xf]  ;;  %v173_v9 = vld [vmem:[%s289_s0 + $0x38] sm:$0xf] }
   0x7   :  { %8 = vst [vmem:[#allocation0 + $0x78] sm:$0xf] %v172_v8  ;;  %13 = vst [vmem:[#allocation0 + $0x70] sm:$0xf] %v173_v9  ;;  %v174_v10 = vld [vmem:[%s289_s0 + $0x34] sm:$0xf] }
   0x8   :  { %v175_v11 = vld [vmem:[%s289_s0 + $0x30] sm:$0xf]  ;;  %v176_v12 = vld [vmem:[%s289_s0 + $0x2c] sm:$0xf]  ;;  %18 = vst [vmem:[#allocation0 + $0x68] sm:$0xf] %v174_v10 }
   0x9   :  { %23 = vst [vmem:[#allocation0 + $0x60] sm:$0xf] %v175_v11  ;;  %28 = vst [vmem:[#allocation0 + $0x58] sm:$0xf] %v176_v12  ;;  %v177_v13 = vld [vmem:[%s289_s0 + $0x28] sm:$0xf] }
   0xa   :  { %v178_v14 = vld [vmem:[%s289_s0 + $0x24] sm:$0xf]  ;;  %v179_v15 = vld [vmem:[%s289_s0 + $0x20] sm:$0xf]  ;;  %33 = vst [vmem:[#allocation0 + $0x50] sm:$0xf] %v177_v13 }
   0xb   :  { %38 = vst [vmem:[#allocation0 + $0x48] sm:$0xf] %v178_v14  ;;  %43 = vst [vmem:[#allocation0 + $0x40] sm:$0xf] %v179_v15  ;;  %s194_s0 = smov 16   ;;  %vm145_vm4 = vcmask 130112  }
   0xc   :  { %v119_v16 = vld [vmem:[#allocation0 + $0x2] ss:$8 sm:$0xf0]   ;;  %v98_v17 = vld [vmem:[#allocation0 + $0x3] ss:$8 sm:$0xf0]  }
   0xd   :  { %v117_v18 = vld [vmem:[#allocation0 + $0x2] ss:$8 sm:$0xf]   ;;  %v96_v19 = vld [vmem:[#allocation0 + $0x3] ss:$8 sm:$0xf]  }
   0xe   :  { %v121_v20 = vsel %vm82_vm0, %v119_v16, %v117_v18  ;;  %v100_v21 = vsel %vm82_vm0, %v98_v17, %v96_v19  ;;  %v138_v24 = vld [vmem:[#allocation0 + $0x1] ss:$8 sm:$0xf]   ;;  %v80_v32 = vld [vmem:[#allocation0] ss:$8 sm:$0xf]  }
   0xf   :  { %122 = vrot.lane.b32.xlu1 %v121_v20, %s194_s0  ;;  %101 = vrot.lane.b32.xlu0 %v100_v21, %s195_s9  ;;  %v140_v25 = vld [vmem:[#allocation0 + $0x1] ss:$8 sm:$0xf0]   ;;  %v81_v33 = vld [vmem:[#allocation0] ss:$8 sm:$0xf0]  }
  0x10   :  { %v129_v22 = vld [vmem:[#allocation0 + $0x42] ss:$8 sm:$0xf0]   ;;  %v108_v23 = vld [vmem:[#allocation0 + $0x43] ss:$8 sm:$0xf0]   ;;  %v83_v34 = vsel %vm82_vm0, %v81_v33, %v80_v32  ;;  %v142_v38 = vsel %vm82_vm0, %v140_v25, %v138_v24 }
  0x11   :  { %v150_v31 = vld [vmem:[#allocation0 + $0x41] ss:$8 sm:$0xf0]   ;;  %v89_v36 = vld [vmem:[#allocation0 + $0x40] ss:$8 sm:$0xf0]  }
  0x12   :  { %v127_v26 = vld [vmem:[#allocation0 + $0x42] ss:$8 sm:$0xf]   ;;  %v106_v27 = vld [vmem:[#allocation0 + $0x43] ss:$8 sm:$0xf]  }
  0x13   :  { %v131_v28 = vsel %vm82_vm0, %v129_v22, %v127_v26  ;;  %v110_v29 = vsel %vm82_vm0, %v108_v23, %v106_v27  ;;  %v148_v30 = vld [vmem:[#allocation0 + $0x41] ss:$8 sm:$0xf]   ;;  %v87_v35 = vld [vmem:[#allocation0 + $0x40] ss:$8 sm:$0xf]  }
  0x14   :  { %132 = vrot.lane.b32.xlu1 %v131_v28, %s194_s0  ;;  %111 = vrot.lane.b32.xlu0 %v110_v29, %s195_s9  ;;  %v152_v37 = vsel %vm82_vm0, %v150_v31, %v148_v30  ;;  %85 = vst.msk [vmem:[%s290_s1] sm:$0xff] %vm84_vm1, %v83_v34   ;;  %v91_v39 = vsel %vm82_vm0, %v89_v36, %v87_v35 }
  0x15   :  { %187 = vst.msk [vmem:[%s290_s1 + $0x8] sm:$0xff] %vm84_vm1, %v91_v39  }
  0x18   :  { %153 = vrot.lane.b32.xlu1 %v152_v37, %s196_s14  ;;  %143 = vrot.lane.b32.xlu0 %v142_v38, %s196_s14 }
  0x81   :  { %v123_v40 = vpop.permute.xlu1 %122   ;;  %v102_v41 = vpop.permute.xlu0 %101  }
  0x82   :  { %104 = vst.msk [vmem:[%s290_s1] sm:$0xff] %vm103_vm2, %v102_v41  }
  0x83   :  { %125 = vst.msk [vmem:[%s290_s1] sm:$0xff] %vm124_vm3, %v123_v40  }
  0x86   :  { %v133_v42 = vpop.permute.xlu1 %132   ;;  %v112_v43 = vpop.permute.xlu0 %111  }
  0x87   :  { %188 = vst.msk [vmem:[%s290_s1 + $0x8] sm:$0xff] %vm103_vm2, %v112_v43  }
  0x88   :  { %189 = vst.msk [vmem:[%s290_s1 + $0x8] sm:$0xff] %vm124_vm3, %v133_v42  }
  0x8a   :  { %v154_v44 = vpop.permute.xlu1 %153   ;;  %v144_v45 = vpop.permute.xlu0 %143  }
  0x8b   :  { %190 = vst.msk [vmem:[%s290_s1 + $0x8] sm:$0xff] %vm145_vm4, %v154_v44   ;;  %146 = vst.msk [vmem:[%s290_s1] sm:$0xff] %vm145_vm4, %v144_v45  }

// kernel: _lambda_.4
= control target key start
LH: loop header
LB: loop body
LE: loop exit
PB: predicated region body
PF: predicated region fallthrough
CT: control target
= control target key end

     0   :  { %vm32_vm0 = vcmask 261120   ;;  %v192_v3 = vmov 0   ;;  %vm115_vm1 = vcmask 130048   ;;  %s249_s0 = inlined_call_operand.vmem [shape: f32[32,16], index: 0, kind: input, shape index: {}]   ;;  %s250_s1 = inlined_call_operand.vmem [shape: f32[16,32], index: 1, kind: input, shape index: {}]   ;;  %s251_s2 = inlined_call_operand.vmem [shape: f32[16,1], index: 2, kind: input, shape index: {}]   ;;  %s252_s3 = inlined_call_operand.vmem [shape: f32[16,16], index: 3, kind: output, shape index: {}]  }
   0x1   :  { %v16_v0 = vld [vmem:[%s249_s0] sm:$0xff]  ;;  %v17_v1 = vld [vmem:[%s249_s0 + $0x8] sm:$0xff]  ;;  %v18_v2 = vld [vmem:[%s249_s0 + $0x10] sm:$0xff]  ;;  %183 = vset.pattern.permute.xlu0 %v192_v3 }
   0x2   :  { %v174_v4 = vpack.c.bf16 %v17_v1, %v16_v0  ;;  %v19_v5 = vld [vmem:[%s249_s0 + $0x18] sm:$0xff]  ;;  %v14_v6 = vld [vmem:[%s250_s1] sm:$0xff]  ;;  %v21_v9 = vld [vmem:[%s251_s2 + $0x8] sm:$0xff] }
   0x3   :  { %v178_v7 = vpack.c.bf16 %v19_v5, %v18_v2  ;;  %171 = vmatprep.mubr.msk.f32.mxu0 %vm32_vm0, %v14_v6  ;;  %v20_v8 = vld [vmem:[%s251_s2] sm:$0xff]  ;;  %v15_v10 = vld [vmem:[%s250_s1 + $0x8] sm:$0xff] }
   0x4   :  { %175 = vmatprep.subr.bf16.mxu0 %v174_v4  ;;  %24 = vperm.xlu0 %183, %v20_v8  }
   0x5   :  { %177 = vmatpush3.bf16.msra.mxu0 %v174_v4 }
   0x6   :  { %179 = vmatprep.subr.bf16.mxu0 %v178_v7 }
   0x8   :  { %29 = vperm.xlu0 %183, %v21_v9  }
   0x9   :  { %181 = vmatpush3.bf16.msra.mxu0 %v178_v7 }
   0xc   :  { %172 = vmatmul.mubr.msk.f32.vlgmr.msra.gmra.mrb[0].mxu0 %vm32_vm0, %v15_v10 }
  0x83   :  { %v25_v11 = vpop.permute.xlu0 %24 }
  0x87   :  { %v30_v12 = vpop.permute.xlu0 %29 }
  0xdf   :  { %v173_v13 = vpop.f32.mrb[0].mxu0 }
  0xe0   :  { %v105_v14 = vpop.f32.mrb[1].mxu0  ;;  %v111_v15 = vadd.f32 %v173_v13, %v30_v12 }
  0xe1   :  { %v106_v16 = vadd.f32 %v105_v14, %v25_v11 }
  0xe2   :  { %v133_v19 = vmul.f32 %v111_v15, %v111_v15 }
  0xe3   :  { %v114_v17 = vmul.f32 %v106_v16, %v106_v16 }
  0xe4   :  { %v134_v20 = vsel %vm115_vm1, %v133_v19, 0.0 }
  0xe5   :  { %v116_v18 = vsel %vm115_vm1, %v114_v17, 0.0 }
  0xe6   :  { %117 = vadd.xlane.f32.xlu1 %v116_v18 }
  0xea   :  { %135 = vadd.xlane.f32.xlu1 %v134_v20 }
 0x173   :  { %v118_v21 = vpop.xlane.xlu1 %117 }
 0x174   :  { %v119_v22 = vrot.slane %v118_v21, 4 }
 0x176   :  { %v120_v23 = vadd.f32 %v119_v22, %v118_v21 }
 0x177   :  { %v136_v24 = vpop.xlane.xlu1 %135 }
 0x178   :  { %v121_v25 = vrot.slane %v120_v23, 2  ;;  %v137_v26 = vrot.slane %v136_v24, 4 }
 0x17a   :  { %v122_v27 = vadd.f32 %v121_v25, %v120_v23  ;;  %v138_v28 = vadd.f32 %v137_v26, %v136_v24 }
 0x17c   :  { %v123_v29 = vrot.slane %v122_v27, 1  ;;  %v139_v30 = vrot.slane %v138_v28, 2 }
 0x17e   :  { %v124_v31 = vadd.f32 %v123_v29, %v122_v27  ;;  %v140_v32 = vadd.f32 %v139_v30, %v138_v28 }
 0x180   :  { %v125_v33 = vadd.f32 1.0, %v124_v31  ;;  %v128_v34 = vadd.f32 1e-09, %v124_v31  ;;  %v141_v35 = vrot.slane %v140_v32, 1 }
 0x182   :  { %184 = vrcp.f32 %v125_v33  ;;  %v142_v36 = vadd.f32 %v141_v35, %v140_v32 }
 0x183   :  { %186 = vrsqrt.f32 %v128_v34 }
 0x184   :  { %v143_v37 = vadd.f32 1.0, %v142_v36  ;;  %v146_v38 = vadd.f32 1e-09, %v142_v36 }
 0x186   :  { %188 = vrcp.f32 %v143_v37 }
 0x187   :  { %190 = vrsqrt.f32 %v146_v38 }
 0x18c   :  { %v185_v39 = vpop.eup %184 }
 0x18d   :  { %v127_v40 = vmul.f32 %v185_v39, %v124_v31  ;;  %v187_v41 = vpop.eup %186 }
 0x18f   :  { %v130_v42 = vmul.f32 %v187_v41, %v127_v40 }
 0x190   :  { %v189_v43 = vpop.eup %188 }
 0x191   :  { %v131_v44 = vmul.f32 %v130_v42, %v106_v16  ;;  %v145_v45 = vmul.f32 %v189_v43, %v142_v36  ;;  %v191_v46 = vpop.eup %190 }
 0x193   :  { %132 = vst.msk [vmem:[%s252_s3] sm:$0xff] %vm115_vm1, %v131_v44  ;;  %v148_v47 = vmul.f32 %v191_v46, %v145_v45 }
 0x195   :  { %v149_v48 = vmul.f32 %v148_v47, %v111_v15 }
 0x197   :  { %150 = vst.msk [vmem:[%s252_s3 + $0x8] sm:$0xff] %vm115_vm1, %v149_v48 }

// kernel: _lambda_.3
= control target key start
LH: loop header
LB: loop body
LE: loop exit
PB: predicated region body
PF: predicated region fallthrough
CT: control target
= control target key end

     0   :  { %vm29_vm0 = vcmask 130048   ;;  %s535_s2 = inlined_call_operand.vmem [shape: f32[16,16], index: 2, kind: input, shape index: {}]   ;;  %s536_s1 = inlined_call_operand.vmem [shape: f32[16,16], index: 1, kind: input, shape index: {}]   ;;  %s537_s0 = inlined_call_operand.vmem [shape: f32[16,16], index: 0, kind: input, shape index: {}]   ;;  %s538_s4 = inlined_call_operand.vmem [shape: f32[16,16], index: 4, kind: input, shape index: {}]   ;;  %s539_s3 = inlined_call_operand.vmem [shape: f32[1,16], index: 3, kind: input, shape index: {}]   ;;  %s540_s6 = inlined_call_operand.vmem [shape: f32[32,16], index: 6, kind: output, shape index: {}]   ;;  %s541_s5 = inlined_call_operand.vmem [shape: f32[1,16], index: 5, kind: input, shape index: {}]  }
   0x1   :  { %v27_v0 = vld [vmem:[%s535_s2] sm:$0xff]  ;;  %v28_v1 = vld [vmem:[%s535_s2 + $0x8] sm:$0xff] }
   0x2   :  { %v25_v2 = vld [vmem:[%s536_s1] sm:$0xff]  ;;  %v430_v3 = vpack.c.bf16 %v28_v1, %v27_v0  ;;  %v26_v4 = vld [vmem:[%s536_s1 + $0x8] sm:$0xff] }
   0x3   :  { %406 = vmatprep.mubr.msk.f32.mxu0 %vm29_vm0, %v25_v2  ;;  %v23_v5 = vld [vmem:[%s537_s0] sm:$0xff]  ;;  %v24_v9 = vld [vmem:[%s537_s0 + $0x8] sm:$0xff] }
   0x4   :  { %431 = vmatprep.subr.bf16.mxu0 %v430_v3  ;;  %413 = vmatprep.mubr.msk.f32.mxu1 %vm29_vm0, %v23_v5  ;;  %v203_v10 = vld [vmem:[%s538_s4] sm:$0xff]  ;;  %v204_v11 = vld [vmem:[%s538_s4 + $0x8] sm:$0xff] }
   0x5   :  { %433 = vmatpush3.bf16.msra.mxu0 %v430_v3  ;;  %v438_v12 = vpack.c.bf16 %v204_v11, %v203_v10  ;;  %v378_v13 = vld [vmem:[%s539_s3] ss:$0 sm:$0xff] }
   0x6   :  { %v383_v23 = vld [vmem:[%s541_s5] ss:$0 sm:$0xff] }
   0x7   :  { %439 = vmatprep.subr.bf16.mxu0 %v438_v12 }
   0x8   :  { %407 = vmatmul.mubr.msk.f32.vlgmr.msra.gmra.mrb[0].mxu0 %vm29_vm0, %v26_v4 }
   0x9   :  { %441 = vmatpush3.bf16.msra.mxu0 %v438_v12 }
  0xdb   :  { %v408_v6 = vpop.f32.mrb[0].mxu0 }
  0xdc   :  { %v102_v7 = vpop.f32.mrb[1].mxu0 }
  0xdd   :  { %v434_v8 = vpack.c.bf16 %v408_v6, %v102_v7 }
  0xdf   :  { %435 = vmatprep.subr.bf16.mxu1 %v434_v8 }
  0xe0   :  { %437 = vmatpush3.bf16.msra.mxu1 %v434_v8 }
  0xe3   :  { %414 = vmatmul.mubr.msk.f32.vlgmr.msra.gmra.mrb[0].mxu1 %vm29_vm0, %v24_v9 }
  0xe4   :  { %427 = vmatprep.mubr.msk.f32.mxu1 %vm29_vm0, %v23_v5 }
 0x1b6   :  { %v415_v14 = vpop.f32.mrb[0].mxu1 }
 0x1b7   :  { %v196_v15 = vadd.f32 %v415_v14, %v378_v13  ;;  %v190_v16 = vpop.f32.mrb[1].mxu1 }
 0x1b8   :  { %v191_v17 = vadd.f32 %v378_v13, %v190_v16 }
 0x1b9   :  { %v200_v18 = vmax.f32 %v196_v15, 0.0 }
 0x1ba   :  { %v199_v19 = vmax.f32 %v191_v17, 0.0 }
 0x1bb   :  { %202 = vst.msk [vmem:[%s540_s6 + $0x8] sm:$0xff] %vm29_vm0, %v200_v18 }
 0x1bc   :  { %201 = vst.msk [vmem:[%s540_s6] sm:$0xff] %vm29_vm0, %v199_v19  ;;  %420 = vmatprep.mubr.msk.f32.mxu0 %vm29_vm0, %v199_v19 }
 0x1bd   :  { %421 = vmatmul.mubr.msk.f32.vlgmr.msra.gmra.mrb[2].mxu0 %vm29_vm0, %v200_v18 }
 0x290   :  { %v422_v20 = vpop.f32.mrb[2].mxu0 }
 0x291   :  { %v277_v21 = vpop.f32.mrb[3].mxu0 }
 0x292   :  { %v442_v22 = vpack.c.bf16 %v422_v20, %v277_v21 }
 0x294   :  { %443 = vmatprep.subr.bf16.mxu1 %v442_v22 }
 0x295   :  { %445 = vmatpush3.bf16.msra.mxu1 %v442_v22 }
 0x298   :  { %428 = vmatmul.mubr.msk.f32.vlgmr.msra.gmra.mrb[2].mxu1 %vm29_vm0, %v24_v9 }
 0x36b   :  { %v429_v24 = vpop.f32.mrb[2].mxu1 }
 0x36c   :  { %v365_v25 = vadd.f32 %v429_v24, %v383_v23  ;;  %v359_v26 = vpop.f32.mrb[3].mxu1 }
 0x36d   :  { %v360_v27 = vadd.f32 %v383_v23, %v359_v26 }
 0x36e   :  { %v369_v28 = vmax.f32 %v365_v25, 0.0 }
 0x36f   :  { %v368_v29 = vmax.f32 %v360_v27, 0.0 }
 0x370   :  { %371 = vst.msk [vmem:[%s540_s6 + $0x18] sm:$0xff] %vm29_vm0, %v369_v28 }
 0x371   :  { %370 = vst.msk [vmem:[%s540_s6 + $0x10] sm:$0xff] %vm29_vm0, %v368_v29 }

// kernel: _lambda_.5
= control target key start
LH: loop header
LB: loop body
LE: loop exit
PB: predicated region body
PF: predicated region fallthrough
CT: control target
= control target key end

     0   :  { %vm61_vm0 = vcmask 130048   ;;  %s4178_s0 = inlined_call_operand.vmem [shape: f32[16,16], index: 0, kind: input, shape index: {}]   ;;  %s4179_s1 = inlined_call_operand.vmem [shape: f32[16,16], index: 1, kind: input, shape index: {}]   ;;  %s4180_s2 = inlined_call_operand.vmem [shape: f32[16,8], index: 2, kind: input, shape index: {}]   ;;  %s4181_s3 = inlined_call_operand.vmem [shape: f32[1,8], index: 3, kind: input, shape index: {}]   ;;  %s4182_s4 = inlined_call_operand.vmem [shape: f32[8,16], index: 4, kind: input, shape index: {}]   ;;  %s4183_s5 = inlined_call_operand.vmem [shape: f32[1,16], index: 5, kind: input, shape index: {}]   ;;  %s4184_s6 = inlined_call_operand.vmem [shape: f32[16,256], index: 6, kind: input, shape index: {}]   ;;  %s4185_s7 = inlined_call_operand.vmem [shape: f32[32,96], index: 7, kind: input, shape index: {}]   ;;  %s4186_s8 = inlined_call_operand.vmem [shape: f32[24,10], index: 8, kind: input, shape index: {}]   ;;  %s4187_s9 = inlined_call_operand.vmem [shape: f32[1,10], index: 9, kind: input, shape index: {}]   ;;  %s4188_s10 = inlined_call_operand.vmem [shape: f32[10,24], index: 10, kind: input, shape index: {}]   ;;  %s4189_s11 = inlined_call_operand.vmem [shape: f32[1,24], index: 11, kind: input, shape index: {}]   ;;  %s4190_s12 = inlined_call_operand.vmem [shape: f32[24,16], index: 12, kind: input, shape index: {}]   ;;  %s4191_s13 = inlined_call_operand.vmem [shape: f32[1,16], index: 13, kind: input, shape index: {}]   ;;  %s4192_s14 = inlined_call_operand.vmem [shape: f32[1,24], index: 14, kind: output, shape index: {0}]   ;;  %s4193_s15 = inlined_call_operand.hbm [shape: f32[1,1], index: 15, kind: output, shape index: {1}]  }
   0x1   :  { %v52_v0 = vld [vmem:[%s4180_s2] sm:$0xff]  ;;  %v53_v1 = vld [vmem:[%s4180_s2 + $0x8] sm:$0xff] }
   0x2   :  { %v3271_v2 = vld [vmem:[%s4178_s0] sm:$0xff]  ;;  %v3002_v3 = vpack.c.bf16 %v53_v1, %v52_v0 }
   0x3   :  { %2958 = vmatprep.mubr.msk.f32.mxu0 %vm61_vm0, %v3271_v2 }
   0x4   :  { %21 = vsyncpa [#allocation3], 0  ;;  %3003 = vmatprep.subr.bf16.mxu0 %v3002_v3  ;;  %v3278_v4 = vld [vmem:[%s4178_s0 + $0x8] sm:$0xff]  ;;  %v145_v5 = vld [vmem:[%s4182_s4] sm:$0xff]  ;;  %vm351_vm1 = vcmask 31744   ;;  %v3158_v6 = vmov 0.0   ;;  %v357_v22 = vlaneseq }
   0x5   :  { %3005 = vmatpush3.bf16.msra.mxu0 %v3002_v3  ;;  %2961 = vmatprep.subr.mxu1 %v145_v5  ;;  %v352_v7 = vsel %vm351_vm1, 1.0, %v3158_v6  ;;  %v2913_v8 = vld [vmem:[%s4181_s3] ss:$0 sm:$0xff]  ;;  %vm153_vm2 = vcmask 64512   ;;  %v265_v15 = vld [vmem:[%s4184_s6 + $0x8] sm:$0xff]  ;;  %v267_v16 = vld [vmem:[%s4184_s6 + $0x18] sm:$0xff] }
   0x6   :  { %2962 = vmatpush3.msra.mxu1 %v145_v5  ;;  %353 = vadd.xlane.f32.xlu0 %v352_v7  ;;  %v264_v17 = vld [vmem:[%s4184_s6] sm:$0xff]  ;;  %v3006_v18 = vpack.c.bf16 %v267_v16, %v265_v15  ;;  %v266_v19 = vld [vmem:[%s4184_s6 + $0x10] sm:$0xff]  ;;  %v3305_v23 = vshrl.u32 %v357_v22, 7  ;;  %s3159_s6 = smov 64   ;;  %s3160_s19 = smov 32   ;;  %vm543_vm3 = vcmask 195584  }
   0x7   :  { %v3008_v20 = vpack.c.bf16 %v266_v19, %v264_v17  ;;  %s3161_s20 = smov 96   ;;  %v2916_v37 = vld [vmem:[%s4183_s5] ss:$0 sm:$0xff]  ;;  %s3162_s5 = smov 120   ;;  %vm562_vm4 = vcmask 261120   ;;  %vm610_vm5 = vcmask 523520  }
   0x8   :  { %2959 = vmatmul.mubr.msk.f32.vlgmr.msra.gmra.mrb[0].mxu0 %vm61_vm0, %v3278_v4  ;;  %3007 = vmatprep.subr.bf16.mxu1 %v3006_v18  ;;  %v3308_v24 = vsub.s32 2, %v3305_v23  ;;  %v3311_v25 = vsub.s32 1, %v3305_v23  ;;  %v3314_v26 = vsub.s32 3, %v3305_v23  ;;  %v3326_v31 = vsub.s32 5, %v3305_v23  ;;  %s3163_s23 = smov 112   ;;  %s3164_s24 = smov 104  }
   0x9   :  { %v3333_v33 = vsub.s32 6, %v3305_v23  ;;  %v3339_v35 = vsub.s32 7, %v3305_v23  ;;  %s3165_s25 = smov 8   ;;  %s3166_s2 = smov 16   ;;  %vm656_vm6 = vcmask 785920   ;;  %vm702_vm7 = vcmask 1048320  }
   0xa   :  { %s3167_s26 = smov 24   ;;  %s3168_s27 = smov 88   ;;  %vm594_vm8 = vcmask 7168   ;;  %vm596_vm9 = vcmask 15360   ;;  %vm598_vm10 = vcmask 23552   ;;  %vm4194_vm11 = vcmask 1040384  }
   0xb   :  { %s3169_s28 = smov 80   ;;  %s3170_s0 = smov 48   ;;  %vm4195_vm12 = vcmask 1041408   ;;  %vm918_vm13 = vcmask 1042432   ;;  %vm920_vm14 = vcmask 1043456   ;;  %vm922_vm15 = vcmask 1044480  }
   0xc   :  { %s3171_s4 = smov 56   ;;  %s3172_s29 = smov 72  }
   0xd   :  { %s4196_s30 = smov 40  }
  0x93   :  { %v354_v21 = vpop.xlane.xlu0 %353 }
  0x94   :  { %3068 = vrcp.f32 %v354_v21 }
  0x9e   :  { %v3316_v27 = vpop.eup %3068 }
  0x9f   :  { %v386_v28 = vrot.slane %v3316_v27, %v3308_v24  ;;  %v366_v29 = vrot.slane %v3316_v27, %v3311_v25  ;;  %v406_v30 = vrot.slane %v3316_v27, %v3314_v26  ;;  %v434_v32 = vrot.slane %v3316_v27, %v3326_v31 }
  0xa0   :  { %v454_v34 = vrot.slane %v3316_v27, %v3333_v33  ;;  %v474_v36 = vrot.slane %v3316_v27, %v3339_v35 }
  0xa1   :  { %388 = vrot.lane.b32.xlu1 %v386_v28, %s3159_s6  ;;  %368 = vrot.lane.b32.xlu0 %v366_v29, %s3160_s19 }
  0xa5   :  { %408 = vrot.lane.b32.xlu1 %v406_v30, %s3161_s20 }
  0xa9   :  { %436 = vrot.lane.b32.xlu1 %v434_v32, %s3160_s19 }
  0xad   :  { %456 = vrot.lane.b32.xlu1 %v454_v34, %s3159_s6 }
  0xb1   :  { %476 = vrot.lane.b32.xlu1 %v474_v36, %s3161_s20 }
  0xdb   :  { %v2960_v9 = vpop.f32.mrb[0].mxu0 }
  0xdc   :  { %v140_v10 = vadd.f32 %v2960_v9, %v2913_v8  ;;  %v134_v11 = vpop.f32.mrb[1].mxu0 }
  0xdd   :  { %v135_v12 = vadd.f32 %v2913_v8, %v134_v11 }
  0xde   :  { %v144_v14 = vmax.f32 %v140_v10, 0.0 }
  0xdf   :  { %v143_v13 = vmax.f32 %v135_v12, 0.0 }
  0xe1   :  { %2963 = vmatprep.mubr.msk.f32.mxu1 %vm153_vm2, %v143_v13 }
  0xe2   :  { %2964 = vmatmul.mubr.msk.f32.vlgmr.msra.gmra.mrb[0].mxu1 %vm153_vm2, %v144_v14 }
  0xe3   :  { %338 = vmatprep.mubr.f32.mxu1 %v3158_v6  ;;  %3009 = vmatpush1.bf16.msra.mxu1 %v3008_v20 }
 0x113   :  { %v389_v10 = vpop.permute.xlu1 %388  ;;  %v369_v12 = vpop.permute.xlu0 %368 }
 0x117   :  { %v409_v11 = vpop.permute.xlu1 %408 }
 0x1b5   :  { %v2965_v38 = vpop.f32.mrb[0].mxu1 }
 0x1b6   :  { %v232_v39 = vadd.f32 %v2965_v38, %v2916_v37  ;;  %v226_v40 = vpop.f32.mrb[1].mxu1  ;;  %v3390_v38 = vsub.s32 0, %v3305_v23 }
 0x1b7   :  { %v227_v41 = vadd.f32 %v2916_v37, %v226_v40 }
 0x1b8   :  { %v236_v42 = vsel %vm61_vm0, %v232_v39, -inf }
 0x1b9   :  { %v235_v43 = vsel %vm61_vm0, %v227_v41, -inf }
 0x1ba   :  { %v237_v44 = vmax.f32 %v235_v43, %v236_v42 }
 0x1bc   :  { %v238_v45 = vrot.slane %v237_v44, 4 }
 0x1be   :  { %v239_v46 = vmax.f32 %v237_v44, %v238_v45 }
 0x1c0   :  { %v240_v47 = vrot.slane %v239_v46, 2 }
 0x1c2   :  { %v241_v48 = vmax.f32 %v239_v46, %v240_v47 }
 0x1c4   :  { %v242_v49 = vrot.slane %v241_v48, 1 }
 0x1c6   :  { %v243_v50 = vmax.f32 %v241_v48, %v242_v49 }
 0x1c8   :  { %v244_v51 = vsub.f32 %v227_v41, %v243_v50  ;;  %v245_v52 = vsub.f32 %v232_v39, %v243_v50  ;;  %v360_v39 = vrot.slane %v3316_v27, %v3390_v38  ;;  %v3396_v41 = vsub.s32 4, %v3305_v23 }
 0x1ca   :  { %v246_v53 = vmul.f32 1.442695, %v244_v51  ;;  %v248_v54 = vmul.f32 1.442695, %v245_v52  ;;  %v426_v46 = vrot.slane %v3316_v27, %v3396_v41 }
 0x1cc   :  { %3070 = vpow2.f32 %v246_v53 }
 0x1cd   :  { %3072 = vpow2.f32 %v248_v54 }
 0x1d6   :  { %v3071_v55 = vpop.eup %3070 }
 0x1d7   :  { %v3073_v56 = vpop.eup %3072  ;;  %v250_v57 = vsel %vm61_vm0, %v3071_v55, 0.0 }
 0x1d8   :  { %v251_v58 = vsel %vm61_vm0, %v3073_v56, 0.0 }
 0x1d9   :  { %v252_v59 = vadd.f32 %v251_v58, %v250_v57 }
 0x1db   :  { %v253_v60 = vrot.slane %v252_v59, 4 }
 0x1dd   :  { %v254_v61 = vadd.f32 %v253_v60, %v252_v59 }
 0x1df   :  { %v255_v62 = vrot.slane %v254_v61, 2 }
 0x1e1   :  { %v256_v63 = vadd.f32 %v255_v62, %v254_v61 }
 0x1e3   :  { %v257_v0 = vrot.slane %v256_v63, 1 }
 0x1e5   :  { %v258_v1 = vadd.f32 %v257_v0, %v256_v63 }
 0x1e7   :  { %3074 = vrcp.f32 %v258_v1 }
 0x1f1   :  { %v3075_v3 = vpop.eup %3074 }
 0x1f2   :  { %v260_v5 = vmul.f32 %v3075_v3, %v3071_v55  ;;  %v261_v7 = vmul.f32 %v3075_v3, %v3073_v56 }
 0x1f4   :  { %v262_v8 = vmul.f32 %v260_v5, %v3271_v2  ;;  %v263_v9 = vmul.f32 %v261_v7, %v3278_v4  ;;  %v437_v2 = vpop.permute.xlu1 %436 }
 0x1f6   :  { %2919 = vmatmul.mubr.msk.f32.vlgmr.msra.gmra.mrb[2].mxu1 %vm61_vm0, %v262_v8 }
 0x1f7   :  { %344 = vmatprep.mubr.f32.mxu1 %v3158_v6 }
 0x1f8   :  { %v457_v20 = vpop.permute.xlu1 %456 }
 0x1fa   :  { %2920 = vmatmul.mubr.msk.f32.gmra.mrb[4].mxu1 %vm61_vm0, %v263_v9 }
 0x1fc   :  { %v477_v30 = vpop.permute.xlu1 %476 }
 0x2c9   :  { %v3357_v13 = vpop.f32.mrb[2].mxu1 }
 0x2ca   :  { %v3359_v14 = vpop.f32.mrb[3].mxu1  ;;  %v391_v15 = vmul.f32 %v389_v10, %v3357_v13  ;;  %v371_v16 = vmul.f32 %v369_v12, %v3357_v13  ;;  %v411_v18 = vmul.f32 %v409_v11, %v3357_v13  ;;  %v361_v40 = vmul.f32 %v360_v39, %v3357_v13 }
 0x2cb   :  { %v439_v21 = vmul.f32 %v437_v2, %v3359_v14  ;;  %v459_v28 = vmul.f32 %v457_v20, %v3359_v14  ;;  %v479_v32 = vmul.f32 %v477_v30, %v3359_v14  ;;  %v427_v50 = vmul.f32 %v426_v46, %v3359_v14 }
 0x2cc   :  { %395 = vrot.lane.b32.xlu0 %v391_v15, %s3159_s6  ;;  %375 = vrot.lane.b32.xlu1 %v371_v16, %s3161_s20 }
 0x2cd   :  { %v3365_v17 = vpop.f32.mrb[4].mxu1 }
 0x2ce   :  { %v3367_v4 = vpop.f32.mrb[5].mxu1  ;;  %v372_v19 = vmul.f32 %v369_v12, %v3365_v17  ;;  %v392_v22 = vmul.f32 %v389_v10, %v3365_v17  ;;  %v412_v29 = vmul.f32 %v409_v11, %v3365_v17  ;;  %v362_v51 = vmul.f32 %v360_v39, %v3365_v17 }
 0x2cf   :  { %v440_v34 = vmul.f32 %v437_v2, %v3367_v4  ;;  %v460_v36 = vmul.f32 %v457_v20, %v3367_v4  ;;  %v480_v37 = vmul.f32 %v477_v30, %v3367_v4  ;;  %v428_v60 = vmul.f32 %v426_v46, %v3367_v4 }
 0x2d0   :  { %415 = vrot.lane.b32.xlu0 %v411_v18, %s3160_s19  ;;  %377 = vrot.lane.b32.xlu1 %v372_v19, %s3161_s20 }
 0x2d4   :  { %443 = vrot.lane.b32.xlu0 %v439_v21, %s3161_s20  ;;  %397 = vrot.lane.b32.xlu1 %v392_v22, %s3159_s6 }
 0x2d8   :  { %463 = vrot.lane.b32.xlu0 %v459_v28, %s3159_s6  ;;  %417 = vrot.lane.b32.xlu1 %v412_v29, %s3160_s19 }
 0x2dc   :  { %483 = vrot.lane.b32.xlu0 %v479_v32, %s3160_s19  ;;  %445 = vrot.lane.b32.xlu1 %v440_v34, %s3161_s20 }
 0x2e0   :  { %465 = vrot.lane.b32.xlu1 %v460_v36, %s3159_s6 }
 0x2e4   :  { %485 = vrot.lane.b32.xlu1 %v480_v37, %s3160_s19 }
 0x33e   :  { %v396_v42 = vpop.permute.xlu0 %395  ;;  %v376_v43 = vpop.permute.xlu1 %375 }
 0x33f   :  { %v381_v44 = vadd.f32 %v376_v43, %v361_v40 }
 0x341   :  { %v401_v45 = vadd.f32 %v396_v42, %v381_v44 }
 0x342   :  { %v416_v47 = vpop.permute.xlu0 %415  ;;  %v378_v48 = vpop.permute.xlu1 %377 }
 0x343   :  { %v421_v49 = vadd.f32 %v416_v47, %v401_v45  ;;  %v382_v55 = vadd.f32 %v378_v48, %v362_v51 }
 0x345   :  { %v429_v52 = vadd.f32 %v427_v50, %v421_v49 }
 0x346   :  { %v444_v53 = vpop.permute.xlu0 %443  ;;  %v398_v54 = vpop.permute.xlu1 %397 }
 0x347   :  { %v402_v23 = vadd.f32 %v398_v54, %v382_v55  ;;  %v449_v58 = vadd.f32 %v444_v53, %v429_v52 }
 0x34a   :  { %v464_v56 = vpop.permute.xlu0 %463  ;;  %v418_v57 = vpop.permute.xlu1 %417 }
 0x34b   :  { %v422_v59 = vadd.f32 %v418_v57, %v402_v23  ;;  %v469_v61 = vadd.f32 %v464_v56, %v449_v58 }
 0x34d   :  { %v430_v27 = vadd.f32 %v428_v60, %v422_v59 }
 0x34e   :  { %v484_v62 = vpop.permute.xlu0 %483  ;;  %v446_v63 = vpop.permute.xlu1 %445 }
 0x34f   :  { %v489_v0 = vadd.f32 %v484_v62, %v469_v61  ;;  %v450_v5 = vadd.f32 %v446_v63, %v430_v27 }
 0x351   :  { %v491_v1 = vmul.f32 %v489_v0, %v489_v0 }
 0x352   :  { %v466_v3 = vpop.permute.xlu1 %465 }
 0x353   :  { %495 = vrot.lane.b32.xlu0 %v491_v1, %s3162_s5  ;;  %v470_v7 = vadd.f32 %v466_v3, %v450_v5 }
 0x356   :  { %v486_v8 = vpop.permute.xlu1 %485 }
 0x357   :  { %v490_v9 = vadd.f32 %v486_v8, %v470_v7  ;;  %503 = vrot.lane.b32.xlu0 %v491_v1, %s3163_s23 }
 0x359   :  { %v492_v10 = vmul.f32 %v490_v9, %v490_v9 }
 0x35b   :  { %511 = vrot.lane.b32.xlu0 %v491_v1, %s3164_s24  ;;  %497 = vrot.lane.b32.xlu1 %v492_v10, %s3162_s5 }
 0x35f   :  { %505 = vrot.lane.b32.xlu1 %v492_v10, %s3163_s23 }
 0x363   :  { %513 = vrot.lane.b32.xlu1 %v492_v10, %s3164_s24 }
 0x3c5   :  { %v496_v11 = vpop.permute.xlu0 %495 }
 0x3c6   :  { %v501_v15 = vadd.f32 %v496_v11, %v491_v1 }
 0x3c9   :  { %v504_v12 = vpop.permute.xlu0 %503 }
 0x3ca   :  { %v509_v16 = vadd.f32 %v504_v12, %v501_v15 }
 0x3cd   :  { %v512_v2 = vpop.permute.xlu0 %511  ;;  %v498_v18 = vpop.permute.xlu1 %497 }
 0x3ce   :  { %v517_v19 = vadd.f32 %v512_v2, %v509_v16  ;;  %v502_v21 = vadd.f32 %v498_v18, %v492_v10 }
 0x3d0   :  { %521 = vrot.lane.b32.xlu0 %v517_v19, %s3165_s25 }
 0x3d1   :  { %v506_v20 = vpop.permute.xlu1 %505 }
 0x3d2   :  { %v510_v22 = vadd.f32 %v506_v20, %v502_v21 }
 0x3d4   :  { %527 = vrot.lane.b32.xlu0 %v517_v19, %s3166_s2 }
 0x3d5   :  { %v514_v28 = vpop.permute.xlu1 %513 }
 0x3d6   :  { %v518_v29 = vadd.f32 %v514_v28, %v510_v22 }
 0x3d8   :  { %533 = vrot.lane.b32.xlu0 %v517_v19, %s3167_s26  ;;  %523 = vrot.lane.b32.xlu1 %v518_v29, %s3165_s25 }
 0x3dc   :  { %529 = vrot.lane.b32.xlu1 %v518_v29, %s3166_s2 }
 0x3e0   :  { %535 = vrot.lane.b32.xlu1 %v518_v29, %s3167_s26 }
 0x442   :  { %v522_v30 = vpop.permute.xlu0 %521 }
 0x443   :  { %v539_v34 = vsel %vm153_vm2, %v517_v19, %v522_v30 }
 0x446   :  { %v528_v32 = vpop.permute.xlu0 %527 }
 0x447   :  { %v541_v36 = vsel %vm61_vm0, %v539_v34, %v528_v32 }
 0x44a   :  { %v534_v37 = vpop.permute.xlu0 %533  ;;  %v524_v39 = vpop.permute.xlu1 %523 }
 0x44b   :  { %v544_v40 = vsel %vm543_vm3, %v541_v36, %v534_v37  ;;  %v540_v45 = vsel %vm153_vm2, %v518_v29, %v524_v39 }
 0x44c   :  { %v546_v42 = vadd.f32 1.0, %v544_v40  ;;  %v554_v43 = vadd.f32 1e-09, %v544_v40 }
 0x44e   :  { %3076 = vrcp.f32 %v546_v42  ;;  %v530_v44 = vpop.permute.xlu1 %529 }
 0x44f   :  { %3078 = vrsqrt.f32 %v554_v43  ;;  %v542_v46 = vsel %vm61_vm0, %v540_v45, %v530_v44 }
 0x452   :  { %v536_v47 = vpop.permute.xlu1 %535 }
 0x453   :  { %v545_v48 = vsel %vm543_vm3, %v542_v46, %v536_v47 }
 0x454   :  { %v547_v49 = vadd.f32 1.0, %v545_v48  ;;  %v555_v50 = vadd.f32 1e-09, %v545_v48 }
 0x456   :  { %3080 = vrcp.f32 %v547_v49 }
 0x457   :  { %3082 = vrsqrt.f32 %v555_v50 }
 0x458   :  { %v3077_v51 = vpop.eup %3076 }
 0x459   :  { %v549_v52 = vmul.f32 %v3077_v51, %v544_v40  ;;  %v3079_v54 = vpop.eup %3078 }
 0x45b   :  { %v552_v53 = vmul.f32 %v549_v52, %v489_v0 }
 0x45d   :  { %v558_v55 = vmul.f32 %v3079_v54, %v552_v53 }
 0x45f   :  { %602 = vrot.lane.b32.xlu0 %v558_v55, %s3160_s19  ;;  %v560_v60 = vmul.f32 %v558_v55, %v3357_v13  ;;  %v740_v61 = vmul.f32 %v558_v55, %v3359_v14 }
 0x460   :  { %v3081_v23 = vpop.eup %3080 }
 0x461   :  { %v551_v56 = vmul.f32 %v3081_v23, %v545_v48  ;;  %v3083_v58 = vpop.eup %3082  ;;  %v563_v63 = vsel %vm562_vm4, %v560_v60, 0.0  ;;  %v742_v1 = vsel %vm562_vm4, %v740_v61, 0.0 }
 0x463   :  { %v553_v57 = vmul.f32 %v551_v56, %v490_v9  ;;  %648 = vrot.lane.b32.xlu0 %v558_v55, %s3159_s6 }
 0x465   :  { %v559_v59 = vmul.f32 %v3083_v58, %v553_v57 }
 0x467   :  { %694 = vrot.lane.b32.xlu0 %v558_v55, %s3161_s20  ;;  %604 = vrot.lane.b32.xlu1 %v559_v59, %s3160_s19  ;;  %v561_v27 = vmul.f32 %v559_v59, %v3365_v17  ;;  %v741_v62 = vmul.f32 %v559_v59, %v3367_v4 }
 0x469   :  { %v564_v0 = vsel %vm562_vm4, %v561_v27, 0.0  ;;  %v743_v3 = vsel %vm562_vm4, %v741_v62, 0.0 }
 0x46a   :  { %v565_v5 = vadd.f32 %v564_v0, %v563_v63  ;;  %v744_v7 = vadd.f32 %v743_v3, %v742_v1 }
 0x46b   :  { %650 = vrot.lane.b32.xlu1 %v559_v59, %s3159_s6 }
 0x46c   :  { %v566_v8 = vrot.slane %v565_v5, 4  ;;  %v745_v9 = vrot.slane %v744_v7, 4 }
 0x46e   :  { %v567_v10 = vadd.f32 %v566_v8, %v565_v5  ;;  %v746_v11 = vadd.f32 %v745_v9, %v744_v7 }
 0x46f   :  { %696 = vrot.lane.b32.xlu1 %v559_v59, %s3161_s20 }
 0x470   :  { %v568_v12 = vrot.slane %v567_v10, 2  ;;  %v747_v15 = vrot.slane %v746_v11, 2 }
 0x472   :  { %v569_v16 = vadd.f32 %v568_v12, %v567_v10  ;;  %v748_v2 = vadd.f32 %v747_v15, %v746_v11 }
 0x474   :  { %v570_v18 = vrot.slane %v569_v16, 1  ;;  %v749_v20 = vrot.slane %v748_v2, 1 }
 0x476   :  { %v571_v19 = vadd.f32 %v570_v18, %v569_v16  ;;  %v750_v21 = vadd.f32 %v749_v20, %v748_v2 }
 0x478   :  { %582 = vrot.lane.b32.xlu0 %v571_v19, %s3163_s23  ;;  %576 = vrot.lane.b32.xlu1 %v571_v19, %s3162_s5  ;;  %v572_v22 = vsel %vm153_vm2, %v571_v19, 0.0  ;;  %v751_v28 = vsel %vm153_vm2, %v750_v21, 0.0 }
 0x47c   :  { %588 = vrot.lane.b32.xlu0 %v571_v19, %s3164_s24  ;;  %755 = vrot.lane.b32.xlu1 %v750_v21, %s3162_s5 }
 0x480   :  { %761 = vrot.lane.b32.xlu0 %v750_v21, %s3163_s23  ;;  %767 = vrot.lane.b32.xlu1 %v750_v21, %s3164_s24 }
 0x49f   :  { %573 = vadd.xlane.f32.xlu0 %v572_v22 }
 0x4a4   :  { %752 = vadd.xlane.f32.xlu1 %v751_v28 }
 0x4d1   :  { %v603_v29 = vpop.permute.xlu0 %602 }
 0x4d2   :  { %v608_v32 = vmul.f32 %v603_v29, %v3357_v13  ;;  %v776_v34 = vmul.f32 %v603_v29, %v3359_v14 }
 0x4d4   :  { %v611_v43 = vsel %vm610_vm5, %v608_v32, 0.0  ;;  %v778_v44 = vsel %vm610_vm5, %v776_v34, 0.0 }
 0x4d5   :  { %v649_v30 = vpop.permute.xlu0 %648 }
 0x4d6   :  { %v654_v40 = vmul.f32 %v649_v30, %v3357_v13  ;;  %v815_v42 = vmul.f32 %v649_v30, %v3359_v14 }
 0x4d8   :  { %v657_v53 = vsel %vm656_vm6, %v654_v40, 0.0  ;;  %v817_v54 = vsel %vm656_vm6, %v815_v42, 0.0 }
 0x4d9   :  { %v605_v36 = vpop.permute.xlu1 %604  ;;  %v695_v47 = vpop.permute.xlu0 %694 }
 0x4da   :  { %v609_v37 = vmul.f32 %v605_v36, %v3365_v17  ;;  %v777_v39 = vmul.f32 %v605_v36, %v3367_v4  ;;  %v700_v23 = vmul.f32 %v695_v47, %v3357_v13  ;;  %v854_v56 = vmul.f32 %v695_v47, %v3359_v14 }
 0x4dc   :  { %v612_v45 = vsel %vm610_vm5, %v609_v37, 0.0  ;;  %v779_v46 = vsel %vm610_vm5, %v777_v39, 0.0  ;;  %v703_v3 = vsel %vm702_vm7, %v700_v23, 0.0  ;;  %v856_v5 = vsel %vm702_vm7, %v854_v56, 0.0 }
 0x4dd   :  { %v613_v48 = vadd.f32 %v612_v45, %v611_v43  ;;  %v780_v49 = vadd.f32 %v779_v46, %v778_v44  ;;  %v651_v50 = vpop.permute.xlu1 %650 }
 0x4de   :  { %v655_v51 = vmul.f32 %v651_v50, %v3365_v17  ;;  %v816_v52 = vmul.f32 %v651_v50, %v3367_v4 }
 0x4df   :  { %v614_v55 = vrot.slane %v613_v48, 4  ;;  %v781_v29 = vrot.slane %v780_v49, 4 }
 0x4e0   :  { %v658_v57 = vsel %vm656_vm6, %v655_v51, 0.0  ;;  %v818_v58 = vsel %vm656_vm6, %v816_v52, 0.0 }
 0x4e1   :  { %v615_v59 = vadd.f32 %v614_v55, %v613_v48  ;;  %v659_v60 = vadd.f32 %v658_v57, %v657_v53  ;;  %v819_v61 = vadd.f32 %v818_v58, %v817_v54  ;;  %v697_v27 = vpop.permute.xlu1 %696  ;;  %v782_v32 = vadd.f32 %v781_v29, %v780_v49 }
 0x4e2   :  { %v701_v62 = vmul.f32 %v697_v27, %v3365_v17  ;;  %v855_v63 = vmul.f32 %v697_v27, %v3367_v4 }
 0x4e3   :  { %v616_v0 = vrot.slane %v615_v59, 2  ;;  %v660_v1 = vrot.slane %v659_v60, 4  ;;  %v820_v34 = vrot.slane %v819_v61, 4  ;;  %v783_v37 = vrot.slane %v782_v32, 2 }
 0x4e4   :  { %v704_v7 = vsel %vm702_vm7, %v701_v62, 0.0  ;;  %v857_v8 = vsel %vm702_vm7, %v855_v63, 0.0 }
 0x4e5   :  { %v661_v9 = vadd.f32 %v660_v1, %v659_v60  ;;  %v705_v10 = vadd.f32 %v704_v7, %v703_v3  ;;  %v858_v11 = vadd.f32 %v857_v8, %v856_v5  ;;  %v617_v12 = vadd.f32 %v616_v0, %v615_v59 }
 0x4e6   :  { %v821_v39 = vadd.f32 %v820_v34, %v819_v61  ;;  %v784_v44 = vadd.f32 %v783_v37, %v782_v32 }
 0x4e7   :  { %v662_v15 = vrot.slane %v661_v9, 2  ;;  %v706_v16 = vrot.slane %v705_v10, 4  ;;  %v618_v2 = vrot.slane %v617_v12, 1  ;;  %v859_v43 = vrot.slane %v858_v11, 4 }
 0x4e8   :  { %v822_v42 = vrot.slane %v821_v39, 2  ;;  %v785_v46 = vrot.slane %v784_v44, 1 }
 0x4e9   :  { %v707_v18 = vadd.f32 %v706_v16, %v705_v10  ;;  %v663_v19 = vadd.f32 %v662_v15, %v661_v9  ;;  %v619_v20 = vadd.f32 %v618_v2, %v617_v12  ;;  %v860_v45 = vadd.f32 %v859_v43, %v858_v11 }
 0x4ea   :  { %v823_v47 = vadd.f32 %v822_v42, %v821_v39  ;;  %v786_v49 = vadd.f32 %v785_v46, %v784_v44  ;;  %v577_v55 = vpop.permute.xlu1 %576  ;;  %v583_v23 = vpop.permute.xlu0 %582 }
 0x4eb   :  { %v708_v21 = vrot.slane %v707_v18, 2  ;;  %v664_v22 = vrot.slane %v663_v19, 1  ;;  %627 = vrot.lane.b32.xlu1 %v619_v20, %s3168_s27  ;;  %621 = vrot.lane.b32.xlu0 %v619_v20, %s3161_s20  ;;  %v861_v48 = vrot.slane %v860_v45, 2  ;;  %v585_v57 = vsel %vm153_vm2, %v583_v23, 0.0 }
 0x4ec   :  { %v824_v50 = vrot.slane %v823_v47, 1  ;;  %v579_v61 = vsel %vm153_vm2, %v577_v55, 0.0 }
 0x4ed   :  { %v665_v28 = vadd.f32 %v664_v22, %v663_v19  ;;  %v709_v30 = vadd.f32 %v708_v21, %v707_v18  ;;  %v862_v52 = vadd.f32 %v861_v48, %v860_v45 }
 0x4ee   :  { %v825_v51 = vadd.f32 %v824_v50, %v823_v47  ;;  %v756_v56 = vpop.permute.xlu1 %755  ;;  %v589_v58 = vpop.permute.xlu0 %588 }
 0x4ef   :  { %667 = vrot.lane.b32.xlu1 %v665_v28, %s3159_s6  ;;  %633 = vrot.lane.b32.xlu0 %v619_v20, %s3169_s28  ;;  %v710_v36 = vrot.slane %v709_v30, 1  ;;  %v863_v53 = vrot.slane %v862_v52, 1  ;;  %v758_v59 = vsel %vm153_vm2, %v756_v56, 0.0  ;;  %v591_v62 = vsel %vm153_vm2, %v589_v58, 0.0 }
 0x4f1   :  { %v711_v40 = vadd.f32 %v710_v36, %v709_v30  ;;  %v864_v54 = vadd.f32 %v863_v53, %v862_v52 }
 0x4f2   :  { %v768_v60 = vpop.permute.xlu1 %767  ;;  %v762_v63 = vpop.permute.xlu0 %761 }
 0x4f3   :  { %679 = vrot.lane.b32.xlu1 %v665_v28, %s3170_s0  ;;  %673 = vrot.lane.b32.xlu0 %v665_v28, %s3171_s4  ;;  %v770_v27 = vsel %vm153_vm2, %v768_v60, 0.0  ;;  %v764_v0 = vsel %vm153_vm2, %v762_v63, 0.0 }
 0x4f7   :  { %719 = vrot.lane.b32.xlu1 %v711_v40, %s3167_s26  ;;  %639 = vrot.lane.b32.xlu0 %v619_v20, %s3172_s29 }
 0x4fb   :  { %685 = vrot.lane.b32.xlu1 %v665_v28, %s4196_s30  ;;  %713 = vrot.lane.b32.xlu0 %v711_v40, %s3160_s19 }
 0x4ff   :  { %731 = vrot.lane.b32.xlu1 %v711_v40, %s3165_s25  ;;  %725 = vrot.lane.b32.xlu0 %v711_v40, %s3166_s2 }
 0x503   :  { %788 = vrot.lane.b32.xlu1 %v786_v49, %s3161_s20  ;;  %794 = vrot.lane.b32.xlu0 %v786_v49, %s3168_s27 }
 0x507   :  { %827 = vrot.lane.b32.xlu1 %v825_v51, %s3159_s6  ;;  %800 = vrot.lane.b32.xlu0 %v786_v49, %s3169_s28 }
 0x50b   :  { %806 = vrot.lane.b32.xlu1 %v786_v49, %s3172_s29  ;;  %833 = vrot.lane.b32.xlu0 %v825_v51, %s3171_s4 }
 0x50f   :  { %866 = vrot.lane.b32.xlu1 %v864_v54, %s3160_s19  ;;  %839 = vrot.lane.b32.xlu0 %v825_v51, %s3170_s0 }
 0x513   :  { %845 = vrot.lane.b32.xlu1 %v825_v51, %s4196_s30  ;;  %872 = vrot.lane.b32.xlu0 %v864_v54, %s3167_s26 }
 0x517   :  { %884 = vrot.lane.b32.xlu1 %v864_v54, %s3165_s25  ;;  %878 = vrot.lane.b32.xlu0 %v864_v54, %s3166_s2 }
 0x52c   :  { %v3497_v1 = vpop.xlane.xlu0 %573 }
 0x531   :  { %v3499_v3 = vpop.xlane.xlu1 %752 }
 0x536   :  { %586 = vadd.xlane.f32.xlu0 %v585_v57 }
 0x53a   :  { %759 = vadd.xlane.f32.xlu0 %v758_v59 }
 0x53b   :  { %580 = vadd.xlane.f32.xlu1 %v579_v61 }
 0x53e   :  { %771 = vadd.xlane.f32.xlu0 %v770_v27 }
 0x53f   :  { %592 = vadd.xlane.f32.xlu1 %v591_v62 }
 0x543   :  { %765 = vadd.xlane.f32.xlu1 %v764_v0 }
 0x55d   :  { %v628_v5 = vpop.permute.xlu1 %627  ;;  %v622_v7 = vpop.permute.xlu0 %621 }
 0x55e   :  { %v630_v8 = vsel %vm153_vm2, %v628_v5, 0.0  ;;  %v624_v9 = vsel %vm153_vm2, %v622_v7, 0.0 }
 0x55f   :  { %631 = vadd.xlane.f32.xlu1 %v630_v8  ;;  %625 = vadd.xlane.f32.xlu0 %v624_v9 }
 0x561   :  { %v668_v10 = vpop.permute.xlu1 %667  ;;  %v634_v11 = vpop.permute.xlu0 %633 }
 0x562   :  { %v636_v12 = vsel %vm153_vm2, %v634_v11, 0.0  ;;  %v670_v2 = vsel %vm153_vm2, %v668_v10, 0.0 }
 0x563   :  { %637 = vadd.xlane.f32.xlu0 %v636_v12 }
 0x565   :  { %v680_v15 = vpop.permute.xlu1 %679  ;;  %v674_v16 = vpop.permute.xlu0 %673 }
 0x566   :  { %v676_v18 = vsel %vm153_vm2, %v674_v16, 0.0  ;;  %v682_v21 = vsel %vm153_vm2, %v680_v15, 0.0 }
 0x567   :  { %671 = vadd.xlane.f32.xlu0 %v670_v2  ;;  %677 = vadd.xlane.f32.xlu1 %v676_v18 }
 0x569   :  { %v720_v19 = vpop.permute.xlu1 %719  ;;  %v640_v20 = vpop.permute.xlu0 %639 }
 0x56a   :  { %v642_v22 = vsel %vm153_vm2, %v640_v20, 0.0  ;;  %v722_v30 = vsel %vm153_vm2, %v720_v19, 0.0 }
 0x56b   :  { %683 = vadd.xlane.f32.xlu1 %v682_v21  ;;  %643 = vadd.xlane.f32.xlu0 %v642_v22 }
 0x56d   :  { %v686_v28 = vpop.permute.xlu1 %685  ;;  %v714_v29 = vpop.permute.xlu0 %713 }
 0x56e   :  { %v716_v32 = vsel %vm153_vm2, %v714_v29, 0.0  ;;  %v688_v37 = vsel %vm153_vm2, %v686_v28, 0.0 }
 0x56f   :  { %723 = vadd.xlane.f32.xlu1 %v722_v30  ;;  %717 = vadd.xlane.f32.xlu0 %v716_v32 }
 0x571   :  { %v732_v34 = vpop.permute.xlu1 %731  ;;  %v726_v36 = vpop.permute.xlu0 %725 }
 0x572   :  { %v728_v39 = vsel %vm153_vm2, %v726_v36, 0.0  ;;  %v734_v43 = vsel %vm153_vm2, %v732_v34, 0.0 }
 0x573   :  { %689 = vadd.xlane.f32.xlu1 %v688_v37  ;;  %729 = vadd.xlane.f32.xlu0 %v728_v39 }
 0x575   :  { %v789_v40 = vpop.permute.xlu1 %788  ;;  %v795_v42 = vpop.permute.xlu0 %794 }
 0x576   :  { %v797_v44 = vsel %vm153_vm2, %v795_v42, 0.0  ;;  %v791_v47 = vsel %vm153_vm2, %v789_v40, 0.0 }
 0x577   :  { %735 = vadd.xlane.f32.xlu0 %v734_v43  ;;  %798 = vadd.xlane.f32.xlu1 %v797_v44 }
 0x579   :  { %v828_v45 = vpop.permute.xlu1 %827  ;;  %v801_v46 = vpop.permute.xlu0 %800 }
 0x57a   :  { %v803_v48 = vsel %vm153_vm2, %v801_v46, 0.0  ;;  %v830_v51 = vsel %vm153_vm2, %v828_v45, 0.0 }
 0x57b   :  { %792 = vadd.xlane.f32.xlu0 %v791_v47  ;;  %804 = vadd.xlane.f32.xlu1 %v803_v48 }
 0x57d   :  { %v807_v49 = vpop.permute.xlu1 %806  ;;  %v834_v50 = vpop.permute.xlu0 %833 }
 0x57e   :  { %v836_v52 = vsel %vm153_vm2, %v834_v50, 0.0  ;;  %v809_v55 = vsel %vm153_vm2, %v807_v49, 0.0 }
 0x57f   :  { %831 = vadd.xlane.f32.xlu0 %v830_v51  ;;  %837 = vadd.xlane.f32.xlu1 %v836_v52 }
 0x581   :  { %v867_v53 = vpop.permute.xlu1 %866  ;;  %v840_v54 = vpop.permute.xlu0 %839 }
 0x582   :  { %v842_v23 = vsel %vm153_vm2, %v840_v54, 0.0  ;;  %v869_v58 = vsel %vm153_vm2, %v867_v53, 0.0 }
 0x583   :  { %810 = vadd.xlane.f32.xlu0 %v809_v55  ;;  %843 = vadd.xlane.f32.xlu1 %v842_v23 }
 0x585   :  { %v846_v56 = vpop.permute.xlu1 %845  ;;  %v873_v57 = vpop.permute.xlu0 %872 }
 0x586   :  { %v875_v59 = vsel %vm153_vm2, %v873_v57, 0.0  ;;  %v848_v61 = vsel %vm153_vm2, %v846_v56, 0.0 }
 0x587   :  { %870 = vadd.xlane.f32.xlu0 %v869_v58  ;;  %876 = vadd.xlane.f32.xlu1 %v875_v59 }
 0x589   :  { %v879_v60 = vpop.permute.xlu0 %878  ;;  %v885_v62 = vpop.permute.xlu1 %884 }
 0x58a   :  { %v881_v27 = vsel %vm153_vm2, %v879_v60, 0.0  ;;  %v887_v63 = vsel %vm153_vm2, %v885_v62, 0.0 }
 0x58b   :  { %849 = vadd.xlane.f32.xlu0 %v848_v61  ;;  %882 = vadd.xlane.f32.xlu1 %v881_v27 }
 0x58f   :  { %888 = vadd.xlane.f32.xlu0 %v887_v63 }
 0x5c3   :  { %v587_v0 = vpop.xlane.xlu0 %586 }
 0x5c7   :  { %v760_v7 = vpop.xlane.xlu0 %759 }
 0x5c8   :  { %v581_v5 = vpop.xlane.xlu1 %580  ;;  %v773_v53 = vsel %vm594_vm8, %v3499_v3, %v760_v7 }
 0x5c9   :  { %v595_v50 = vsel %vm594_vm8, %v3497_v1, %v581_v5 }
 0x5ca   :  { %v597_v58 = vsel %vm596_vm9, %v595_v50, %v587_v0 }
 0x5cb   :  { %v772_v9 = vpop.xlane.xlu0 %771 }
 0x5cc   :  { %v593_v8 = vpop.xlane.xlu1 %592 }
 0x5cd   :  { %v599_v60 = vsel %vm598_vm10, %v597_v58, %v593_v8 }
 0x5d0   :  { %v766_v10 = vpop.xlane.xlu1 %765 }
 0x5d1   :  { %v774_v56 = vsel %vm596_vm9, %v773_v53, %v766_v10 }
 0x5d2   :  { %v775_v27 = vsel %vm598_vm10, %v774_v56, %v772_v9 }
 0x5ec   :  { %v626_v11 = vpop.xlane.xlu0 %625  ;;  %v632_v12 = vpop.xlane.xlu1 %631 }
 0x5ed   :  { %v645_v39 = vsel %vm594_vm8, %v626_v11, %v632_v12  ;;  %v903_v12 = vrot.slane %v775_v27, 4 }
 0x5f0   :  { %v638_v15 = vpop.xlane.xlu0 %637 }
 0x5f1   :  { %v646_v40 = vsel %vm596_vm9, %v645_v39, %v638_v15 }
 0x5f4   :  { %v678_v16 = vpop.xlane.xlu1 %677  ;;  %v672_v2 = vpop.xlane.xlu0 %671 }
 0x5f5   :  { %v691_v42 = vsel %vm594_vm8, %v672_v2, %v678_v16 }
 0x5f8   :  { %v684_v18 = vpop.xlane.xlu1 %683  ;;  %v644_v19 = vpop.xlane.xlu0 %643 }
 0x5f9   :  { %v692_v45 = vsel %vm596_vm9, %v691_v42, %v684_v18  ;;  %v647_v46 = vsel %vm598_vm10, %v646_v40, %v644_v19  ;;  %v3174_v40 = vmov 1   ;;  %v3175_v42 = vmov 0  }
 0x5fa   :  { %v894_v54 = vrot.slane %v647_v46, 7  ;;  %3055 = vset.pattern.permute.xlu0 %v3174_v40  ;;  %3054 = vset.pattern.permute.xlu1 %v3175_v42  ;;  %v3176_v46 = vmov 2  }
 0x5fc   :  { %v724_v20 = vpop.xlane.xlu1 %723  ;;  %v718_v21 = vpop.xlane.xlu0 %717  ;;  %v915_v62 = vsel %vm4194_vm11, %v599_v60, %v894_v54  ;;  %vm924_vm11 = vcmask 1045504  }
 0x5fd   :  { %v737_v47 = vsel %vm594_vm8, %v718_v21, %v724_v20 }
 0x600   :  { %v690_v22 = vpop.xlane.xlu1 %689  ;;  %v730_v28 = vpop.xlane.xlu0 %729 }
 0x601   :  { %v693_v48 = vsel %vm598_vm10, %v692_v45, %v690_v22  ;;  %v738_v49 = vsel %vm596_vm9, %v737_v47, %v730_v28  ;;  %v3177_v47 = vmov 3  }
 0x602   :  { %v897_v57 = vrot.slane %v693_v48, 6 }
 0x604   :  { %v799_v29 = vpop.xlane.xlu1 %798  ;;  %v736_v30 = vpop.xlane.xlu0 %735  ;;  %v917_v0 = vsel %vm4195_vm12, %v915_v62, %v897_v57  ;;  %vm926_vm12 = vcmask 1046528  }
 0x605   :  { %v739_v51 = vsel %vm598_vm10, %v738_v49, %v736_v30 }
 0x606   :  { %v900_v59 = vrot.slane %v739_v51, 5 }
 0x608   :  { %v805_v32 = vpop.xlane.xlu1 %804  ;;  %v793_v34 = vpop.xlane.xlu0 %792  ;;  %v919_v11 = vsel %vm918_vm13, %v917_v0, %v900_v59 }
 0x609   :  { %v812_v52 = vsel %vm594_vm8, %v793_v34, %v799_v29  ;;  %v921_v18 = vsel %vm920_vm14, %v919_v11, %v903_v12 }
 0x60a   :  { %v813_v1 = vsel %vm596_vm9, %v812_v52, %v805_v32 }
 0x60c   :  { %v838_v36 = vpop.xlane.xlu1 %837  ;;  %v832_v37 = vpop.xlane.xlu0 %831 }
 0x60d   :  { %v851_v61 = vsel %vm594_vm8, %v832_v37, %v838_v36 }
 0x610   :  { %v844_v43 = vpop.xlane.xlu1 %843  ;;  %v811_v44 = vpop.xlane.xlu0 %810 }
 0x611   :  { %v814_v3 = vsel %vm598_vm10, %v813_v1, %v811_v44  ;;  %v852_v63 = vsel %vm596_vm9, %v851_v61, %v844_v43 }
 0x612   :  { %v906_v8 = vrot.slane %v814_v3, 3 }
 0x614   :  { %v877_v55 = vpop.xlane.xlu1 %876  ;;  %v871_v23 = vpop.xlane.xlu0 %870  ;;  %v923_v20 = vsel %vm922_vm15, %v921_v18, %v906_v8 }
 0x615   :  { %v890_v15 = vsel %vm594_vm8, %v871_v23, %v877_v55 }
 0x618   :  { %v850_v5 = vpop.xlane.xlu0 %849  ;;  %v883_v7 = vpop.xlane.xlu1 %882 }
 0x619   :  { %v853_v10 = vsel %vm598_vm10, %v852_v63, %v850_v5  ;;  %v891_v9 = vsel %vm596_vm9, %v890_v15, %v883_v7 }
 0x61a   :  { %v909_v16 = vrot.slane %v853_v10, 2 }
 0x61c   :  { %v889_v2 = vpop.xlane.xlu0 %888  ;;  %v925_v22 = vsel %vm924_vm11, %v923_v20, %v909_v16 }
 0x61d   :  { %v892_v19 = vsel %vm598_vm10, %v891_v9, %v889_v2 }
 0x61e   :  { %v912_v21 = vrot.slane %v892_v19, 1 }
 0x620   :  { %v927_v28 = vsel %vm926_vm12, %v925_v22, %v912_v21 }
 0x621   :  { %v3558_v29 = vmul.f32 0.0625, %v927_v28 }
 0x623   :  { %v931_v30 = vsel %vm351_vm1, %v3558_v29, -inf }
 0x624   :  { %932 = vmax.xlane.f32.xlu1 %v931_v30 }
 0x6b1   :  { %v933_v32 = vpop.xlane.xlu1 %932 }
 0x6b2   :  { %v934_v34 = vsub.f32 %v3558_v29, %v933_v32 }
 0x6b4   :  { %v935_v36 = vmul.f32 1.442695, %v934_v34 }
 0x6b6   :  { %3084 = vpow2.f32 %v935_v36 }
 0x6c0   :  { %v3085_v37 = vpop.eup %3084 }
 0x6c1   :  { %v937_v39 = vsel %vm351_vm1, %v3085_v37, 0.0 }
 0x6c2   :  { %938 = vadd.xlane.f32.xlu0 %v937_v39 }
 0x74f   :  { %v939_v43 = vpop.xlane.xlu0 %938 }
 0x750   :  { %3086 = vrcp.f32 %v939_v43 }
 0x75a   :  { %v3087_v44 = vpop.eup %3086 }
 0x75b   :  { %v941_v45 = vmul.f32 %v3087_v44, %v3085_v37 }
 0x75d   :  { %948 = vperm.xlu0 %3055, %v941_v45   ;;  %944 = vperm.xlu1 %3054, %v941_v45  }
 0x761   :  { %3056 = vset.pattern.permute.xlu1 %v3176_v46  ;;  %3058 = vset.pattern.permute.xlu0 %v3175_v42 }
 0x762   :  { %952 = vperm.xlu1 %3056, %v941_v45  }
 0x766   :  { %3057 = vset.pattern.permute.xlu1 %v3177_v47 }
 0x767   :  { %956 = vperm.xlu1 %3057, %v941_v45  }
 0x76b   :  { %3059 = vset.pattern.permute.xlu1 %v3174_v40 }
 0x7dc   :  { %v945_v48 = vpop.permute.xlu1 %944  ;;  %v949_v50 = vpop.permute.xlu0 %948 }
 0x7dd   :  { %v959_v51 = vsel %vm153_vm2, %v945_v48, %v949_v50 }
 0x7e1   :  { %v953_v49 = vpop.permute.xlu1 %952 }
 0x7e2   :  { %v960_v52 = vsel %vm61_vm0, %v959_v51, %v953_v49 }
 0x7e6   :  { %v957_v53 = vpop.permute.xlu1 %956 }
 0x7e7   :  { %v961_v54 = vsel %vm543_vm3, %v960_v52, %v957_v53 }
 0x7e8   :  { %v1079_v55 = vrot.slane %v961_v54, %v3339_v35  ;;  %v971_v23 = vrot.slane %v961_v54, %v3311_v25  ;;  %v965_v56 = vrot.slane %v961_v54, %v3390_v38  ;;  %v1031_v57 = vrot.slane %v961_v54, %v3396_v41 }
 0x7e9   :  { %v991_v61 = vrot.slane %v961_v54, %v3308_v24  ;;  %v1011_v3 = vrot.slane %v961_v54, %v3314_v26  ;;  %v1039_v27 = vrot.slane %v961_v54, %v3326_v31  ;;  %v1059_v62 = vrot.slane %v961_v54, %v3333_v33 }
 0x7ea   :  { %1081 = vrot.lane.b32.xlu0 %v1079_v55, %s3161_s20  ;;  %973 = vrot.lane.b32.xlu1 %v971_v23, %s3160_s19  ;;  %v967_v58 = vmul.f32 %v965_v56, %v3365_v17  ;;  %v966_v59 = vmul.f32 %v965_v56, %v3357_v13  ;;  %v1033_v1 = vmul.f32 %v1031_v57, %v3367_v4 }
 0x7eb   :  { %v1032_v60 = vmul.f32 %v1031_v57, %v3359_v14 }
 0x7ee   :  { %993 = vrot.lane.b32.xlu1 %v991_v61, %s3159_s6 }
 0x7f2   :  { %1013 = vrot.lane.b32.xlu1 %v1011_v3, %s3161_s20 }
 0x7f6   :  { %1041 = vrot.lane.b32.xlu1 %v1039_v27, %s3160_s19 }
 0x7fa   :  { %1061 = vrot.lane.b32.xlu1 %v1059_v62, %s3159_s6 }
 0x85c   :  { %v974_v63 = vpop.permute.xlu1 %973  ;;  %v1082_v21 = vpop.permute.xlu0 %1081 }
 0x85d   :  { %v976_v5 = vmul.f32 %v974_v63, %v3357_v13  ;;  %v977_v0 = vmul.f32 %v974_v63, %v3365_v17  ;;  %v1084_v22 = vmul.f32 %v1082_v21, %v3359_v14  ;;  %v1085_v28 = vmul.f32 %v1082_v21, %v3367_v4 }
 0x85f   :  { %982 = vrot.lane.b32.xlu0 %v977_v0, %s3161_s20  ;;  %980 = vrot.lane.b32.xlu1 %v976_v5, %s3161_s20 }
 0x860   :  { %v994_v7 = vpop.permute.xlu1 %993 }
 0x861   :  { %v996_v10 = vmul.f32 %v994_v7, %v3357_v13  ;;  %v997_v11 = vmul.f32 %v994_v7, %v3365_v17 }
 0x863   :  { %1002 = vrot.lane.b32.xlu0 %v997_v11, %s3159_s6  ;;  %1000 = vrot.lane.b32.xlu1 %v996_v10, %s3159_s6 }
 0x864   :  { %v1014_v8 = vpop.permute.xlu1 %1013 }
 0x865   :  { %v1016_v12 = vmul.f32 %v1014_v8, %v3357_v13  ;;  %v1017_v15 = vmul.f32 %v1014_v8, %v3365_v17 }
 0x867   :  { %1022 = vrot.lane.b32.xlu0 %v1017_v15, %s3160_s19  ;;  %1020 = vrot.lane.b32.xlu1 %v1016_v12, %s3160_s19 }
 0x868   :  { %v1042_v16 = vpop.permute.xlu1 %1041 }
 0x869   :  { %v1044_v9 = vmul.f32 %v1042_v16, %v3359_v14  ;;  %v1045_v2 = vmul.f32 %v1042_v16, %v3367_v4 }
 0x86b   :  { %1050 = vrot.lane.b32.xlu0 %v1045_v2, %s3161_s20  ;;  %1048 = vrot.lane.b32.xlu1 %v1044_v9, %s3161_s20 }
 0x86c   :  { %v1062_v18 = vpop.permute.xlu1 %1061 }
 0x86d   :  { %v1064_v19 = vmul.f32 %v1062_v18, %v3359_v14  ;;  %v1065_v20 = vmul.f32 %v1062_v18, %v3367_v4 }
 0x86f   :  { %1070 = vrot.lane.b32.xlu0 %v1065_v20, %s3159_s6  ;;  %1068 = vrot.lane.b32.xlu1 %v1064_v19, %s3159_s6 }
 0x873   :  { %1090 = vrot.lane.b32.xlu0 %v1085_v28, %s3160_s19  ;;  %1088 = vrot.lane.b32.xlu1 %v1084_v22, %s3160_s19 }
 0x8d1   :  { %v983_v30 = vpop.permute.xlu0 %982  ;;  %v981_v32 = vpop.permute.xlu1 %980 }
 0x8d2   :  { %v987_v37 = vadd.f32 %v983_v30, %v967_v58  ;;  %v986_v39 = vadd.f32 %v981_v32, %v966_v59 }
 0x8d5   :  { %v1003_v34 = vpop.permute.xlu0 %1002  ;;  %v1001_v36 = vpop.permute.xlu1 %1000 }
 0x8d6   :  { %v1007_v43 = vadd.f32 %v1003_v34, %v987_v37  ;;  %v1006_v44 = vadd.f32 %v1001_v36, %v986_v39 }
 0x8d9   :  { %v1023_v45 = vpop.permute.xlu0 %1022  ;;  %v1021_v48 = vpop.permute.xlu1 %1020 }
 0x8da   :  { %v1027_v49 = vadd.f32 %v1023_v45, %v1007_v43  ;;  %v1026_v50 = vadd.f32 %v1021_v48, %v1006_v44 }
 0x8dc   :  { %v1035_v51 = vadd.f32 %v1033_v1, %v1027_v49  ;;  %v1034_v52 = vadd.f32 %v1032_v60, %v1026_v50 }
 0x8dd   :  { %v1051_v53 = vpop.permute.xlu0 %1050  ;;  %v1049_v54 = vpop.permute.xlu1 %1048 }
 0x8de   :  { %v1055_v56 = vadd.f32 %v1051_v53, %v1035_v51  ;;  %v1054_v57 = vadd.f32 %v1049_v54, %v1034_v52 }
 0x8e1   :  { %v1071_v55 = vpop.permute.xlu0 %1070  ;;  %v1069_v23 = vpop.permute.xlu1 %1068 }
 0x8e2   :  { %v1075_v61 = vadd.f32 %v1071_v55, %v1055_v56  ;;  %v1074_v3 = vadd.f32 %v1069_v23, %v1054_v57 }
 0x8e5   :  { %v1091_v27 = vpop.permute.xlu0 %1090  ;;  %v1089_v62 = vpop.permute.xlu1 %1088 }
 0x8e6   :  { %v1095_v58 = vadd.f32 %v1091_v27, %v1075_v61  ;;  %v1094_v59 = vadd.f32 %v1089_v62, %v1074_v3 }
 0x8e8   :  { %v1097_v63 = vmul.f32 %v1095_v58, %v1095_v58  ;;  %v1096_v5 = vmul.f32 %v1094_v59, %v1094_v59 }
 0x8ea   :  { %1102 = vrot.lane.b32.xlu0 %v1097_v63, %s3162_s5  ;;  %1100 = vrot.lane.b32.xlu1 %v1096_v5, %s3162_s5 }
 0x8ee   :  { %1110 = vrot.lane.b32.xlu0 %v1097_v63, %s3163_s23  ;;  %1108 = vrot.lane.b32.xlu1 %v1096_v5, %s3163_s23 }
 0x8f2   :  { %1118 = vrot.lane.b32.xlu0 %v1097_v63, %s3164_s24  ;;  %1116 = vrot.lane.b32.xlu1 %v1096_v5, %s3164_s24 }
 0x95c   :  { %v1103_v1 = vpop.permute.xlu0 %1102  ;;  %v1101_v60 = vpop.permute.xlu1 %1100 }
 0x95d   :  { %v1107_v10 = vadd.f32 %v1103_v1, %v1097_v63  ;;  %v1106_v11 = vadd.f32 %v1101_v60, %v1096_v5 }
 0x960   :  { %v1111_v0 = vpop.permute.xlu0 %1110  ;;  %v1109_v7 = vpop.permute.xlu1 %1108 }
 0x961   :  { %v1115_v8 = vadd.f32 %v1111_v0, %v1107_v10  ;;  %v1114_v12 = vadd.f32 %v1109_v7, %v1106_v11 }
 0x964   :  { %v1119_v15 = vpop.permute.xlu0 %1118  ;;  %v1117_v16 = vpop.permute.xlu1 %1116 }
 0x965   :  { %v1123_v9 = vadd.f32 %v1119_v15, %v1115_v8  ;;  %v1122_v2 = vadd.f32 %v1117_v16, %v1114_v12 }
 0x967   :  { %1128 = vrot.lane.b32.xlu0 %v1123_v9, %s3165_s25  ;;  %1126 = vrot.lane.b32.xlu1 %v1122_v2, %s3165_s25 }
 0x96b   :  { %1134 = vrot.lane.b32.xlu0 %v1123_v9, %s3166_s2  ;;  %1132 = vrot.lane.b32.xlu1 %v1122_v2, %s3166_s2 }
 0x96f   :  { %1140 = vrot.lane.b32.xlu0 %v1123_v9, %s3167_s26  ;;  %1138 = vrot.lane.b32.xlu1 %v1122_v2, %s3167_s26 }
 0x9d9   :  { %v1129_v18 = vpop.permute.xlu0 %1128  ;;  %v1127_v19 = vpop.permute.xlu1 %1126 }
 0x9da   :  { %v1145_v22 = vsel %vm153_vm2, %v1123_v9, %v1129_v18  ;;  %v1144_v28 = vsel %vm153_vm2, %v1122_v2, %v1127_v19 }
 0x9dd   :  { %v1135_v20 = vpop.permute.xlu0 %1134  ;;  %v1133_v21 = vpop.permute.xlu1 %1132 }
 0x9de   :  { %v1147_v30 = vsel %vm61_vm0, %v1145_v22, %v1135_v20  ;;  %v1146_v32 = vsel %vm61_vm0, %v1144_v28, %v1133_v21 }
 0x9e1   :  { %v1141_v34 = vpop.permute.xlu0 %1140  ;;  %v1139_v36 = vpop.permute.xlu1 %1138 }
 0x9e2   :  { %v1149_v37 = vsel %vm543_vm3, %v1147_v30, %v1141_v34  ;;  %v1148_v39 = vsel %vm543_vm3, %v1146_v32, %v1139_v36 }
 0x9e3   :  { %v1151_v43 = vadd.f32 1.0, %v1149_v37  ;;  %v1150_v44 = vadd.f32 1.0, %v1148_v39  ;;  %v1159_v45 = vadd.f32 1e-09, %v1149_v37  ;;  %v1158_v48 = vadd.f32 1e-09, %v1148_v39 }
 0x9e5   :  { %3088 = vrcp.f32 %v1151_v43 }
 0x9e6   :  { %3090 = vrcp.f32 %v1150_v44 }
 0x9e7   :  { %3092 = vrsqrt.f32 %v1159_v45 }
 0x9e8   :  { %3094 = vrsqrt.f32 %v1158_v48 }
 0x9ef   :  { %v3089_v49 = vpop.eup %3088 }
 0x9f0   :  { %v1155_v50 = vmul.f32 %v3089_v49, %v1149_v37  ;;  %v3091_v51 = vpop.eup %3090 }
 0x9f1   :  { %v1153_v53 = vmul.f32 %v3091_v51, %v1148_v39  ;;  %v3093_v54 = vpop.eup %3092 }
 0x9f2   :  { %v1157_v52 = vmul.f32 %v1155_v50, %v1095_v58  ;;  %v3095_v56 = vpop.eup %3094 }
 0x9f3   :  { %v1156_v23 = vmul.f32 %v1153_v53, %v1094_v59 }
 0x9f4   :  { %v1163_v55 = vmul.f32 %v3093_v54, %v1157_v52 }
 0x9f5   :  { %v1162_v57 = vmul.f32 %v3095_v56, %v1156_v23 }
 0x9f6   :  { %1204 = vrot.lane.b32.xlu0 %v1163_v55, %s3160_s19  ;;  %v1165_v61 = vmul.f32 %v1163_v55, %v3365_v17  ;;  %v1338_v3 = vmul.f32 %v1163_v55, %v3367_v4 }
 0x9f7   :  { %1202 = vrot.lane.b32.xlu1 %v1162_v57, %s3160_s19  ;;  %v1164_v27 = vmul.f32 %v1162_v57, %v3357_v13  ;;  %v1337_v58 = vmul.f32 %v1162_v57, %v3359_v14 }
 0x9f8   :  { %v1167_v62 = vsel %vm562_vm4, %v1165_v61, 0.0  ;;  %v1340_v63 = vsel %vm562_vm4, %v1338_v3, 0.0 }
 0x9f9   :  { %v1166_v59 = vsel %vm562_vm4, %v1164_v27, 0.0  ;;  %v1339_v5 = vsel %vm562_vm4, %v1337_v58, 0.0 }
 0x9fa   :  { %1249 = vrot.lane.b32.xlu0 %v1163_v55, %s3159_s6  ;;  %v1168_v1 = vadd.f32 %v1167_v62, %v1166_v59  ;;  %v1341_v60 = vadd.f32 %v1340_v63, %v1339_v5 }
 0x9fb   :  { %1247 = vrot.lane.b32.xlu1 %v1162_v57, %s3159_s6 }
 0x9fc   :  { %v1169_v0 = vrot.slane %v1168_v1, 4  ;;  %v1342_v7 = vrot.slane %v1341_v60, 4 }
 0x9fe   :  { %1294 = vrot.lane.b32.xlu0 %v1163_v55, %s3161_s20  ;;  %v1170_v10 = vadd.f32 %v1169_v0, %v1168_v1  ;;  %v1343_v11 = vadd.f32 %v1342_v7, %v1341_v60 }
 0x9ff   :  { %1292 = vrot.lane.b32.xlu1 %v1162_v57, %s3161_s20 }
 0xa00   :  { %v1171_v8 = vrot.slane %v1170_v10, 2  ;;  %v1344_v12 = vrot.slane %v1343_v11, 2 }
 0xa02   :  { %v1172_v15 = vadd.f32 %v1171_v8, %v1170_v10  ;;  %v1345_v16 = vadd.f32 %v1344_v12, %v1343_v11 }
 0xa04   :  { %v1173_v9 = vrot.slane %v1172_v15, 1  ;;  %v1346_v18 = vrot.slane %v1345_v16, 1 }
 0xa06   :  { %v1174_v2 = vadd.f32 %v1173_v9, %v1172_v15  ;;  %v1347_v19 = vadd.f32 %v1346_v18, %v1345_v16 }
 0xa08   :  { %1185 = vrot.lane.b32.xlu1 %v1174_v2, %s3163_s23  ;;  %1179 = vrot.lane.b32.xlu0 %v1174_v2, %s3162_s5  ;;  %v1348_v20 = vsel %vm153_vm2, %v1347_v19, 0.0  ;;  %v1175_v21 = vsel %vm153_vm2, %v1174_v2, 0.0 }
 0xa0c   :  { %1191 = vrot.lane.b32.xlu1 %v1174_v2, %s3164_s24  ;;  %1352 = vrot.lane.b32.xlu0 %v1347_v19, %s3162_s5 }
 0xa10   :  { %1358 = vrot.lane.b32.xlu1 %v1347_v19, %s3163_s23  ;;  %1364 = vrot.lane.b32.xlu0 %v1347_v19, %s3164_s24 }
 0xa2f   :  { %1349 = vadd.xlane.f32.xlu0 %v1348_v20 }
 0xa34   :  { %1176 = vadd.xlane.f32.xlu1 %v1175_v21 }
 0xa68   :  { %v1205_v22 = vpop.permute.xlu0 %1204 }
 0xa69   :  { %v1209_v28 = vmul.f32 %v1205_v22, %v3365_v17  ;;  %v1374_v30 = vmul.f32 %v1205_v22, %v3367_v4  ;;  %v1203_v32 = vpop.permute.xlu1 %1202 }
 0xa6a   :  { %v1208_v37 = vmul.f32 %v1203_v32, %v3357_v13  ;;  %v1373_v39 = vmul.f32 %v1203_v32, %v3359_v14 }
 0xa6b   :  { %v1211_v34 = vsel %vm610_vm5, %v1209_v28, 0.0  ;;  %v1376_v36 = vsel %vm610_vm5, %v1374_v30, 0.0 }
 0xa6c   :  { %v1250_v43 = vpop.permute.xlu0 %1249  ;;  %v1210_v44 = vsel %vm610_vm5, %v1208_v37, 0.0  ;;  %v1375_v45 = vsel %vm610_vm5, %v1373_v39, 0.0  ;;  %vm4198_vm5 = vcmask 1040384  }
 0xa6d   :  { %v1254_v48 = vmul.f32 %v1250_v43, %v3365_v17  ;;  %v1413_v49 = vmul.f32 %v1250_v43, %v3367_v4  ;;  %v1212_v50 = vadd.f32 %v1211_v34, %v1210_v44  ;;  %v1377_v51 = vadd.f32 %v1376_v36, %v1375_v45  ;;  %v1248_v52 = vpop.permute.xlu1 %1247 }
 0xa6e   :  { %v1253_v55 = vmul.f32 %v1248_v52, %v3357_v13  ;;  %v1412_v23 = vmul.f32 %v1248_v52, %v3359_v14 }
 0xa6f   :  { %v1256_v53 = vsel %vm656_vm6, %v1254_v48, 0.0  ;;  %v1415_v54 = vsel %vm656_vm6, %v1413_v49, 0.0  ;;  %v1213_v56 = vrot.slane %v1212_v50, 4  ;;  %v1378_v36 = vrot.slane %v1377_v51, 4 }
 0xa70   :  { %v1295_v57 = vpop.permute.xlu0 %1294  ;;  %v1255_v61 = vsel %vm656_vm6, %v1253_v55, 0.0  ;;  %v1414_v3 = vsel %vm656_vm6, %v1412_v23, 0.0  ;;  %vm4199_vm6 = vcmask 1041408  }
 0xa71   :  { %v1299_v27 = vmul.f32 %v1295_v57, %v3365_v17  ;;  %v1452_v62 = vmul.f32 %v1295_v57, %v3367_v4  ;;  %v1214_v58 = vadd.f32 %v1213_v56, %v1212_v50  ;;  %v1257_v63 = vadd.f32 %v1256_v53, %v1255_v61  ;;  %v1293_v5 = vpop.permute.xlu1 %1292 }
 0xa72   :  { %v1416_v59 = vadd.f32 %v1415_v54, %v1414_v3  ;;  %v1298_v0 = vmul.f32 %v1293_v5, %v3357_v13  ;;  %v1451_v7 = vmul.f32 %v1293_v5, %v3359_v14  ;;  %v1379_v39 = vadd.f32 %v1378_v36, %v1377_v51 }
 0xa73   :  { %v1301_v1 = vsel %vm702_vm7, %v1299_v27, 0.0  ;;  %v1454_v60 = vsel %vm702_vm7, %v1452_v62, 0.0  ;;  %v1215_v10 = vrot.slane %v1214_v58, 2  ;;  %v1258_v11 = vrot.slane %v1257_v63, 4 }
 0xa74   :  { %v1300_v8 = vsel %vm702_vm7, %v1298_v0, 0.0  ;;  %v1453_v12 = vsel %vm702_vm7, %v1451_v7, 0.0  ;;  %v1417_v43 = vrot.slane %v1416_v59, 4  ;;  %v1380_v45 = vrot.slane %v1379_v39, 2 }
 0xa75   :  { %v1259_v15 = vadd.f32 %v1258_v11, %v1257_v63  ;;  %v1302_v16 = vadd.f32 %v1301_v1, %v1300_v8  ;;  %v1455_v9 = vadd.f32 %v1454_v60, %v1453_v12  ;;  %v1216_v2 = vadd.f32 %v1215_v10, %v1214_v58 }
 0xa76   :  { %v1418_v48 = vadd.f32 %v1417_v43, %v1416_v59  ;;  %v1381_v53 = vadd.f32 %v1380_v45, %v1379_v39  ;;  %vm2078_vm7 = vcmask 785984  }
 0xa77   :  { %v1260_v18 = vrot.slane %v1259_v15, 2  ;;  %v1303_v19 = vrot.slane %v1302_v16, 4  ;;  %v1217_v20 = vrot.slane %v1216_v2, 1  ;;  %v1456_v52 = vrot.slane %v1455_v9, 4 }
 0xa78   :  { %v1419_v50 = vrot.slane %v1418_v48, 2  ;;  %v1382_v54 = vrot.slane %v1381_v53, 1 }
 0xa79   :  { %v1304_v21 = vadd.f32 %v1303_v19, %v1302_v16  ;;  %v1261_v22 = vadd.f32 %v1260_v18, %v1259_v15  ;;  %v1218_v28 = vadd.f32 %v1217_v20, %v1216_v2  ;;  %v1457_v51 = vadd.f32 %v1456_v52, %v1455_v9 }
 0xa7a   :  { %v1420_v55 = vadd.f32 %v1419_v50, %v1418_v48  ;;  %v1383_v56 = vadd.f32 %v1382_v54, %v1381_v53  ;;  %v1186_v58 = vpop.permute.xlu1 %1185  ;;  %v1180_v63 = vpop.permute.xlu0 %1179 }
 0xa7b   :  { %v1305_v30 = vrot.slane %v1304_v21, 2  ;;  %v1262_v32 = vrot.slane %v1261_v22, 1  ;;  %1226 = vrot.lane.b32.xlu0 %v1218_v28, %s3168_s27  ;;  %1220 = vrot.lane.b32.xlu1 %v1218_v28, %s3161_s20  ;;  %v1458_v23 = vrot.slane %v1457_v51, 2  ;;  %v1182_v5 = vsel %vm153_vm2, %v1180_v63, 0.0 }
 0xa7c   :  { %v1421_v57 = vrot.slane %v1420_v55, 1  ;;  %v1188_v7 = vsel %vm153_vm2, %v1186_v58, 0.0 }
 0xa7d   :  { %v1263_v34 = vadd.f32 %v1262_v32, %v1261_v22  ;;  %v1306_v37 = vadd.f32 %v1305_v30, %v1304_v21  ;;  %v1459_v3 = vadd.f32 %v1458_v23, %v1457_v51 }
 0xa7e   :  { %v1422_v61 = vadd.f32 %v1421_v57, %v1420_v55  ;;  %v1192_v59 = vpop.permute.xlu1 %1191  ;;  %v1353_v1 = vpop.permute.xlu0 %1352 }
 0xa7f   :  { %1265 = vrot.lane.b32.xlu0 %v1263_v34, %s3159_s6  ;;  %1232 = vrot.lane.b32.xlu1 %v1218_v28, %s3169_s28  ;;  %v1307_v44 = vrot.slane %v1306_v37, 1  ;;  %v1460_v27 = vrot.slane %v1459_v3, 1  ;;  %v1194_v60 = vsel %vm153_vm2, %v1192_v59, 0.0  ;;  %v1355_v11 = vsel %vm153_vm2, %v1353_v1, 0.0 }
 0xa81   :  { %v1308_v49 = vadd.f32 %v1307_v44, %v1306_v37  ;;  %v1461_v62 = vadd.f32 %v1460_v27, %v1459_v3 }
 0xa82   :  { %v1359_v0 = vpop.permute.xlu1 %1358  ;;  %v1365_v8 = vpop.permute.xlu0 %1364 }
 0xa83   :  { %1277 = vrot.lane.b32.xlu0 %v1263_v34, %s3170_s0  ;;  %1271 = vrot.lane.b32.xlu1 %v1263_v34, %s3171_s4  ;;  %v1361_v10 = vsel %vm153_vm2, %v1359_v0, 0.0  ;;  %v1367_v12 = vsel %vm153_vm2, %v1365_v8, 0.0 }
 0xa87   :  { %1316 = vrot.lane.b32.xlu0 %v1308_v49, %s3167_s26  ;;  %1238 = vrot.lane.b32.xlu1 %v1218_v28, %s3172_s29 }
 0xa8b   :  { %1283 = vrot.lane.b32.xlu0 %v1263_v34, %s4196_s30  ;;  %1310 = vrot.lane.b32.xlu1 %v1308_v49, %s3160_s19 }
 0xa8f   :  { %1328 = vrot.lane.b32.xlu0 %v1308_v49, %s3165_s25  ;;  %1322 = vrot.lane.b32.xlu1 %v1308_v49, %s3166_s2 }
 0xa93   :  { %1385 = vrot.lane.b32.xlu0 %v1383_v56, %s3161_s20  ;;  %1391 = vrot.lane.b32.xlu1 %v1383_v56, %s3168_s27 }
 0xa97   :  { %1424 = vrot.lane.b32.xlu0 %v1422_v61, %s3159_s6  ;;  %1397 = vrot.lane.b32.xlu1 %v1383_v56, %s3169_s28 }
 0xa9b   :  { %1403 = vrot.lane.b32.xlu0 %v1383_v56, %s3172_s29  ;;  %1430 = vrot.lane.b32.xlu1 %v1422_v61, %s3171_s4 }
 0xa9f   :  { %1463 = vrot.lane.b32.xlu0 %v1461_v62, %s3160_s19  ;;  %1436 = vrot.lane.b32.xlu1 %v1422_v61, %s3170_s0 }
 0xaa3   :  { %1442 = vrot.lane.b32.xlu0 %v1422_v61, %s4196_s30  ;;  %1469 = vrot.lane.b32.xlu1 %v1461_v62, %s3167_s26 }
 0xaa7   :  { %1481 = vrot.lane.b32.xlu0 %v1461_v62, %s3165_s25  ;;  %1475 = vrot.lane.b32.xlu1 %v1461_v62, %s3166_s2 }
 0xabc   :  { %v3709_v15 = vpop.xlane.xlu0 %1349 }
 0xac1   :  { %v3711_v16 = vpop.xlane.xlu1 %1176 }
 0xac6   :  { %1183 = vadd.xlane.f32.xlu0 %v1182_v5 }
 0xaca   :  { %1195 = vadd.xlane.f32.xlu0 %v1194_v60 }
 0xacb   :  { %1189 = vadd.xlane.f32.xlu1 %v1188_v7 }
 0xace   :  { %1362 = vadd.xlane.f32.xlu0 %v1361_v10 }
 0xacf   :  { %1356 = vadd.xlane.f32.xlu1 %v1355_v11 }
 0xad3   :  { %1368 = vadd.xlane.f32.xlu1 %v1367_v12 }
 0xaed   :  { %v1227_v9 = vpop.permute.xlu0 %1226  ;;  %v1221_v2 = vpop.permute.xlu1 %1220 }
 0xaee   :  { %v1229_v18 = vsel %vm153_vm2, %v1227_v9, 0.0  ;;  %v1223_v19 = vsel %vm153_vm2, %v1221_v2, 0.0 }
 0xaef   :  { %1230 = vadd.xlane.f32.xlu0 %v1229_v18  ;;  %1224 = vadd.xlane.f32.xlu1 %v1223_v19 }
 0xaf1   :  { %v1266_v20 = vpop.permute.xlu0 %1265  ;;  %v1233_v21 = vpop.permute.xlu1 %1232 }
 0xaf2   :  { %v1268_v22 = vsel %vm153_vm2, %v1266_v20, 0.0  ;;  %v1235_v28 = vsel %vm153_vm2, %v1233_v21, 0.0 }
 0xaf3   :  { %1269 = vadd.xlane.f32.xlu1 %v1268_v22  ;;  %1236 = vadd.xlane.f32.xlu0 %v1235_v28 }
 0xaf5   :  { %v1278_v30 = vpop.permute.xlu0 %1277  ;;  %v1272_v32 = vpop.permute.xlu1 %1271 }
 0xaf6   :  { %v1274_v34 = vsel %vm153_vm2, %v1272_v32, 0.0  ;;  %v1280_v39 = vsel %vm153_vm2, %v1278_v30, 0.0 }
 0xaf7   :  { %1275 = vadd.xlane.f32.xlu0 %v1274_v34 }
 0xaf9   :  { %v1317_v36 = vpop.permute.xlu0 %1316  ;;  %v1239_v37 = vpop.permute.xlu1 %1238 }
 0xafa   :  { %v1241_v43 = vsel %vm153_vm2, %v1239_v37, 0.0  ;;  %v1319_v48 = vsel %vm153_vm2, %v1317_v36, 0.0 }
 0xafb   :  { %1281 = vadd.xlane.f32.xlu0 %v1280_v39  ;;  %1242 = vadd.xlane.f32.xlu1 %v1241_v43 }
 0xafd   :  { %v1284_v44 = vpop.permute.xlu0 %1283  ;;  %v1311_v45 = vpop.permute.xlu1 %1310 }
 0xafe   :  { %v1313_v49 = vsel %vm153_vm2, %v1311_v45, 0.0  ;;  %v1286_v53 = vsel %vm153_vm2, %v1284_v44, 0.0 }
 0xaff   :  { %1320 = vadd.xlane.f32.xlu0 %v1319_v48  ;;  %1314 = vadd.xlane.f32.xlu1 %v1313_v49 }
 0xb01   :  { %v1329_v50 = vpop.permute.xlu0 %1328  ;;  %v1323_v52 = vpop.permute.xlu1 %1322 }
 0xb02   :  { %v1325_v51 = vsel %vm153_vm2, %v1323_v52, 0.0  ;;  %v1331_v23 = vsel %vm153_vm2, %v1329_v50, 0.0 }
 0xb03   :  { %1287 = vadd.xlane.f32.xlu0 %v1286_v53  ;;  %1326 = vadd.xlane.f32.xlu1 %v1325_v51 }
 0xb05   :  { %v1386_v54 = vpop.permute.xlu0 %1385  ;;  %v1392_v55 = vpop.permute.xlu1 %1391 }
 0xb06   :  { %v1394_v56 = vsel %vm153_vm2, %v1392_v55, 0.0  ;;  %v1388_v3 = vsel %vm153_vm2, %v1386_v54, 0.0 }
 0xb07   :  { %1332 = vadd.xlane.f32.xlu1 %v1331_v23  ;;  %1395 = vadd.xlane.f32.xlu0 %v1394_v56 }
 0xb09   :  { %v1425_v57 = vpop.permute.xlu0 %1424  ;;  %v1398_v61 = vpop.permute.xlu1 %1397 }
 0xb0a   :  { %v1400_v27 = vsel %vm153_vm2, %v1398_v61, 0.0  ;;  %v1427_v63 = vsel %vm153_vm2, %v1425_v57, 0.0 }
 0xb0b   :  { %1389 = vadd.xlane.f32.xlu1 %v1388_v3  ;;  %1401 = vadd.xlane.f32.xlu0 %v1400_v27 }
 0xb0d   :  { %v1404_v62 = vpop.permute.xlu0 %1403  ;;  %v1431_v58 = vpop.permute.xlu1 %1430 }
 0xb0e   :  { %v1433_v59 = vsel %vm153_vm2, %v1431_v58, 0.0  ;;  %v1406_v60 = vsel %vm153_vm2, %v1404_v62, 0.0 }
 0xb0f   :  { %1428 = vadd.xlane.f32.xlu1 %v1427_v63  ;;  %1434 = vadd.xlane.f32.xlu0 %v1433_v59 }
 0xb11   :  { %v1464_v5 = vpop.permute.xlu0 %1463  ;;  %v1437_v1 = vpop.permute.xlu1 %1436 }
 0xb12   :  { %v1439_v0 = vsel %vm153_vm2, %v1437_v1, 0.0  ;;  %v1466_v11 = vsel %vm153_vm2, %v1464_v5, 0.0 }
 0xb13   :  { %1407 = vadd.xlane.f32.xlu1 %v1406_v60  ;;  %1440 = vadd.xlane.f32.xlu0 %v1439_v0 }
 0xb15   :  { %v1443_v7 = vpop.permute.xlu0 %1442  ;;  %v1470_v10 = vpop.permute.xlu1 %1469 }
 0xb16   :  { %v1472_v8 = vsel %vm153_vm2, %v1470_v10, 0.0  ;;  %v1445_v9 = vsel %vm153_vm2, %v1443_v7, 0.0 }
 0xb17   :  { %1467 = vadd.xlane.f32.xlu1 %v1466_v11  ;;  %1473 = vadd.xlane.f32.xlu0 %v1472_v8 }
 0xb19   :  { %v1476_v12 = vpop.permute.xlu1 %1475  ;;  %v1482_v18 = vpop.permute.xlu0 %1481 }
 0xb1a   :  { %v1478_v2 = vsel %vm153_vm2, %v1476_v12, 0.0  ;;  %v1484_v19 = vsel %vm153_vm2, %v1482_v18, 0.0 }
 0xb1b   :  { %1446 = vadd.xlane.f32.xlu1 %v1445_v9  ;;  %1479 = vadd.xlane.f32.xlu0 %v1478_v2 }
 0xb1f   :  { %1485 = vadd.xlane.f32.xlu1 %v1484_v19 }
 0xb53   :  { %v1184_v20 = vpop.xlane.xlu0 %1183 }
 0xb54   :  { %v1197_v60 = vsel %vm594_vm8, %v3711_v16, %v1184_v20 }
 0xb57   :  { %v1196_v22 = vpop.xlane.xlu0 %1195 }
 0xb58   :  { %v1190_v21 = vpop.xlane.xlu1 %1189 }
 0xb59   :  { %v1198_v10 = vsel %vm596_vm9, %v1197_v60, %v1190_v21 }
 0xb5b   :  { %v1363_v30 = vpop.xlane.xlu0 %1362 }
 0xb5c   :  { %v1357_v28 = vpop.xlane.xlu1 %1356 }
 0xb5d   :  { %v1370_v11 = vsel %vm594_vm8, %v3709_v15, %v1357_v28 }
 0xb5e   :  { %v1371_v16 = vsel %vm596_vm9, %v1370_v11, %v1363_v30 }
 0xb60   :  { %v1369_v32 = vpop.xlane.xlu1 %1368 }
 0xb61   :  { %v1372_v21 = vsel %vm598_vm10, %v1371_v16, %v1369_v32 }
 0xb62   :  { %v1500_v30 = vrot.slane %v1372_v21, 4 }
 0xb7c   :  { %v1231_v34 = vpop.xlane.xlu0 %1230  ;;  %v1225_v36 = vpop.xlane.xlu1 %1224 }
 0xb7d   :  { %v1244_v57 = vsel %vm594_vm8, %v1225_v36, %v1231_v34  ;;  %v1199_v34 = vsel %vm598_vm10, %v1198_v10, %v1196_v22 }
 0xb80   :  { %v1237_v37 = vpop.xlane.xlu0 %1236  ;;  %v1270_v39 = vpop.xlane.xlu1 %1269 }
 0xb81   :  { %v1245_v61 = vsel %vm596_vm9, %v1244_v57, %v1237_v37 }
 0xb84   :  { %v1276_v43 = vpop.xlane.xlu0 %1275 }
 0xb85   :  { %v1289_v3 = vsel %vm594_vm8, %v1270_v39, %v1276_v43 }
 0xb88   :  { %v1282_v44 = vpop.xlane.xlu0 %1281  ;;  %v1243_v45 = vpop.xlane.xlu1 %1242 }
 0xb89   :  { %v1290_v58 = vsel %vm596_vm9, %v1289_v3, %v1282_v44  ;;  %v1246_v63 = vsel %vm598_vm10, %v1245_v61, %v1243_v45 }
 0xb8a   :  { %v1491_v8 = vrot.slane %v1246_v63, 7 }
 0xb8c   :  { %v1321_v48 = vpop.xlane.xlu0 %1320  ;;  %v1315_v49 = vpop.xlane.xlu1 %1314  ;;  %v1511_v37 = vsel %vm4198_vm5, %v1199_v34, %v1491_v8 }
 0xb8d   :  { %v1334_v59 = vsel %vm594_vm8, %v1315_v49, %v1321_v48 }
 0xb90   :  { %v1288_v50 = vpop.xlane.xlu0 %1287  ;;  %v1327_v52 = vpop.xlane.xlu1 %1326 }
 0xb91   :  { %v1291_v5 = vsel %vm598_vm10, %v1290_v58, %v1288_v50  ;;  %v1335_v1 = vsel %vm596_vm9, %v1334_v59, %v1327_v52 }
 0xb92   :  { %v1494_v2 = vrot.slane %v1291_v5, 6 }
 0xb94   :  { %v1396_v53 = vpop.xlane.xlu0 %1395  ;;  %v1333_v51 = vpop.xlane.xlu1 %1332  ;;  %v1512_v39 = vsel %vm4199_vm6, %v1511_v37, %v1494_v2 }
 0xb95   :  { %v1336_v0 = vsel %vm598_vm10, %v1335_v1, %v1333_v51 }
 0xb96   :  { %v1497_v18 = vrot.slane %v1336_v0, 5 }
 0xb98   :  { %v1402_v54 = vpop.xlane.xlu0 %1401  ;;  %v1390_v55 = vpop.xlane.xlu1 %1389  ;;  %v1513_v22 = vsel %vm918_vm13, %v1512_v39, %v1497_v18 }
 0xb99   :  { %v1409_v7 = vsel %vm594_vm8, %v1390_v55, %v1396_v53  ;;  %v1514_v52 = vsel %vm920_vm14, %v1513_v22, %v1500_v30  ;;  %vm4203_vm14 = vmmov %vm4198_vm5 }
 0xb9a   :  { %v1410_v19 = vsel %vm596_vm9, %v1409_v7, %v1402_v54 }
 0xb9c   :  { %v1435_v23 = vpop.xlane.xlu0 %1434  ;;  %v1429_v56 = vpop.xlane.xlu1 %1428 }
 0xb9d   :  { %v1448_v20 = vsel %vm594_vm8, %v1429_v56, %v1435_v23 }
 0xba0   :  { %v1441_v27 = vpop.xlane.xlu0 %1440  ;;  %v1408_v62 = vpop.xlane.xlu1 %1407 }
 0xba1   :  { %v1411_v36 = vsel %vm598_vm10, %v1410_v19, %v1408_v62  ;;  %v1449_v15 = vsel %vm596_vm9, %v1448_v20, %v1441_v27 }
 0xba2   :  { %v1503_v45 = vrot.slane %v1411_v36, 3 }
 0xba4   :  { %v1474_v12 = vpop.xlane.xlu0 %1473  ;;  %v1468_v9 = vpop.xlane.xlu1 %1467  ;;  %v1515_v51 = vsel %vm922_vm15, %v1514_v52, %v1503_v45  ;;  %vm4204_vm15 = vmmov %vm4199_vm6 }
 0xba5   :  { %v1487_v48 = vsel %vm594_vm8, %v1468_v9, %v1474_v12 }
 0xba8   :  { %v1447_v28 = vpop.xlane.xlu1 %1446  ;;  %v1480_v43 = vpop.xlane.xlu0 %1479 }
 0xba9   :  { %v1450_v44 = vsel %vm598_vm10, %v1449_v15, %v1447_v28  ;;  %v1488_v50 = vsel %vm596_vm9, %v1487_v48, %v1480_v43 }
 0xbaa   :  { %v1506_v49 = vrot.slane %v1450_v44, 2 }
 0xbac   :  { %v1486_v32 = vpop.xlane.xlu1 %1485  ;;  %v1516_v55 = vsel %vm924_vm11, %v1515_v51, %v1506_v49  ;;  %vm4202_vm11 = vmmov %vm4199_vm6 }
 0xbad   :  { %v1489_v53 = vsel %vm598_vm10, %v1488_v50, %v1486_v32 }
 0xbae   :  { %v1509_v54 = vrot.slane %v1489_v53, 1 }
 0xbb0   :  { %v1517_v23 = vsel %vm926_vm12, %v1516_v55, %v1509_v54  ;;  %vm2123_vm12 = vcmask 19456  }
 0xbb1   :  { %v1518_v56 = vmul.f32 0.0625, %v1517_v23 }
 0xbb3   :  { %v1519_v57 = vadd.f32 %v1518_v56, %v3558_v29 }
 0xbb5   :  { %v1520_v61 = vsel %vm351_vm1, %v1519_v57, -inf }
 0xbb6   :  { %1521 = vmax.xlane.f32.xlu0 %v1520_v61 }
 0xc43   :  { %v1522_v3 = vpop.xlane.xlu0 %1521 }
 0xc44   :  { %v1523_v27 = vsub.f32 %v1519_v57, %v1522_v3 }
 0xc46   :  { %v1524_v62 = vmul.f32 1.442695, %v1523_v27 }
 0xc48   :  { %3096 = vpow2.f32 %v1524_v62 }
 0xc52   :  { %v3097_v58 = vpop.eup %3096 }
 0xc53   :  { %v1526_v63 = vsel %vm351_vm1, %v3097_v58, 0.0  ;;  %vm2000_vm1 = vcmask 392384  }
 0xc54   :  { %1527 = vadd.xlane.f32.xlu1 %v1526_v63 }
 0xce1   :  { %v1528_v59 = vpop.xlane.xlu1 %1527 }
 0xce2   :  { %3098 = vrcp.f32 %v1528_v59 }
 0xcec   :  { %v3099_v5 = vpop.eup %3098 }
 0xced   :  { %v1530_v1 = vmul.f32 %v3099_v5, %v3097_v58 }
 0xcef   :  { %1537 = vperm.xlu1 %3059, %v1530_v1   ;;  %1533 = vperm.xlu0 %3058, %v1530_v1  }
 0xcf3   :  { %3060 = vset.pattern.permute.xlu1 %v3176_v46  ;;  %3063 = vset.pattern.permute.xlu0 %v3174_v40 }
 0xcf4   :  { %1541 = vperm.xlu1 %3060, %v1530_v1  }
 0xcf8   :  { %3061 = vset.pattern.permute.xlu1 %v3177_v47 }
 0xcf9   :  { %1545 = vperm.xlu1 %3061, %v1530_v1  }
 0xcfd   :  { %3062 = vset.pattern.permute.xlu1 %v3175_v42 }
 0xd6e   :  { %v1538_v29 = vpop.permute.xlu1 %1537  ;;  %v1534_v0 = vpop.permute.xlu0 %1533 }
 0xd6f   :  { %v1548_v7 = vsel %vm153_vm2, %v1534_v0, %v1538_v29 }
 0xd73   :  { %v1542_v60 = vpop.permute.xlu1 %1541 }
 0xd74   :  { %v1549_v10 = vsel %vm61_vm0, %v1548_v7, %v1542_v60 }
 0xd78   :  { %v1546_v11 = vpop.permute.xlu1 %1545 }
 0xd79   :  { %v1550_v8 = vsel %vm543_vm3, %v1549_v10, %v1546_v11 }
 0xd7a   :  { %v1668_v12 = vrot.slane %v1550_v8, %v3339_v35  ;;  %v1560_v9 = vrot.slane %v1550_v8, %v3311_v25  ;;  %v1554_v2 = vrot.slane %v1550_v8, %v3390_v38  ;;  %v1620_v47 = vrot.slane %v1550_v8, %v3396_v41 }
 0xd7b   :  { %v1580_v35 = vrot.slane %v1550_v8, %v3308_v24  ;;  %v1600_v20 = vrot.slane %v1550_v8, %v3314_v26  ;;  %v1628_v41 = vrot.slane %v1550_v8, %v3326_v31  ;;  %v1648_v36 = vrot.slane %v1550_v8, %v3333_v33 }
 0xd7c   :  { %1670 = vrot.lane.b32.xlu0 %v1668_v12, %s3161_s20  ;;  %1562 = vrot.lane.b32.xlu1 %v1560_v9, %s3160_s19  ;;  %v1556_v18 = vmul.f32 %v1554_v2, %v3365_v17  ;;  %v1555_v19 = vmul.f32 %v1554_v2, %v3357_v13  ;;  %v1622_v34 = vmul.f32 %v1620_v47, %v3367_v4 }
 0xd7d   :  { %v1621_v16 = vmul.f32 %v1620_v47, %v3359_v14 }
 0xd80   :  { %1582 = vrot.lane.b32.xlu1 %v1580_v35, %s3159_s6 }
 0xd84   :  { %1602 = vrot.lane.b32.xlu1 %v1600_v20, %s3161_s20 }
 0xd88   :  { %1630 = vrot.lane.b32.xlu1 %v1628_v41, %s3160_s19 }
 0xd8c   :  { %1650 = vrot.lane.b32.xlu1 %v1648_v36, %s3159_s6 }
 0xdee   :  { %v1563_v21 = vpop.permute.xlu1 %1562  ;;  %v1671_v50 = vpop.permute.xlu0 %1670 }
 0xdef   :  { %v1565_v37 = vmul.f32 %v1563_v21, %v3357_v13  ;;  %v1566_v15 = vmul.f32 %v1563_v21, %v3365_v17  ;;  %v1674_v32 = vmul.f32 %v1671_v50, %v3367_v4 }
 0xdf1   :  { %1571 = vrot.lane.b32.xlu0 %v1566_v15, %s3161_s20  ;;  %1569 = vrot.lane.b32.xlu1 %v1565_v37, %s3161_s20  ;;  %v1753_v15 = vld [vmem:[%s4185_s7] sm:$0xff] }
 0xdf2   :  { %v1583_v28 = vpop.permute.xlu1 %1582 }
 0xdf3   :  { %v1585_v39 = vmul.f32 %v1583_v28, %v3357_v13  ;;  %v1586_v31 = vmul.f32 %v1583_v28, %v3365_v17  ;;  %v1754_v28 = vld [vmem:[%s4185_s7 + $0x8] sm:$0xff] }
 0xdf5   :  { %1591 = vrot.lane.b32.xlu0 %v1586_v31, %s3159_s6  ;;  %1589 = vrot.lane.b32.xlu1 %v1585_v39, %s3159_s6  ;;  %v3010_v39 = vpack.c.bf16 %v1754_v28, %v1753_v15  ;;  %v1755_v31 = vld [vmem:[%s4185_s7 + $0x10] sm:$0xff] }
 0xdf6   :  { %v1603_v33 = vpop.permute.xlu1 %1602 }
 0xdf7   :  { %v1605_v43 = vmul.f32 %v1603_v33, %v3357_v13  ;;  %v1606_v44 = vmul.f32 %v1603_v33, %v3365_v17  ;;  %v1673_v17 = vmul.f32 %v1671_v50, %v3359_v14  ;;  %3011 = vmatprep.subr.bf16.mxu0 %v3010_v39  ;;  %v1756_v33 = vld [vmem:[%s4185_s7 + $0x18] sm:$0xff]  ;;  %s4200_s7 = smov 40  }
 0xdf8   :  { %3013 = vmatpush3.bf16.msra.mxu0 %v3010_v39 }
 0xdf9   :  { %1611 = vrot.lane.b32.xlu0 %v1606_v44, %s3160_s19  ;;  %1609 = vrot.lane.b32.xlu1 %v1605_v43, %s3160_s19  ;;  %v3014_v43 = vpack.c.bf16 %v1756_v33, %v1755_v31  ;;  %v1838_v44 = vsel %vm598_vm10, 1.0, %v3158_v6  ;;  %vm4201_vm10 = vmmov %vm4198_vm5 }
 0xdfa   :  { %v1631_v22 = vpop.permute.xlu1 %1630 }
 0xdfb   :  { %v1633_v45 = vmul.f32 %v1631_v22, %v3359_v14  ;;  %v1634_v30 = vmul.f32 %v1631_v22, %v3367_v4  ;;  %3015 = vmatprep.subr.bf16.mxu0 %v3014_v43 }
 0xdfc   :  { %3017 = vmatpush3.bf16.msra.mxu0 %v3014_v43 }
 0xdfd   :  { %1639 = vrot.lane.b32.xlu0 %v1634_v30, %s3161_s20  ;;  %1637 = vrot.lane.b32.xlu1 %v1633_v45, %s3161_s20 }
 0xdfe   :  { %v1651_v48 = vpop.permute.xlu1 %1650 }
 0xdff   :  { %v1653_v49 = vmul.f32 %v1651_v48, %v3359_v14  ;;  %v1654_v13 = vmul.f32 %v1651_v48, %v3367_v4 }
 0xe01   :  { %1659 = vrot.lane.b32.xlu0 %v1654_v13, %s3159_s6  ;;  %1657 = vrot.lane.b32.xlu1 %v1653_v49, %s3159_s6 }
 0xe05   :  { %1679 = vrot.lane.b32.xlu0 %v1674_v32, %s3160_s19  ;;  %1677 = vrot.lane.b32.xlu1 %v1673_v17, %s3160_s19 }
 0xe63   :  { %v1572_v52 = vpop.permute.xlu0 %1571  ;;  %v1570_v53 = vpop.permute.xlu1 %1569 }
 0xe64   :  { %v1576_v55 = vadd.f32 %v1572_v52, %v1556_v18  ;;  %v1575_v23 = vadd.f32 %v1570_v53, %v1555_v19 }
 0xe67   :  { %v1592_v51 = vpop.permute.xlu0 %1591  ;;  %v1590_v54 = vpop.permute.xlu1 %1589 }
 0xe68   :  { %v1596_v56 = vadd.f32 %v1592_v51, %v1576_v55  ;;  %v1595_v57 = vadd.f32 %v1590_v54, %v1575_v23 }
 0xe6b   :  { %v1612_v61 = vpop.permute.xlu0 %1611  ;;  %v1610_v3 = vpop.permute.xlu1 %1609 }
 0xe6c   :  { %v1616_v27 = vadd.f32 %v1612_v61, %v1596_v56  ;;  %v1615_v62 = vadd.f32 %v1610_v3, %v1595_v57 }
 0xe6e   :  { %v1624_v58 = vadd.f32 %v1622_v34, %v1616_v27  ;;  %v1623_v14 = vadd.f32 %v1621_v16, %v1615_v62 }
 0xe6f   :  { %v1640_v63 = vpop.permute.xlu0 %1639  ;;  %v1638_v4 = vpop.permute.xlu1 %1637 }
 0xe70   :  { %v1644_v1 = vadd.f32 %v1640_v63, %v1624_v58  ;;  %v1643_v29 = vadd.f32 %v1638_v4, %v1623_v14 }
 0xe73   :  { %v1660_v59 = vpop.permute.xlu0 %1659  ;;  %v1658_v5 = vpop.permute.xlu1 %1657 }
 0xe74   :  { %v1664_v60 = vadd.f32 %v1660_v59, %v1644_v1  ;;  %v1663_v0 = vadd.f32 %v1658_v5, %v1643_v29 }
 0xe77   :  { %v1680_v7 = vpop.permute.xlu0 %1679  ;;  %v1678_v10 = vpop.permute.xlu1 %1677 }
 0xe78   :  { %v3822_v11 = vadd.f32 %v1680_v7, %v1664_v60  ;;  %v3824_v8 = vadd.f32 %v1678_v10, %v1663_v0 }
 0xe7a   :  { %v1686_v12 = vmul.f32 %v3822_v11, %v3822_v11  ;;  %v1685_v9 = vmul.f32 %v3824_v8, %v3824_v8 }
 0xe7c   :  { %1691 = vrot.lane.b32.xlu0 %v1686_v12, %s3162_s5  ;;  %1689 = vrot.lane.b32.xlu1 %v1685_v9, %s3162_s5 }
 0xe80   :  { %1699 = vrot.lane.b32.xlu0 %v1686_v12, %s3163_s23  ;;  %1697 = vrot.lane.b32.xlu1 %v1685_v9, %s3163_s23 }
 0xe84   :  { %1707 = vrot.lane.b32.xlu0 %v1686_v12, %s3164_s24  ;;  %1705 = vrot.lane.b32.xlu1 %v1685_v9, %s3164_s24 }
 0xeee   :  { %v1692_v2 = vpop.permute.xlu0 %1691  ;;  %v1690_v47 = vpop.permute.xlu1 %1689 }
 0xeef   :  { %v1696_v34 = vadd.f32 %v1692_v2, %v1686_v12  ;;  %v1695_v16 = vadd.f32 %v1690_v47, %v1685_v9 }
 0xef2   :  { %v1700_v18 = vpop.permute.xlu0 %1699  ;;  %v1698_v19 = vpop.permute.xlu1 %1697 }
 0xef3   :  { %v1704_v35 = vadd.f32 %v1700_v18, %v1696_v34  ;;  %v1703_v20 = vadd.f32 %v1698_v19, %v1695_v16 }
 0xef6   :  { %v1708_v41 = vpop.permute.xlu0 %1707  ;;  %v1706_v36 = vpop.permute.xlu1 %1705 }
 0xef7   :  { %v1712_v21 = vadd.f32 %v1708_v41, %v1704_v35  ;;  %v1711_v37 = vadd.f32 %v1706_v36, %v1703_v20 }
 0xef9   :  { %1717 = vrot.lane.b32.xlu0 %v1712_v21, %s3165_s25  ;;  %1715 = vrot.lane.b32.xlu1 %v1711_v37, %s3165_s25 }
 0xefd   :  { %1723 = vrot.lane.b32.xlu0 %v1712_v21, %s3166_s2  ;;  %1721 = vrot.lane.b32.xlu1 %v1711_v37, %s3166_s2 }
 0xf01   :  { %1729 = vrot.lane.b32.xlu0 %v1712_v21, %s3167_s26  ;;  %1727 = vrot.lane.b32.xlu1 %v1711_v37, %s3167_s26 }
 0xf25   :  { %1839 = vadd.xlane.f32.xlu1 %v1838_v44 }
 0xf6b   :  { %v1718_v22 = vpop.permute.xlu0 %1717  ;;  %v1716_v45 = vpop.permute.xlu1 %1715 }
 0xf6c   :  { %v1734_v49 = vsel %vm153_vm2, %v1712_v21, %v1718_v22  ;;  %v1733_v13 = vsel %vm153_vm2, %v1711_v37, %v1716_v45 }
 0xf6f   :  { %v1724_v30 = vpop.permute.xlu0 %1723  ;;  %v1722_v48 = vpop.permute.xlu1 %1721 }
 0xf70   :  { %v1736_v50 = vsel %vm61_vm0, %v1734_v49, %v1724_v30  ;;  %v1735_v17 = vsel %vm61_vm0, %v1733_v13, %v1722_v48 }
 0xf73   :  { %v1730_v32 = vpop.permute.xlu0 %1729  ;;  %v1728_v52 = vpop.permute.xlu1 %1727 }
 0xf74   :  { %v1738_v53 = vsel %vm543_vm3, %v1736_v50, %v1730_v32  ;;  %v1737_v51 = vsel %vm543_vm3, %v1735_v17, %v1728_v52 }
 0xf75   :  { %v1740_v54 = vadd.f32 1.0, %v1738_v53  ;;  %v1739_v55 = vadd.f32 1.0, %v1737_v51  ;;  %v1748_v23 = vadd.f32 1e-09, %v1738_v53  ;;  %v1747_v56 = vadd.f32 1e-09, %v1737_v51 }
 0xf77   :  { %3100 = vrcp.f32 %v1740_v54 }
 0xf78   :  { %3102 = vrcp.f32 %v1739_v55 }
 0xf79   :  { %3104 = vrsqrt.f32 %v1748_v23 }
 0xf7a   :  { %3106 = vrsqrt.f32 %v1747_v56 }
 0xf81   :  { %v3101_v57 = vpop.eup %3100 }
 0xf82   :  { %v1744_v61 = vmul.f32 %v3101_v57, %v1738_v53  ;;  %v3103_v3 = vpop.eup %3102 }
 0xf83   :  { %v1742_v62 = vmul.f32 %v3103_v3, %v1737_v51  ;;  %v3105_v58 = vpop.eup %3104 }
 0xf84   :  { %v1746_v27 = vmul.f32 %v1744_v61, %v3822_v11  ;;  %v3107_v63 = vpop.eup %3106 }
 0xf85   :  { %v1745_v14 = vmul.f32 %v1742_v62, %v3824_v8 }
 0xf86   :  { %v1752_v4 = vmul.f32 %v3105_v58, %v1746_v27 }
 0xf87   :  { %v1751_v59 = vmul.f32 %v3107_v63, %v1745_v14 }
 0xf89   :  { %2974 = vmatprep.mubr.msk.f32.mxu0 %vm562_vm4, %v1751_v59 }
 0xf8a   :  { %2975 = vmatmul.mubr.msk.f32.vlgmr.msra.gmra.mrb[2].mxu0 %vm562_vm4, %v1752_v4  ;;  %vm2039_vm4 = vcmask 589184  }
 0xfb2   :  { %v1840_v5 = vpop.xlane.xlu1 %1839 }
 0xfb3   :  { %3108 = vrcp.f32 %v1840_v5 }
 0xfbd   :  { %v3109_v1 = vpop.eup %3108 }
 0xfbe   :  { %v1852_v29 = vrot.slane %v3109_v1, %v3311_v25  ;;  %v1872_v60 = vrot.slane %v3109_v1, %v3308_v24  ;;  %v1892_v0 = vrot.slane %v3109_v1, %v3314_v26  ;;  %v1846_v10 = vrot.slane %v3109_v1, %v3390_v38 }
 0xfc0   :  { %1854 = vrot.lane.b32.xlu0 %v1852_v29, %s3167_s26 }
 0xfc4   :  { %1874 = vrot.lane.b32.xlu0 %v1872_v60, %s3170_s0 }
 0xfc8   :  { %1894 = vrot.lane.b32.xlu0 %v1892_v0, %s3172_s29 }
0x1032   :  { %v1855_v7 = vpop.permute.xlu0 %1854 }
0x1036   :  { %v1875_v47 = vpop.permute.xlu0 %1874 }
0x103a   :  { %v1895_v16 = vpop.permute.xlu0 %1894 }
0x105d   :  { %v3873_v11 = vpop.f32.mrb[2].mxu0 }
0x105e   :  { %v3875_v8 = vpop.f32.mrb[3].mxu0  ;;  %v1858_v12 = vmul.f32 %v3873_v11, %v1855_v7  ;;  %v1848_v9 = vmul.f32 %v3873_v11, %v1846_v10  ;;  %v1878_v18 = vmul.f32 %v3873_v11, %v1875_v47  ;;  %v1898_v20 = vmul.f32 %v3873_v11, %v1895_v16 }
0x105f   :  { %v1847_v2 = vmul.f32 %v1846_v10, %v3875_v8  ;;  %v1857_v19 = vmul.f32 %v1855_v7, %v3875_v8  ;;  %v1877_v34 = vmul.f32 %v1875_v47, %v3875_v8  ;;  %v1897_v35 = vmul.f32 %v1895_v16, %v3875_v8 }
0x1060   :  { %1863 = vrot.lane.b32.xlu0 %v1858_v12, %s3164_s24 }
0x1064   :  { %1883 = vrot.lane.b32.xlu0 %v1878_v18, %s3169_s28 }
0x1068   :  { %1861 = vrot.lane.b32.xlu0 %v1857_v19, %s3164_s24 }
0x106c   :  { %1881 = vrot.lane.b32.xlu0 %v1877_v34, %s3169_s28 }
0x1070   :  { %1901 = vrot.lane.b32.xlu0 %v1897_v35, %s3171_s4 }
0x1074   :  { %1903 = vrot.lane.b32.xlu0 %v1898_v20, %s3171_s4 }
0x10d2   :  { %v1864_v41 = vpop.permute.xlu0 %1863 }
0x10d3   :  { %v1868_v31 = vadd.f32 %v1864_v41, %v1848_v9 }
0x10d6   :  { %v1884_v36 = vpop.permute.xlu0 %1883 }
0x10d7   :  { %v1888_v43 = vadd.f32 %v1884_v36, %v1868_v31 }
0x10da   :  { %v1862_v21 = vpop.permute.xlu0 %1861 }
0x10db   :  { %v1867_v15 = vadd.f32 %v1862_v21, %v1847_v2 }
0x10de   :  { %v1882_v37 = vpop.permute.xlu0 %1881 }
0x10df   :  { %v1887_v28 = vadd.f32 %v1882_v37, %v1867_v15 }
0x10e2   :  { %v1902_v39 = vpop.permute.xlu0 %1901 }
0x10e3   :  { %v1907_v33 = vadd.f32 %v1902_v39, %v1887_v28 }
0x10e5   :  { %v1909_v44 = vmul.f32 %v1907_v33, %v1907_v33 }
0x10e6   :  { %v1904_v22 = vpop.permute.xlu0 %1903 }
0x10e7   :  { %v1908_v45 = vadd.f32 %v1904_v22, %v1888_v43  ;;  %1913 = vrot.lane.b32.xlu1 %v1909_v44, %s3162_s5 }
0x10e9   :  { %v1910_v30 = vmul.f32 %v1908_v45, %v1908_v45 }
0x10eb   :  { %1915 = vrot.lane.b32.xlu0 %v1910_v30, %s3162_s5 }
0x10ef   :  { %1921 = vrot.lane.b32.xlu0 %v1909_v44, %s3163_s23 }
0x10f3   :  { %1923 = vrot.lane.b32.xlu0 %v1910_v30, %s3163_s23 }
0x1159   :  { %v1914_v48 = vpop.permute.xlu1 %1913 }
0x115a   :  { %v1919_v13 = vadd.f32 %v1914_v48, %v1909_v44 }
0x115d   :  { %v1916_v49 = vpop.permute.xlu0 %1915 }
0x115e   :  { %v1920_v32 = vadd.f32 %v1916_v49, %v1910_v30 }
0x1161   :  { %v1922_v50 = vpop.permute.xlu0 %1921 }
0x1162   :  { %v1927_v17 = vadd.f32 %v1922_v50, %v1919_v13 }
0x1164   :  { %1931 = vrot.lane.b32.xlu0 %v1927_v17, %s3165_s25 }
0x1165   :  { %v1924_v52 = vpop.permute.xlu0 %1923 }
0x1166   :  { %v1928_v53 = vadd.f32 %v1924_v52, %v1920_v32 }
0x1168   :  { %1933 = vrot.lane.b32.xlu1 %v1928_v53, %s3165_s25  ;;  %1937 = vrot.lane.b32.xlu0 %v1927_v17, %s3166_s2 }
0x116c   :  { %1939 = vrot.lane.b32.xlu1 %v1928_v53, %s3166_s2 }
0x11d6   :  { %v1932_v51 = vpop.permute.xlu0 %1931 }
0x11d7   :  { %v1943_v54 = vsel %vm153_vm2, %v1927_v17, %v1932_v51 }
0x11da   :  { %v1938_v55 = vpop.permute.xlu0 %1937  ;;  %v1934_v23 = vpop.permute.xlu1 %1933 }
0x11db   :  { %v1945_v56 = vsel %vm61_vm0, %v1943_v54, %v1938_v55  ;;  %v1944_v3 = vsel %vm153_vm2, %v1928_v53, %v1934_v23 }
0x11dc   :  { %v1947_v57 = vadd.f32 1.0, %v1945_v56  ;;  %v1955_v61 = vadd.f32 1e-09, %v1945_v56 }
0x11de   :  { %3110 = vrcp.f32 %v1947_v57  ;;  %v1940_v27 = vpop.permute.xlu1 %1939 }
0x11df   :  { %v1946_v62 = vsel %vm61_vm0, %v1944_v3, %v1940_v27  ;;  %3112 = vrsqrt.f32 %v1955_v61 }
0x11e0   :  { %v1948_v58 = vadd.f32 1.0, %v1946_v62  ;;  %v1956_v14 = vadd.f32 1e-09, %v1946_v62 }
0x11e2   :  { %3114 = vrcp.f32 %v1948_v58 }
0x11e3   :  { %3116 = vrsqrt.f32 %v1956_v14 }
0x11e8   :  { %v3111_v63 = vpop.eup %3110 }
0x11e9   :  { %v1950_v4 = vmul.f32 %v3111_v63, %v1945_v56  ;;  %v3113_v59 = vpop.eup %3112 }
0x11eb   :  { %v1953_v5 = vmul.f32 %v1950_v4, %v1907_v33 }
0x11ec   :  { %v3115_v1 = vpop.eup %3114 }
0x11ed   :  { %v1952_v29 = vmul.f32 %v3115_v1, %v1946_v62  ;;  %v1959_v60 = vmul.f32 %v3113_v59, %v1953_v5  ;;  %v3117_v7 = vpop.eup %3116 }
0x11ef   :  { %v1954_v0 = vmul.f32 %v1952_v29, %v1908_v45  ;;  %1992 = vrot.lane.b32.xlu0 %v1959_v60, %s3167_s26  ;;  %v1961_v10 = vmul.f32 %v1959_v60, %v3875_v8 }
0x11f1   :  { %v1960_v12 = vmul.f32 %v3117_v7, %v1954_v0  ;;  %v1963_v2 = vsel %vm543_vm3, %v1961_v10, 0.0 }
0x11f3   :  { %2031 = vrot.lane.b32.xlu0 %v1959_v60, %s3170_s0  ;;  %1994 = vrot.lane.b32.xlu1 %v1960_v12, %s3167_s26  ;;  %v1962_v9 = vmul.f32 %v3873_v11, %v1960_v12 }
0x11f5   :  { %v1964_v47 = vsel %vm543_vm3, %v1962_v9, 0.0 }
0x11f6   :  { %v1965_v18 = vadd.f32 %v1964_v47, %v1963_v2 }
0x11f7   :  { %2070 = vrot.lane.b32.xlu0 %v1959_v60, %s3172_s29  ;;  %2033 = vrot.lane.b32.xlu1 %v1960_v12, %s3170_s0 }
0x11f8   :  { %v1966_v19 = vrot.slane %v1965_v18, 4 }
0x11fa   :  { %v1967_v34 = vadd.f32 %v1966_v19, %v1965_v18 }
0x11fb   :  { %2072 = vrot.lane.b32.xlu1 %v1960_v12, %s3172_s29 }
0x11fc   :  { %v1968_v16 = vrot.slane %v1967_v34, 2 }
0x11fe   :  { %v1969_v35 = vadd.f32 %v1968_v16, %v1967_v34 }
0x1200   :  { %v1970_v20 = vrot.slane %v1969_v35, 1 }
0x1202   :  { %v1971_v41 = vadd.f32 %v1970_v20, %v1969_v35 }
0x1204   :  { %1976 = vrot.lane.b32.xlu1 %v1971_v41, %s3162_s5  ;;  %v1972_v7 = vsel %vm153_vm2, %v1971_v41, 0.0 }
0x1261   :  { %v1993_v36 = vpop.permute.xlu0 %1992 }
0x1262   :  { %v1998_v21 = vmul.f32 %v1993_v36, %v3875_v8 }
0x1264   :  { %v2001_v39 = vsel %vm2000_vm1, %v1998_v21, 0.0 }
0x1265   :  { %v2032_v37 = vpop.permute.xlu0 %2031  ;;  %v1995_v15 = vpop.permute.xlu1 %1994 }
0x1266   :  { %v1999_v28 = vmul.f32 %v3873_v11, %v1995_v15  ;;  %v2037_v31 = vmul.f32 %v2032_v37, %v3875_v8 }
0x1268   :  { %v2002_v33 = vsel %vm2000_vm1, %v1999_v28, 0.0  ;;  %v2040_v48 = vsel %vm2039_vm4, %v2037_v31, 0.0 }
0x1269   :  { %v2003_v43 = vadd.f32 %v2002_v33, %v2001_v39  ;;  %v2071_v44 = vpop.permute.xlu0 %2070  ;;  %v2034_v22 = vpop.permute.xlu1 %2033 }
0x126a   :  { %v2038_v45 = vmul.f32 %v3873_v11, %v2034_v22  ;;  %v2076_v49 = vmul.f32 %v2071_v44, %v3875_v8 }
0x126b   :  { %v2004_v30 = vrot.slane %v2003_v43, 4 }
0x126c   :  { %v2041_v13 = vsel %vm2039_vm4, %v2038_v45, 0.0  ;;  %v2079_v54 = vsel %vm2078_vm7, %v2076_v49, 0.0 }
0x126d   :  { %v2005_v50 = vadd.f32 %v2004_v30, %v2003_v43  ;;  %v2042_v17 = vadd.f32 %v2041_v13, %v2040_v48  ;;  %v2073_v32 = vpop.permute.xlu1 %2072 }
0x126e   :  { %v2077_v52 = vmul.f32 %v3873_v11, %v2073_v32 }
0x126f   :  { %v2006_v53 = vrot.slane %v2005_v50, 2  ;;  %v2043_v51 = vrot.slane %v2042_v17, 4 }
0x1270   :  { %v2080_v55 = vsel %vm2078_vm7, %v2077_v52, 0.0 }
0x1271   :  { %v2007_v23 = vadd.f32 %v2006_v53, %v2005_v50  ;;  %v2044_v56 = vadd.f32 %v2043_v51, %v2042_v17  ;;  %v2081_v57 = vadd.f32 %v2080_v55, %v2079_v54 }
0x1273   :  { %v2045_v61 = vrot.slane %v2044_v56, 2  ;;  %v2082_v3 = vrot.slane %v2081_v57, 4  ;;  %v2008_v27 = vrot.slane %v2007_v23, 1 }
0x1275   :  { %v2046_v62 = vadd.f32 %v2045_v61, %v2044_v56  ;;  %v2083_v58 = vadd.f32 %v2082_v3, %v2081_v57  ;;  %v2009_v14 = vadd.f32 %v2008_v27, %v2007_v23 }
0x1276   :  { %v1977_v60 = vpop.permute.xlu1 %1976 }
0x1277   :  { %v2084_v63 = vrot.slane %v2083_v58, 2  ;;  %2011 = vrot.lane.b32.xlu0 %v2009_v14, %s3164_s24  ;;  %2017 = vrot.lane.b32.xlu1 %v2009_v14, %s3161_s20  ;;  %v2047_v4 = vrot.slane %v2046_v62, 1  ;;  %v1979_v0 = vsel %vm153_vm2, %v1977_v60, 0.0 }
0x1279   :  { %v2085_v59 = vadd.f32 %v2084_v63, %v2083_v58  ;;  %v2048_v5 = vadd.f32 %v2047_v4, %v2046_v62 }
0x127b   :  { %2023 = vrot.lane.b32.xlu0 %v2009_v14, %s3168_s27  ;;  %2050 = vrot.lane.b32.xlu1 %v2048_v5, %s3169_s28  ;;  %v2086_v1 = vrot.slane %v2085_v59, 1 }
0x127d   :  { %v2087_v29 = vadd.f32 %v2086_v1, %v2085_v59 }
0x127f   :  { %2056 = vrot.lane.b32.xlu0 %v2048_v5, %s3172_s29  ;;  %2089 = vrot.lane.b32.xlu1 %v2087_v29, %s3171_s4 }
0x1283   :  { %2062 = vrot.lane.b32.xlu0 %v2048_v5, %s3159_s6  ;;  %1982 = vrot.lane.b32.xlu1 %v1971_v41, %s3163_s23 }
0x1287   :  { %2095 = vrot.lane.b32.xlu0 %v2087_v29, %s3170_s0 }
0x128b   :  { %2101 = vrot.lane.b32.xlu0 %v2087_v29, %s4200_s7 }
0x12a7   :  { %1980 = vadd.xlane.f32.xlu1 %v1979_v0 }
0x12aa   :  { %1973 = vadd.xlane.f32.xlu0 %v1972_v7 }
0x12e9   :  { %v2012_v10 = vpop.permute.xlu0 %2011  ;;  %v2018_v12 = vpop.permute.xlu1 %2017 }
0x12ea   :  { %v2014_v9 = vsel %vm153_vm2, %v2012_v10, 0.0  ;;  %v2020_v2 = vsel %vm153_vm2, %v2018_v12, 0.0 }
0x12eb   :  { %2015 = vadd.xlane.f32.xlu1 %v2014_v9  ;;  %2021 = vadd.xlane.f32.xlu0 %v2020_v2 }
0x12ed   :  { %v2024_v47 = vpop.permute.xlu0 %2023  ;;  %v2051_v18 = vpop.permute.xlu1 %2050 }
0x12ee   :  { %v2026_v19 = vsel %vm153_vm2, %v2024_v47, 0.0  ;;  %v2053_v20 = vsel %vm153_vm2, %v2051_v18, 0.0 }
0x12ef   :  { %2027 = vadd.xlane.f32.xlu0 %v2026_v19 }
0x12f1   :  { %v2057_v34 = vpop.permute.xlu0 %2056  ;;  %v2090_v16 = vpop.permute.xlu1 %2089 }
0x12f2   :  { %v2059_v35 = vsel %vm153_vm2, %v2057_v34, 0.0  ;;  %v2092_v21 = vsel %vm153_vm2, %v2090_v16, 0.0 }
0x12f3   :  { %2060 = vadd.xlane.f32.xlu1 %v2059_v35  ;;  %2054 = vadd.xlane.f32.xlu0 %v2053_v20 }
0x12f5   :  { %v2063_v41 = vpop.permute.xlu0 %2062  ;;  %v1983_v37 = vpop.permute.xlu1 %1982 }
0x12f6   :  { %v2065_v36 = vsel %vm153_vm2, %v2063_v41, 0.0  ;;  %v1985_v28 = vsel %vm153_vm2, %v1983_v37, 0.0 }
0x12f7   :  { %2093 = vadd.xlane.f32.xlu1 %v2092_v21  ;;  %2066 = vadd.xlane.f32.xlu0 %v2065_v36 }
0x12f9   :  { %v2096_v15 = vpop.permute.xlu0 %2095 }
0x12fa   :  { %v2098_v39 = vsel %vm153_vm2, %v2096_v15, 0.0 }
0x12fb   :  { %1986 = vadd.xlane.f32.xlu1 %v1985_v28  ;;  %2099 = vadd.xlane.f32.xlu0 %v2098_v39 }
0x12fd   :  { %v2102_v31 = vpop.permute.xlu0 %2101 }
0x12fe   :  { %v2104_v33 = vsel %vm153_vm2, %v2102_v31, 0.0 }
0x12ff   :  { %2105 = vadd.xlane.f32.xlu0 %v2104_v33 }
0x1334   :  { %v1981_v44 = vpop.xlane.xlu1 %1980 }
0x1337   :  { %v1974_v43 = vpop.xlane.xlu0 %1973 }
0x1338   :  { %v1988_v52 = vsel %vm594_vm8, %v1974_v43, %v1981_v44 }
0x1378   :  { %v2022_v22 = vpop.xlane.xlu0 %2021  ;;  %v2016_v45 = vpop.xlane.xlu1 %2015 }
0x1379   :  { %v2029_v17 = vsel %vm594_vm8, %v2016_v45, %v2022_v22 }
0x137c   :  { %v2028_v30 = vpop.xlane.xlu0 %2027 }
0x137d   :  { %v2030_v32 = vsel %vm596_vm9, %v2029_v17, %v2028_v30 }
0x137e   :  { %v2110_v23 = vrot.slane %v2030_v32, 7 }
0x1380   :  { %v2061_v48 = vpop.xlane.xlu1 %2060  ;;  %v2055_v49 = vpop.xlane.xlu0 %2054 }
0x1381   :  { %v2068_v54 = vsel %vm594_vm8, %v2055_v49, %v2061_v48 }
0x1384   :  { %v2094_v13 = vpop.xlane.xlu1 %2093  ;;  %v2067_v50 = vpop.xlane.xlu0 %2066 }
0x1385   :  { %v2069_v56 = vsel %vm596_vm9, %v2068_v54, %v2067_v50 }
0x1386   :  { %v2113_v27 = vrot.slane %v2069_v56, 6 }
0x1388   :  { %v1987_v53 = vpop.xlane.xlu1 %1986  ;;  %v2100_v51 = vpop.xlane.xlu0 %2099 }
0x1389   :  { %v1989_v55 = vsel %vm596_vm9, %v1988_v52, %v1987_v53  ;;  %v2107_v61 = vsel %vm594_vm8, %v2094_v13, %v2100_v51 }
0x138a   :  { %v2118_v57 = vsel %vm4201_vm10, %v1989_v55, %v2110_v23  ;;  %vm2860_vm10 = vcmask 122880  }
0x138b   :  { %v2119_v14 = vsel %vm4202_vm11, %v2118_v57, %v2113_v27 }
0x138c   :  { %v2106_v3 = vpop.xlane.xlu0 %2105 }
0x138d   :  { %v2108_v62 = vsel %vm596_vm9, %v2107_v61, %v2106_v3 }
0x138e   :  { %v2116_v58 = vrot.slane %v2108_v62, 5 }
0x1390   :  { %v2120_v63 = vsel %vm918_vm13, %v2119_v14, %v2116_v58 }
0x1391   :  { %v3959_v4 = vmul.f32 0.0625, %v2120_v63 }
0x1393   :  { %v2124_v59 = vsel %vm2123_vm12, %v3959_v4, -inf }
0x1394   :  { %2125 = vmax.xlane.f32.xlu1 %v2124_v59 }
0x1421   :  { %v2126_v5 = vpop.xlane.xlu1 %2125 }
0x1422   :  { %v2127_v1 = vsub.f32 %v3959_v4, %v2126_v5 }
0x1424   :  { %v2128_v29 = vmul.f32 1.442695, %v2127_v1 }
0x1426   :  { %3118 = vpow2.f32 %v2128_v29 }
0x1430   :  { %v3119_v60 = vpop.eup %3118 }
0x1431   :  { %v2130_v0 = vsel %vm2123_vm12, %v3119_v60, 0.0 }
0x1432   :  { %2131 = vadd.xlane.f32.xlu0 %v2130_v0 }
0x14bf   :  { %v2132_v7 = vpop.xlane.xlu0 %2131 }
0x14c0   :  { %3120 = vrcp.f32 %v2132_v7 }
0x14ca   :  { %v3121_v10 = vpop.eup %3120 }
0x14cb   :  { %v2134_v12 = vmul.f32 %v3121_v10, %v3119_v60 }
0x14cd   :  { %2141 = vperm.xlu0 %3063, %v2134_v12   ;;  %2137 = vperm.xlu1 %3062, %v2134_v12  }
0x14d1   :  { %3064 = vset.pattern.permute.xlu1 %v3176_v46  ;;  %3065 = vset.pattern.permute.xlu0 %v3175_v42 }
0x14d2   :  { %2145 = vperm.xlu1 %3064, %v2134_v12  }
0x14d6   :  { %3066 = vset.pattern.permute.xlu1 %v3174_v40 }
0x154c   :  { %v2138_v9 = vpop.permute.xlu1 %2137  ;;  %v2142_v2 = vpop.permute.xlu0 %2141 }
0x154d   :  { %v2148_v47 = vsel %vm153_vm2, %v2138_v9, %v2142_v2 }
0x1551   :  { %v2146_v18 = vpop.permute.xlu1 %2145 }
0x1552   :  { %v2149_v19 = vsel %vm61_vm0, %v2148_v47, %v2146_v18 }
0x1553   :  { %v2159_v34 = vrot.slane %v2149_v19, %v3311_v25  ;;  %v2153_v16 = vrot.slane %v2149_v19, %v3390_v38  ;;  %v2179_v20 = vrot.slane %v2149_v19, %v3308_v24  ;;  %v2199_v40 = vrot.slane %v2149_v19, %v3314_v26 }
0x1555   :  { %2161 = vrot.lane.b32.xlu1 %v2159_v34, %s3167_s26  ;;  %v2154_v35 = vmul.f32 %v2153_v16, %v3875_v8  ;;  %v2155_v42 = vmul.f32 %v3873_v11, %v2153_v16 }
0x1559   :  { %2181 = vrot.lane.b32.xlu1 %v2179_v20, %s3170_s0 }
0x155d   :  { %2201 = vrot.lane.b32.xlu1 %v2199_v40, %s3172_s29 }
0x15c7   :  { %v2162_v41 = vpop.permute.xlu1 %2161 }
0x15c8   :  { %v2164_v36 = vmul.f32 %v2162_v41, %v3875_v8  ;;  %v2165_v37 = vmul.f32 %v3873_v11, %v2162_v41 }
0x15ca   :  { %2168 = vrot.lane.b32.xlu1 %v2164_v36, %s3164_s24 }
0x15cb   :  { %v2182_v21 = vpop.permute.xlu1 %2181 }
0x15cc   :  { %v2184_v28 = vmul.f32 %v2182_v21, %v3875_v8  ;;  %v2185_v31 = vmul.f32 %v3873_v11, %v2182_v21 }
0x15ce   :  { %2170 = vrot.lane.b32.xlu1 %v2165_v37, %s3164_s24 }
0x15cf   :  { %v2202_v15 = vpop.permute.xlu1 %2201 }
0x15d0   :  { %v2204_v39 = vmul.f32 %v2202_v15, %v3875_v8  ;;  %v2205_v33 = vmul.f32 %v3873_v11, %v2202_v15 }
0x15d2   :  { %2188 = vrot.lane.b32.xlu1 %v2184_v28, %s3169_s28  ;;  %2208 = vrot.lane.b32.xlu0 %v2204_v39, %s3171_s4 }
0x15d6   :  { %2190 = vrot.lane.b32.xlu1 %v2185_v31, %s3169_s28 }
0x15da   :  { %2210 = vrot.lane.b32.xlu1 %v2205_v33, %s3171_s4 }
0x163c   :  { %v2169_v43 = vpop.permute.xlu1 %2168 }
0x163d   :  { %v2174_v22 = vadd.f32 %v2169_v43, %v2154_v35 }
0x1640   :  { %v2171_v44 = vpop.permute.xlu1 %2170 }
0x1641   :  { %v2175_v50 = vadd.f32 %v2171_v44, %v2155_v42 }
0x1644   :  { %v2189_v45 = vpop.permute.xlu1 %2188  ;;  %v2209_v48 = vpop.permute.xlu0 %2208 }
0x1645   :  { %v2194_v30 = vadd.f32 %v2189_v45, %v2174_v22 }
0x1647   :  { %v2214_v49 = vadd.f32 %v2209_v48, %v2194_v30 }
0x1648   :  { %v2191_v13 = vpop.permute.xlu1 %2190 }
0x1649   :  { %v2216_v17 = vmul.f32 %v2214_v49, %v2214_v49  ;;  %v2195_v32 = vadd.f32 %v2191_v13, %v2175_v50 }
0x164b   :  { %2220 = vrot.lane.b32.xlu0 %v2216_v17, %s3162_s5 }
0x164c   :  { %v2211_v52 = vpop.permute.xlu1 %2210 }
0x164d   :  { %v2215_v53 = vadd.f32 %v2211_v52, %v2195_v32 }
0x164f   :  { %v2217_v51 = vmul.f32 %v2215_v53, %v2215_v53  ;;  %2228 = vrot.lane.b32.xlu0 %v2216_v17, %s3163_s23 }
0x1651   :  { %2222 = vrot.lane.b32.xlu1 %v2217_v51, %s3162_s5 }
0x1655   :  { %2230 = vrot.lane.b32.xlu1 %v2217_v51, %s3163_s23 }
0x16bd   :  { %v2221_v54 = vpop.permute.xlu0 %2220 }
0x16be   :  { %v2226_v55 = vadd.f32 %v2221_v54, %v2216_v17 }
0x16c1   :  { %v2229_v23 = vpop.permute.xlu0 %2228 }
0x16c2   :  { %v2234_v56 = vadd.f32 %v2229_v23, %v2226_v55 }
0x16c3   :  { %v2223_v57 = vpop.permute.xlu1 %2222 }
0x16c4   :  { %2238 = vrot.lane.b32.xlu0 %v2234_v56, %s3165_s25  ;;  %v2227_v61 = vadd.f32 %v2223_v57, %v2217_v51 }
0x16c7   :  { %v2231_v3 = vpop.permute.xlu1 %2230 }
0x16c8   :  { %v2235_v27 = vadd.f32 %v2231_v3, %v2227_v61  ;;  %2244 = vrot.lane.b32.xlu0 %v2234_v56, %s3166_s2 }
0x16ca   :  { %2240 = vrot.lane.b32.xlu1 %v2235_v27, %s3165_s25 }
0x16ce   :  { %2246 = vrot.lane.b32.xlu1 %v2235_v27, %s3166_s2 }
0x1736   :  { %v2239_v62 = vpop.permute.xlu0 %2238 }
0x1737   :  { %v2250_v58 = vsel %vm153_vm2, %v2234_v56, %v2239_v62 }
0x173a   :  { %v2245_v14 = vpop.permute.xlu0 %2244 }
0x173b   :  { %v2252_v63 = vsel %vm61_vm0, %v2250_v58, %v2245_v14 }
0x173c   :  { %v2254_v59 = vadd.f32 1.0, %v2252_v63  ;;  %v2241_v5 = vpop.permute.xlu1 %2240  ;;  %v2262_v1 = vadd.f32 1e-09, %v2252_v63 }
0x173d   :  { %v2251_v29 = vsel %vm153_vm2, %v2235_v27, %v2241_v5 }
0x173e   :  { %3122 = vrcp.f32 %v2254_v59 }
0x173f   :  { %3124 = vrsqrt.f32 %v2262_v1 }
0x1740   :  { %v2247_v60 = vpop.permute.xlu1 %2246 }
0x1741   :  { %v2253_v0 = vsel %vm61_vm0, %v2251_v29, %v2247_v60 }
0x1742   :  { %v2255_v7 = vadd.f32 1.0, %v2253_v0  ;;  %v2263_v10 = vadd.f32 1e-09, %v2253_v0 }
0x1744   :  { %3126 = vrcp.f32 %v2255_v7 }
0x1745   :  { %3128 = vrsqrt.f32 %v2263_v10 }
0x1748   :  { %v3123_v12 = vpop.eup %3122 }
0x1749   :  { %v2257_v9 = vmul.f32 %v3123_v12, %v2252_v63  ;;  %v3125_v47 = vpop.eup %3124 }
0x174b   :  { %v2260_v2 = vmul.f32 %v2257_v9, %v2214_v49 }
0x174d   :  { %v2266_v18 = vmul.f32 %v3125_v47, %v2260_v2 }
0x174e   :  { %v3127_v19 = vpop.eup %3126 }
0x174f   :  { %v2259_v34 = vmul.f32 %v3127_v19, %v2253_v0  ;;  %2299 = vrot.lane.b32.xlu1 %v2266_v18, %s3167_s26  ;;  %v3129_v35 = vpop.eup %3128  ;;  %v2268_v42 = vmul.f32 %v2266_v18, %v3875_v8 }
0x1751   :  { %v2261_v16 = vmul.f32 %v2259_v34, %v2215_v53  ;;  %v2270_v41 = vsel %vm543_vm3, %v2268_v42, 0.0 }
0x1753   :  { %2337 = vrot.lane.b32.xlu1 %v2266_v18, %s3170_s0  ;;  %v2267_v20 = vmul.f32 %v3129_v35, %v2261_v16 }
0x1755   :  { %v2269_v40 = vmul.f32 %v3873_v11, %v2267_v20  ;;  %2301 = vrot.lane.b32.xlu0 %v2267_v20, %s3167_s26 }
0x1757   :  { %2375 = vrot.lane.b32.xlu1 %v2266_v18, %s3172_s29  ;;  %v2271_v36 = vsel %vm543_vm3, %v2269_v40, 0.0 }
0x1758   :  { %v2272_v21 = vadd.f32 %v2271_v36, %v2270_v41 }
0x1759   :  { %2339 = vrot.lane.b32.xlu0 %v2267_v20, %s3170_s0 }
0x175a   :  { %v2273_v37 = vrot.slane %v2272_v21, 4 }
0x175c   :  { %v2274_v15 = vadd.f32 %v2273_v37, %v2272_v21 }
0x175d   :  { %2377 = vrot.lane.b32.xlu0 %v2267_v20, %s3172_s29 }
0x175e   :  { %v2275_v28 = vrot.slane %v2274_v15, 2 }
0x1760   :  { %v2276_v39 = vadd.f32 %v2275_v28, %v2274_v15 }
0x1762   :  { %v2277_v31 = vrot.slane %v2276_v39, 1 }
0x1764   :  { %v2278_v33 = vadd.f32 %v2277_v31, %v2276_v39 }
0x1766   :  { %2289 = vrot.lane.b32.xlu0 %v2278_v33, %s3163_s23  ;;  %2283 = vrot.lane.b32.xlu1 %v2278_v33, %s3162_s5  ;;  %v2279_v43 = vsel %vm153_vm2, %v2278_v33, 0.0 }
0x1785   :  { %2280 = vadd.xlane.f32.xlu0 %v2279_v43 }
0x17c1   :  { %v2300_v44 = vpop.permute.xlu1 %2299 }
0x17c2   :  { %v2305_v45 = vmul.f32 %v2300_v44, %v3875_v8 }
0x17c4   :  { %v2307_v49 = vsel %vm2000_vm1, %v2305_v45, 0.0 }
0x17c5   :  { %v2338_v22 = vpop.permute.xlu1 %2337 }
0x17c6   :  { %v2343_v13 = vmul.f32 %v2338_v22, %v3875_v8 }
0x17c7   :  { %v2302_v30 = vpop.permute.xlu0 %2301 }
0x17c8   :  { %v2306_v48 = vmul.f32 %v3873_v11, %v2302_v30  ;;  %v2345_v54 = vsel %vm2039_vm4, %v2343_v13, 0.0 }
0x17c9   :  { %v2376_v32 = vpop.permute.xlu1 %2375 }
0x17ca   :  { %v2308_v50 = vsel %vm2000_vm1, %v2306_v48, 0.0  ;;  %v2381_v55 = vmul.f32 %v2376_v32, %v3875_v8  ;;  %vm3180_vm1 = vmmov 1  }
0x17cb   :  { %v2309_v17 = vadd.f32 %v2308_v50, %v2307_v49  ;;  %v2340_v52 = vpop.permute.xlu0 %2339 }
0x17cc   :  { %v2344_v53 = vmul.f32 %v3873_v11, %v2340_v52  ;;  %v2383_v58 = vsel %vm2078_vm7, %v2381_v55, 0.0 }
0x17cd   :  { %v2310_v51 = vrot.slane %v2309_v17, 4 }
0x17ce   :  { %v2346_v23 = vsel %vm2039_vm4, %v2344_v53, 0.0  ;;  %vm4205_vm4 = vmmov %vm4202_vm11 }
0x17cf   :  { %v2311_v56 = vadd.f32 %v2310_v51, %v2309_v17  ;;  %v2347_v57 = vadd.f32 %v2346_v23, %v2345_v54  ;;  %v2378_v61 = vpop.permute.xlu0 %2377 }
0x17d0   :  { %v2382_v3 = vmul.f32 %v3873_v11, %v2378_v61 }
0x17d1   :  { %v2312_v27 = vrot.slane %v2311_v56, 2  ;;  %v2348_v62 = vrot.slane %v2347_v57, 4 }
0x17d2   :  { %v2384_v14 = vsel %vm2078_vm7, %v2382_v3, 0.0  ;;  %vm3023_vm7 = vmpackc.low %vm4205_vm4, %vm3180_vm1 }
0x17d3   :  { %v2313_v63 = vadd.f32 %v2312_v27, %v2311_v56  ;;  %v2349_v59 = vadd.f32 %v2348_v62, %v2347_v57  ;;  %v2385_v5 = vadd.f32 %v2384_v14, %v2383_v58 }
0x17d5   :  { %v2350_v1 = vrot.slane %v2349_v59, 2  ;;  %v2386_v29 = vrot.slane %v2385_v5, 4  ;;  %v2314_v60 = vrot.slane %v2313_v63, 1 }
0x17d7   :  { %v2351_v0 = vadd.f32 %v2350_v1, %v2349_v59  ;;  %v2387_v7 = vadd.f32 %v2386_v29, %v2385_v5  ;;  %v2315_v10 = vadd.f32 %v2314_v60, %v2313_v63 }
0x17d8   :  { %v2284_v34 = vpop.permute.xlu1 %2283  ;;  %v2290_v35 = vpop.permute.xlu0 %2289 }
0x17d9   :  { %v2388_v12 = vrot.slane %v2387_v7, 2  ;;  %2323 = vrot.lane.b32.xlu1 %v2315_v10, %s3161_s20  ;;  %2317 = vrot.lane.b32.xlu0 %v2315_v10, %s3164_s24  ;;  %v2352_v9 = vrot.slane %v2351_v0, 1  ;;  %v2286_v16 = vsel %vm153_vm2, %v2284_v34, 0.0  ;;  %v2292_v42 = vsel %vm153_vm2, %v2290_v35, 0.0  ;;  %s3146_s20 = scalar_lea.hbm %s4193_s15, 16 }
0x17da   :  { %p3147_p0 = scmp.ne.s32.totalorder %s4193_s15, %s3146_s20  ;;  %p3150_p1 = scmp.lt.u32.totalorder %s3146_s20, %s4193_s15 }
0x17db   :  { %v2389_v2 = vadd.f32 %v2388_v12, %v2387_v7  ;;  %v2353_v47 = vadd.f32 %v2352_v9, %v2351_v0 }
0x17dc   :  { %p3152_p2 = pnand %p3150_p1, %p3147_p0 }
0x17dd   :  { %2329 = vrot.lane.b32.xlu0 %v2315_v10, %s3168_s27  ;;  %2361 = vrot.lane.b32.xlu1 %v2353_v47, %s3172_s29  ;;  %v2390_v18 = vrot.slane %v2389_v2, 1 }
0x17df   :  { %v2391_v19 = vadd.f32 %v2390_v18, %v2389_v2 }
0x17e1   :  { %2355 = vrot.lane.b32.xlu0 %v2353_v47, %s3169_s28  ;;  %2399 = vrot.lane.b32.xlu1 %v2391_v19, %s3170_s0 }
0x17e5   :  { %2367 = vrot.lane.b32.xlu0 %v2353_v47, %s3159_s6 }
0x17e9   :  { %2393 = vrot.lane.b32.xlu0 %v2391_v19, %s3171_s4 }
0x1805   :  { %2287 = vadd.xlane.f32.xlu1 %v2286_v16 }
0x1809   :  { %2293 = vadd.xlane.f32.xlu1 %v2292_v42 }
0x1812   :  { %v2281_v20 = vpop.xlane.xlu0 %2280 }
0x184b   :  { %v2324_v40 = vpop.permute.xlu1 %2323  ;;  %v2318_v41 = vpop.permute.xlu0 %2317 }
0x184c   :  { %v2326_v36 = vsel %vm153_vm2, %v2324_v40, 0.0  ;;  %v2320_v21 = vsel %vm153_vm2, %v2318_v41, 0.0 }
0x184d   :  { %2327 = vadd.xlane.f32.xlu1 %v2326_v36  ;;  %2321 = vadd.xlane.f32.xlu0 %v2320_v21 }
0x184f   :  { %v2330_v37 = vpop.permute.xlu0 %2329  ;;  %v2362_v28 = vpop.permute.xlu1 %2361 }
0x1850   :  { %v2332_v15 = vsel %vm153_vm2, %v2330_v37, 0.0  ;;  %v2364_v31 = vsel %vm153_vm2, %v2362_v28, 0.0 }
0x1851   :  { %2333 = vadd.xlane.f32.xlu1 %v2332_v15 }
0x1853   :  { %v2356_v39 = vpop.permute.xlu0 %2355  ;;  %v2400_v22 = vpop.permute.xlu1 %2399 }
0x1854   :  { %v2358_v33 = vsel %vm153_vm2, %v2356_v39, 0.0  ;;  %v2402_v30 = vsel %vm153_vm2, %v2400_v22, 0.0 }
0x1855   :  { %2365 = vadd.xlane.f32.xlu1 %v2364_v31  ;;  %2359 = vadd.xlane.f32.xlu0 %v2358_v33 }
0x1857   :  { %v2368_v43 = vpop.permute.xlu0 %2367 }
0x1858   :  { %v2370_v44 = vsel %vm153_vm2, %v2368_v43, 0.0 }
0x1859   :  { %2371 = vadd.xlane.f32.xlu1 %v2370_v44 }
0x185b   :  { %v2394_v45 = vpop.permute.xlu0 %2393 }
0x185c   :  { %v2396_v48 = vsel %vm153_vm2, %v2394_v45, 0.0 }
0x185d   :  { %2403 = vadd.xlane.f32.xlu1 %v2402_v30  ;;  %2397 = vadd.xlane.f32.xlu0 %v2396_v48 }
0x1873   :  { %2405 = vrot.lane.b32.xlu0 %v2391_v19, %s4200_s7 }
0x1892   :  { %v2288_v49 = vpop.xlane.xlu1 %2287 }
0x1893   :  { %v2295_v57 = vsel %vm594_vm8, %v2281_v20, %v2288_v49 }
0x1896   :  { %v2294_v13 = vpop.xlane.xlu1 %2293 }
0x1897   :  { %v2296_v3 = vsel %vm596_vm9, %v2295_v57, %v2294_v13 }
0x18da   :  { %v2328_v50 = vpop.xlane.xlu1 %2327  ;;  %v2322_v17 = vpop.xlane.xlu0 %2321 }
0x18db   :  { %v2335_v52 = vsel %vm594_vm8, %v2322_v17, %v2328_v50 }
0x18de   :  { %v2334_v32 = vpop.xlane.xlu1 %2333 }
0x18df   :  { %v2336_v53 = vsel %vm596_vm9, %v2335_v52, %v2334_v32 }
0x18e0   :  { %v2414_v55 = vrot.slane %v2336_v53, 7 }
0x18e2   :  { %v2366_v51 = vpop.xlane.xlu1 %2365  ;;  %v2360_v54 = vpop.xlane.xlu0 %2359  ;;  %v2422_v62 = vsel %vm4203_vm14, %v2296_v3, %v2414_v55 }
0x18e3   :  { %v2373_v23 = vsel %vm594_vm8, %v2360_v54, %v2366_v51 }
0x18e6   :  { %v2372_v56 = vpop.xlane.xlu1 %2371 }
0x18e7   :  { %v2374_v61 = vsel %vm596_vm9, %v2373_v23, %v2372_v56 }
0x18e8   :  { %v2417_v27 = vrot.slane %v2374_v61, 6 }
0x18ea   :  { %v2423_v58 = vsel %vm4204_vm15, %v2422_v62, %v2417_v27  ;;  %v2398_v14 = vpop.xlane.xlu0 %2397  ;;  %v2404_v5 = vpop.xlane.xlu1 %2403 }
0x18eb   :  { %v2411_v1 = vsel %vm594_vm8, %v2398_v14, %v2404_v5  ;;  %vm2581_vm8 = vcmask 188416  }
0x18ee   :  { %v2406_v63 = vpop.permute.xlu0 %2405 }
0x18ef   :  { %v2408_v59 = vsel %vm153_vm2, %v2406_v63, 0.0 }
0x18f0   :  { %2409 = vadd.xlane.f32.xlu1 %v2408_v59 }
0x197d   :  { %v2410_v29 = vpop.xlane.xlu1 %2409 }
0x197e   :  { %v2412_v60 = vsel %vm596_vm9, %v2411_v1, %v2410_v29  ;;  %vm3179_vm9 = vmmov 0  }
0x197f   :  { %v2420_v0 = vrot.slane %v2412_v60, 5  ;;  %2983 = vmatprep.mubr.msk.f32.mxu1 %vm3179_vm9, %v3158_v6  ;;  %2990 = vmatprep.mubr.msk.f32.mxu0 %vm3179_vm9, %v3158_v6 }
0x1981   :  { %v2424_v7 = vsel %vm918_vm13, %v2423_v58, %v2420_v0 }
0x1982   :  { %v2425_v10 = vmul.f32 0.0625, %v2424_v7 }
0x1984   :  { %v2426_v12 = vadd.f32 %v2425_v10, %v3959_v4 }
0x1986   :  { %v2427_v9 = vsel %vm2123_vm12, %v2426_v12, -inf }
0x1987   :  { %2428 = vmax.xlane.f32.xlu1 %v2427_v9 }
0x1a14   :  { %v2429_v2 = vpop.xlane.xlu1 %2428 }
0x1a15   :  { %v2430_v47 = vsub.f32 %v2426_v12, %v2429_v2 }
0x1a17   :  { %v2431_v18 = vmul.f32 1.442695, %v2430_v47 }
0x1a19   :  { %3130 = vpow2.f32 %v2431_v18 }
0x1a23   :  { %v3131_v19 = vpop.eup %3130 }
0x1a24   :  { %v2433_v34 = vsel %vm2123_vm12, %v3131_v19, 0.0 }
0x1a25   :  { %2434 = vadd.xlane.f32.xlu1 %v2433_v34 }
0x1ab2   :  { %v2435_v16 = vpop.xlane.xlu1 %2434 }
0x1ab3   :  { %3132 = vrcp.f32 %v2435_v16 }
0x1abd   :  { %v3133_v35 = vpop.eup %3132 }
0x1abe   :  { %v2437_v42 = vmul.f32 %v3133_v35, %v3131_v19 }
0x1ac0   :  { %2444 = vperm.xlu1 %3066, %v2437_v42   ;;  %2440 = vperm.xlu0 %3065, %v2437_v42  }
0x1ac4   :  { %3067 = vset.pattern.permute.xlu0 %v3176_v46 }
0x1ac5   :  { %2448 = vperm.xlu0 %3067, %v2437_v42  }
0x1b3f   :  { %v2441_v4 = vpop.permute.xlu0 %2440  ;;  %v2445_v20 = vpop.permute.xlu1 %2444 }
0x1b40   :  { %v2451_v40 = vsel %vm153_vm2, %v2441_v4, %v2445_v20 }
0x1b44   :  { %v2449_v41 = vpop.permute.xlu0 %2448 }
0x1b45   :  { %v2452_v36 = vsel %vm61_vm0, %v2451_v40, %v2449_v41 }
0x1b46   :  { %v2462_v21 = vrot.slane %v2452_v36, %v3311_v25  ;;  %v2482_v37 = vrot.slane %v2452_v36, %v3308_v24  ;;  %v2456_v15 = vrot.slane %v2452_v36, %v3390_v38  ;;  %v2502_v39 = vrot.slane %v2452_v36, %v3314_v26 }
0x1b48   :  { %2484 = vrot.lane.b32.xlu1 %v2482_v37, %s3170_s0  ;;  %2464 = vrot.lane.b32.xlu0 %v2462_v21, %s3167_s26  ;;  %v2457_v46 = vmul.f32 %v2456_v15, %v3875_v8  ;;  %v2458_v28 = vmul.f32 %v3873_v11, %v2456_v15 }
0x1b4c   :  { %2504 = vrot.lane.b32.xlu0 %v2502_v39, %s3172_s29 }
0x1bba   :  { %v2465_v31 = vpop.permute.xlu0 %2464  ;;  %v2485_v24 = vpop.permute.xlu1 %2484 }
0x1bbb   :  { %v2467_v33 = vmul.f32 %v2465_v31, %v3875_v8  ;;  %v2468_v25 = vmul.f32 %v3873_v11, %v2465_v31  ;;  %v2487_v43 = vmul.f32 %v2485_v24, %v3875_v8  ;;  %v2488_v44 = vmul.f32 %v3873_v11, %v2485_v24 }
0x1bbd   :  { %2473 = vrot.lane.b32.xlu0 %v2468_v25, %s3164_s24  ;;  %2471 = vrot.lane.b32.xlu1 %v2467_v33, %s3164_s24 }
0x1bbe   :  { %v2505_v22 = vpop.permute.xlu0 %2504 }
0x1bbf   :  { %v2507_v26 = vmul.f32 %v2505_v22, %v3875_v8  ;;  %v2508_v45 = vmul.f32 %v3873_v11, %v2505_v22 }
0x1bc1   :  { %2491 = vrot.lane.b32.xlu0 %v2487_v43, %s3169_s28  ;;  %2493 = vrot.lane.b32.xlu1 %v2488_v44, %s3169_s28 }
0x1bc5   :  { %2513 = vrot.lane.b32.xlu0 %v2508_v45, %s3171_s4  ;;  %2511 = vrot.lane.b32.xlu1 %v2507_v26, %s3171_s4  ;;  %v2624_v45 = vld [vmem:[%s4186_s8] sm:$0xff] }
0x1c2f   :  { %v2472_v30 = vpop.permute.xlu1 %2471  ;;  %v2474_v48 = vpop.permute.xlu0 %2473 }
0x1c30   :  { %v2477_v50 = vadd.f32 %v2472_v30, %v2457_v46  ;;  %v2478_v17 = vadd.f32 %v2474_v48, %v2458_v28  ;;  %v2625_v30 = vld [vmem:[%s4186_s8 + $0x8] sm:$0xff] }
0x1c31   :  { %v3019_v48 = vpack.c.bf16 %v2625_v30, %v2624_v45 }
0x1c33   :  { %v2494_v49 = vpop.permute.xlu1 %2493  ;;  %v2492_v13 = vpop.permute.xlu0 %2491 }
0x1c34   :  { %v2498_v32 = vadd.f32 %v2494_v49, %v2478_v17  ;;  %v2497_v52 = vadd.f32 %v2492_v13, %v2477_v50  ;;  %v3178_v49 = vmov 0.0|0.0   ;;  %v2626_v13 = vld [vmem:[%s4186_s8 + $0x10] sm:$0xff] }
0x1c35   :  { %3018 = vmatprep.subr.bf16.mxu1 %v3178_v49  ;;  %3021 = vmatprep.subr.bf16.mxu0 %v3178_v49 }
0x1c36   :  { %3020 = vmatpush3.bf16.msra.mxu1 %v3019_v48 }
0x1c37   :  { %v2512_v53 = vpop.permute.xlu1 %2511  ;;  %v2514_v51 = vpop.permute.xlu0 %2513  ;;  %2981 = vmatprep.subr.mxu1 %v3158_v6 }
0x1c38   :  { %v2517_v54 = vadd.f32 %v2512_v53, %v2497_v52  ;;  %v2518_v55 = vadd.f32 %v2514_v51, %v2498_v32 }
0x1c3a   :  { %v2519_v23 = vmul.f32 %v2517_v54, %v2517_v54  ;;  %v2520_v8 = vmul.f32 %v2518_v55, %v2518_v55  ;;  %2982 = vmatpush3.msra.mxu1 %v2626_v13 }
0x1c3b   :  { %3025 = vmatprep.subr.bf16.mxu1 %v3178_v49 }
0x1c3c   :  { %2525 = vrot.lane.b32.xlu0 %v2520_v8, %s3162_s5  ;;  %2523 = vrot.lane.b32.xlu1 %v2519_v23, %s3162_s5 }
0x1c40   :  { %2533 = vrot.lane.b32.xlu0 %v2520_v8, %s3163_s23  ;;  %2531 = vrot.lane.b32.xlu1 %v2519_v23, %s3163_s23 }
0x1cae   :  { %v2526_v11 = vpop.permute.xlu0 %2525  ;;  %v2524_v56 = vpop.permute.xlu1 %2523 }
0x1caf   :  { %v2530_v57 = vadd.f32 %v2526_v11, %v2520_v8  ;;  %v2529_v61 = vadd.f32 %v2524_v56, %v2519_v23 }
0x1cb2   :  { %v2534_v3 = vpop.permute.xlu0 %2533  ;;  %v2532_v27 = vpop.permute.xlu1 %2531 }
0x1cb3   :  { %v2538_v62 = vadd.f32 %v2534_v3, %v2530_v57  ;;  %v2537_v58 = vadd.f32 %v2532_v27, %v2529_v61 }
0x1cb5   :  { %2543 = vrot.lane.b32.xlu0 %v2538_v62, %s3165_s25  ;;  %2541 = vrot.lane.b32.xlu1 %v2537_v58, %s3165_s25 }
0x1cb9   :  { %2549 = vrot.lane.b32.xlu0 %v2538_v62, %s3166_s2  ;;  %2547 = vrot.lane.b32.xlu1 %v2537_v58, %s3166_s2 }
0x1d27   :  { %v2544_v14 = vpop.permute.xlu0 %2543  ;;  %v2542_v63 = vpop.permute.xlu1 %2541 }
0x1d28   :  { %v2554_v59 = vsel %vm153_vm2, %v2538_v62, %v2544_v14  ;;  %v2553_v5 = vsel %vm153_vm2, %v2537_v58, %v2542_v63  ;;  %v2702_v63 = vld [vmem:[%s4188_s10] sm:$0xff] }
0x1d2b   :  { %v2550_v1 = vpop.permute.xlu0 %2549  ;;  %v2548_v29 = vpop.permute.xlu1 %2547 }
0x1d2c   :  { %v2556_v60 = vsel %vm61_vm0, %v2554_v59, %v2550_v1  ;;  %v2555_v0 = vsel %vm61_vm0, %v2553_v5, %v2548_v29  ;;  %v2703_v59 = vld [vmem:[%s4188_s10 + $0x8] sm:$0x3]  ;;  %v2783_v1 = vld [vmem:[%s4190_s12] sm:$0xff] }
0x1d2d   :  { %v2558_v7 = vadd.f32 1.0, %v2556_v60  ;;  %v2557_v10 = vadd.f32 1.0, %v2555_v0  ;;  %v2566_v12 = vadd.f32 1e-09, %v2556_v60  ;;  %v2565_v9 = vadd.f32 1e-09, %v2555_v0 }
0x1d2e   :  { %v3022_v5 = vpack.c.bf16 %v2703_v59, %v2702_v63  ;;  %v2784_v29 = vld [vmem:[%s4190_s12 + $0x8] sm:$0xff] }
0x1d2f   :  { %3134 = vrcp.f32 %v2558_v7 }
0x1d30   :  { %3136 = vrcp.f32 %v2557_v10  ;;  %3024 = vmatpush3.bf16.msk.msra.mxu0 %vm3023_vm7, %v3022_v5 }
0x1d31   :  { %3138 = vrsqrt.f32 %v2566_v12 }
0x1d32   :  { %3140 = vrsqrt.f32 %v2565_v9 }
0x1d39   :  { %v3135_v2 = vpop.eup %3134 }
0x1d3a   :  { %v2562_v47 = vmul.f32 %v3135_v2, %v2556_v60  ;;  %v3137_v18 = vpop.eup %3136  ;;  %v3026_v60 = vpack.c.bf16 %v2784_v29, %v2783_v1  ;;  %v2785_v2 = vld [vmem:[%s4190_s12 + $0x10] sm:$0xff] }
0x1d3b   :  { %v2560_v34 = vmul.f32 %v3137_v18, %v2555_v0  ;;  %v3139_v16 = vpop.eup %3138  ;;  %v2627_v0 = vld [vmem:[%s4187_s9] sm:$0x1] }
0x1d3c   :  { %v2564_v19 = vmul.f32 %v2562_v47, %v2518_v55  ;;  %v3141_v4 = vpop.eup %3140  ;;  %v2704_v47 = vld [vmem:[%s4189_s11] sm:$0x1] }
0x1d3d   :  { %v2563_v42 = vmul.f32 %v2560_v34, %v2517_v54 }
0x1d3e   :  { %v2570_v35 = vmul.f32 %v3139_v16, %v2564_v19  ;;  %v2786_v16 = vld [vmem:[%s4191_s13] sm:$0x1] }
0x1d3f   :  { %v2569_v40 = vmul.f32 %v3141_v4, %v2563_v42 }
0x1d40   :  { %v2572_v20 = vsel %vm543_vm3, %v2570_v35, 0.0 }
0x1d41   :  { %v2571_v41 = vsel %vm543_vm3, %v2569_v40, 0.0 }
0x1d42   :  { %v2573_v36 = vadd.f32 %v2572_v20, %v2571_v41 }
0x1d44   :  { %v2574_v21 = vrot.slane %v2573_v36, 4 }
0x1d46   :  { %v2575_v37 = vadd.f32 %v2574_v21, %v2573_v36 }
0x1d48   :  { %v2576_v15 = vrot.slane %v2575_v37, 2 }
0x1d4a   :  { %v2577_v46 = vadd.f32 %v2576_v15, %v2575_v37 }
0x1d4c   :  { %v2578_v28 = vrot.slane %v2577_v46, 1 }
0x1d4e   :  { %v2579_v39 = vadd.f32 %v2578_v28, %v2577_v46 }
0x1d50   :  { %v2580_v31 = vmul.f32 0.0625, %v2579_v39  ;;  %v2872_v39 = vld [vmem:[%s4179_s1] sm:$0xff] }
0x1d52   :  { %2582 = vst.msk [vmem:[%s4192_s14] sm:$0x1] %vm2581_vm8, %v2580_v31  ;;  %v2583_v33 = vmul.f32 %v2580_v31, %v2580_v31 }
0x1d54   :  { %2588 = vrot.lane.b32.xlu0 %v2583_v33, %s3162_s5  ;;  %v2584_v25 = vsel %vm153_vm2, %v2583_v33, 0.0 }
0x1d55   :  { %2585 = vadd.xlane.f32.xlu1 %v2584_v25 }
0x1d66   :  { %2594 = vrot.lane.b32.xlu1 %v2583_v33, %s3163_s23 }
0x1dc6   :  { %v2589_v24 = vpop.permute.xlu0 %2588 }
0x1dc7   :  { %v2591_v43 = vsel %vm153_vm2, %v2589_v24, 0.0 }
0x1dc8   :  { %2592 = vadd.xlane.f32.xlu0 %v2591_v43 }
0x1de2   :  { %v2586_v44 = vpop.xlane.xlu1 %2585 }
0x1de6   :  { %v2595_v22 = vpop.permute.xlu1 %2594 }
0x1de7   :  { %v2597_v26 = vsel %vm153_vm2, %v2595_v22, 0.0 }
0x1de8   :  { %2598 = vadd.xlane.f32.xlu0 %v2597_v26 }
0x1e55   :  { %v2593_v50 = vpop.xlane.xlu0 %2592 }
0x1e56   :  { %v2600_v17 = vmax.f32 %v2586_v44, %v2593_v50 }
0x1e75   :  { %v2599_v32 = vpop.xlane.xlu0 %2598 }
0x1e76   :  { %v2601_v52 = vmax.f32 %v2600_v17, %v2599_v32 }
0x1e78   :  { %vm2602_vm13 = vcmp.ge.f32.partialorder %v2586_v44, %v2601_v52  ;;  %vm2607_vm5 = vcmp.ge.f32.partialorder %v2593_v50, %v2601_v52  ;;  %vm2615_vm6 = vcmp.ge.f32.partialorder %v2599_v32, %v2601_v52 }
0x1e79   :  { %v2923_v53 = vsel %vm2602_vm13, 1.0, %v3158_v6  ;;  %v2924_v51 = vsel %vm2607_vm5, 1.0, %v3158_v6  ;;  %v2925_v57 = vsel %vm2615_vm6, 1.0, %v3158_v6 }
0x1e7a   :  { %v2610_v54 = vsub.f32 1.0, %v2923_v53  ;;  %v2614_v55 = vadd.f32 %v2924_v51, %v2923_v53  ;;  %v2605_v61 = vmul.f32 %v2923_v53, %v2580_v31 }
0x1e7c   :  { %v2611_v23 = vmax.f32 %v2610_v54, 0.0  ;;  %v2618_v8 = vsub.f32 1.0, %v2614_v55 }
0x1e7e   :  { %v2612_v11 = vmul.f32 %v2924_v51, %v2611_v23  ;;  %v2619_v56 = vmax.f32 %v2618_v8, 0.0 }
0x1e80   :  { %v2613_v3 = vmul.f32 %v2612_v11, %v2580_v31  ;;  %v2620_v27 = vmul.f32 %v2925_v57, %v2619_v56 }
0x1e82   :  { %v2621_v62 = vmul.f32 %v2620_v27, %v2580_v31  ;;  %v2622_v58 = vsel %vm153_vm2, %v2605_v61, %v2613_v3  ;;  %vm2705_vm2 = vcmask 80896   ;;  %v2873_v31 = vld [vmem:[%s4179_s1 + $0x8] sm:$0xff] }
0x1e84   :  { %v2623_v14 = vsel %vm61_vm0, %v2622_v58, %v2621_v62 }
0x1e85   :  { %2984 = vmatmul.mubr.msk.f32.vlgmr.msra.gmra.mrb[6].mxu1 %vm543_vm3, %v2623_v14 }
0x1e86   :  { %2999 = vmatprep.mubr.msk.f32.mxu1 %vm3179_vm9, %v3158_v6  ;;  %3027 = vmatpush3.bf16.msra.mxu1 %v3026_v60 }
0x1e87   :  { %2997 = vmatprep.subr.mxu1 %v3158_v6 }
0x1e8a   :  { %2998 = vmatpush3.msra.mxu1 %v2785_v2 }
0x1f58   :  { %v2697_v7 = vpop.f32.mrb[6].mxu1 }
0x1f59   :  { %v2698_v10 = vadd.f32 %v2697_v7, %v2627_v0  ;;  %v2985_v12 = vpop.f32.mrb[7].mxu1 }
0x1f5b   :  { %v2701_v9 = vmax.f32 %v2698_v10, 0.0 }
0x1f5d   :  { %2991 = vmatmul.mubr.msk.f32.vlgmr.msra.gmra.mrb[4].mxu0 %vm2705_vm2, %v2701_v9 }
0x2030   :  { %v2778_v6 = vpop.f32.mrb[4].mxu0 }
0x2031   :  { %v2779_v18 = vadd.f32 %v2778_v6, %v2704_v47  ;;  %v2992_v19 = vpop.f32.mrb[5].mxu0 }
0x2033   :  { %v2782_v34 = vmax.f32 %v2779_v18, 0.0 }
0x2035   :  { %3000 = vmatmul.mubr.msk.f32.vlgmr.msra.gmra.mrb[8].mxu1 %vm543_vm3, %v2782_v34 }
0x2108   :  { %v2856_v35 = vpop.f32.mrb[8].mxu1 }
0x2109   :  { %v2857_v42 = vadd.f32 %v2856_v35, %v2786_v16  ;;  %v3001_v4 = vpop.f32.mrb[9].mxu1 }
0x210b   :  { %v2861_v20 = vsel %vm2860_vm10, %v2857_v42, -inf }
0x210c   :  { %2862 = vmax.xlane.f32.xlu0 %v2861_v20 }
0x2199   :  { %v2863_v40 = vpop.xlane.xlu0 %2862 }
0x219a   :  { %v2864_v41 = vsub.f32 %v2857_v42, %v2863_v40 }
0x219c   :  { %v2865_v36 = vmul.f32 1.442695, %v2864_v41 }
0x219e   :  { %3142 = vpow2.f32 %v2865_v36 }
0x21a8   :  { %v3143_v21 = vpop.eup %3142 }
0x21a9   :  { %v2867_v37 = vsel %vm2860_vm10, %v3143_v21, 0.0 }
0x21aa   :  { %2868 = vadd.xlane.f32.xlu0 %v2867_v37 }
0x2237   :  { %v2869_v15 = vpop.xlane.xlu0 %2868 }
0x2238   :  { %3144 = vrcp.f32 %v2869_v15 }
0x2242   :  { %v3145_v46 = vpop.eup %3144 }
0x2243   :  { %v2871_v28 = vmul.f32 %v3145_v46, %v3143_v21 }
0x2245   :  { %v2877_v33 = vrot.slane %v2871_v28, %v3390_v38 }
0x2247   :  { %v2878_v25 = vsub.f32 %v2872_v39, %v2877_v33  ;;  %v2879_v24 = vsub.f32 %v2873_v31, %v2877_v33 }
0x2249   :  { %v2880_v43 = vmul.f32 %v2878_v25, %v2878_v25  ;;  %v2881_v44 = vmul.f32 %v2879_v24, %v2879_v24 }
0x224b   :  { %v2882_v22 = vsel %vm61_vm0, %v2880_v43, 0.0  ;;  %v2883_v26 = vsel %vm61_vm0, %v2881_v44, 0.0 }
0x224c   :  { %v2884_v45 = vadd.f32 %v2883_v26, %v2882_v22 }
0x224e   :  { %2885 = vadd.xlane.f32.xlu0 %v2884_v45 }
0x22db   :  { %v2886_v30 = vpop.xlane.xlu0 %2885 }
0x22dc   :  { %v2887_v48 = vrot.slane %v2886_v30, 4 }
0x22de   :  { %v2888_v49 = vadd.f32 %v2887_v48, %v2886_v30 }
0x22e0   :  { %v2889_v13 = vrot.slane %v2888_v49, 2 }
0x22e2   :  { %v2890_v50 = vadd.f32 %v2889_v13, %v2888_v49 }
0x22e4   :  { %v2891_v17 = vrot.slane %v2890_v50, 1 }
0x22e6   :  { %v2892_v32 = vadd.f32 %v2891_v17, %v2890_v50 }
0x22e8   :  { %3028 = vpush %v2892_v32 }
0x2319   :  { %s3029_s1 = spop %3028 }
0x231a   :  { %2895 = sst [smem:[#allocation2]] %s3029_s1 }
0x231b   :  { %3155 = shalt.err (!%p3152_p2)
}
0x231c   :  { %s3181_s23 = smov [#allocation2]  }
0x231d   :  { %2905 = dma.smem_to_hbm %s3181_s23, 16, %s4193_s15, [#allocation3]  }
0x231e   :  { %3156 = dma.done.wait [#allocation3], 16  }
0x231f   :  { %3157 = vsyncadd [#allocation3], 4294967280 }
0x2320   :  { %2911 = sfence }
0x2321   :  { %2912 = vsyncpa [#allocation3], 1 }

</bundles_post_ra>
